<compile_context>
chip_gen: v7x
topology: tpu7x:2x2x1
jax: 0.10.0
libtpu: 0.0.40
codegen_flags: <defaults>
</compile_context>

<pallas_src>
import functools

import jax
import jax.numpy as jnp
from jax.experimental import pallas as pl
from jax.experimental.pallas import tpu as pltpu


KSIZE = 3
KK = KSIZE * KSIZE     # 9 taps
PAD = KSIZE // 2       # padding = 1


def _fused_dcn_kernel(coords_ref, xpad_ref, xmat_ref, w_off_ref, b_off_ref,
                      w_dcn_ref, scale_ref, shift_ref, out_ref, slab_ref,
                      *, H, W, C_in, tile, n_tiles):
    """Fused DCNv2 + folded BN + ReLU for one (batch, spatial-tile) grid point.

    coords_ref : (2, T) f32   output-pixel (row, col) coordinates of this tile
    xpad_ref   : (1, C_in, HW + 2*(W+1)) f32   zero-padded flat input
    xmat_ref   : (1, C_in*H, W) bf16           input viewed as (C_in*H, W)
    w_off_ref  : (27, 9*C_in) f32   predictor weight, de-interleaved rows,
                                    tap-major columns
    b_off_ref  : (27, 1)  f32       predictor bias (de-interleaved)
    w_dcn_ref  : (C_out, 9*C_in) f32 main conv weight, tap-major columns
    scale_ref, shift_ref : (C_out, 1) f32  folded conv-bias + inference BN
    out_ref    : (1, C_out, T)
    slab_ref   : (9*C_in, T) f32 VMEM scratch, reused for both tap slabs
    """
    P = W + PAD                                   # zero-pad width of xpad
    h_f = coords_ref[0:1, :]                      # (1, T) f32 output rows
    w_f = coords_ref[1:2, :]                      # (1, T) f32 output cols

    # ----------------- pass A: offset/mask predictor (plain 3x3 conv) -------
    # Static taps = contiguous windows of the zero-padded flat input; the
    # wrap-across-rows aliasing of the flat shift is removed by the per-tap
    # boundary mask (validity multiplied into the value, never afterwards).
    if n_tiles == 1:
        xp = xpad_ref[0]                          # (C_in, HW + 2P), this tile
    for k in range(KK):
        dy, dx = k // KSIZE - 1, k % KSIZE - 1
        d = dy * W + dx
        if n_tiles == 1:
            tap = xp[:, P + d:P + d + tile]                         # static slice
        else:
            start = P + d + pl.program_id(1) * tile
            tap = xpad_ref[0, :, pl.ds(start, tile)]                # (C_in, T)
        valid = (((h_f + float(dy)) >= 0.0) & ((h_f + float(dy)) <= float(H - 1)) &
                 ((w_f + float(dx)) >= 0.0) & ((w_f + float(dx)) <= float(W - 1)))
        slab_ref[k * C_in:(k + 1) * C_in, :] = tap * valid.astype(jnp.float32)

    # Single K = 9*C_in contraction for all 27 predictor channels.
    om = (jnp.dot(w_off_ref[...], slab_ref[...],
                  preferred_element_type=jnp.float32) + b_off_ref[...])   # (27, T)
    off_y = om[0:KK, :]                           # de-interleaved host-side
    off_x = om[KK:2 * KK, :]
    mmask = jax.nn.sigmoid(om[2 * KK:3 * KK, :])  # (9, T), one EUP slab

    # ----------------- pass B: modulated deformable 3x3 conv ----------------
    x_mat = xmat_ref[0]                           # (C_in*H, W) bf16
    row_ids = jax.lax.broadcasted_iota(jnp.int32, (H, tile), 0)
    col_ids = jax.lax.broadcasted_iota(jnp.int32, (W, tile), 0)

    for k in range(KK):
        dy, dx = k // KSIZE - 1, k % KSIZE - 1
        py = h_f + float(dy) + off_y[k:k + 1, :]                    # (1, T)
        px = w_f + float(dx) + off_x[k:k + 1, :]
        y0 = jnp.floor(py)
        x0 = jnp.floor(px)
        ly, lx = py - y0, px - x0
        hy, hx = 1.0 - ly, 1.0 - lx
        y0i = y0.astype(jnp.int32)                # exact: y0/x0 are integral
        x0i = x0.astype(jnp.int32)
        # Separable bilinear one-hots.  Out-of-image corners match no row/col,
        # which reproduces zero padding with no flat-index aliasing.
        r_y = (jnp.where(row_ids == y0i, hy, 0.0) +
               jnp.where(row_ids == y0i + 1, ly, 0.0))              # (H, T)
        r_x = (jnp.where(col_ids == x0i, hx, 0.0) +
               jnp.where(col_ids == x0i + 1, lx, 0.0))              # (W, T)
        # Gather on the MXU: (C_in*H, W) @ (W, T), bf16 operands, f32 acc.
        g = jnp.dot(x_mat, r_x.astype(jnp.bfloat16),
                    preferred_element_type=jnp.float32)             # (C_in*H, T)
        g = g.reshape(C_in, H, tile)
        s = jnp.sum(g * r_y[None, :, :], axis=1)                    # (C_in, T)
        slab_ref[k * C_in:(k + 1) * C_in, :] = s * mmask[k:k + 1, :]

    # Single K = 9*C_in contraction, folded bias+BN, ReLU, lane-dense store.
    acc = jnp.dot(w_dcn_ref[...], slab_ref[...],
                  preferred_element_type=jnp.float32)               # (C_out, T)
    acc = acc * scale_ref[...] + shift_ref[...]
    out_ref[0, :, :] = jnp.maximum(acc, 0.0).astype(out_ref.dtype)


def _vmem_capacity_bytes():
    try:
        return int(pltpu.get_tpu_info().vmem_capacity_bytes)
    except Exception:
        return 64 * 2 ** 20          # conservative (v7x per-TensorCore)


def _pick_tile(hw, c_in, c_out, h, w, budget):
    """Largest lane-dense spatial tile whose estimated live VMEM fits budget."""
    resident = (2 * c_in * (hw + 2 * (w + PAD)) * 4        # x_pad f32, dbl-buffered
                + 2 * c_in * h * max(w, 128) * 2)          # x_mat bf16, dbl-buffered
    cands = sorted({t for t in (4096, 2048, 1024, 512, 256, 128)
                    if t <= hw and hw % t == 0} | {hw}, reverse=True)
    for t in cands:
        per_tile = (2 * 8 * t * 4                          # coords block
                    + 2 * max(c_out, 8) * t * 4            # output block
                    + KK * c_in * t * 4                    # tap/sample slab scratch
                    + 2 * c_in * h * t * 4                 # gather-result transients
                    + (h + w + 64) * t * 4)                # Ry/Rx/om/mask transients
        if resident + per_tile <= budget:
            return t
    return cands[-1]


def deform_conv_forward(x_nchw, params, *, tile_hw=None):
    """DeformConv forward: DCNv2(3x3, s1, p1, deform_groups=1) -> BN -> ReLU.

    BatchNorm runs in inference mode with the provided running stats.
    # TODO(synk): training-mode BatchNorm (batch statistics) is not implemented.
    """
    N, C_in, H, W = x_nchw.shape
    HW = H * W
    P = W + PAD
    C_out = params["w_dcn"].shape[0]
    dt = x_nchw.dtype

    vmem_cap = _vmem_capacity_bytes()
    vmem_limit = min(int(vmem_cap * 0.75), 100 * 2 ** 20)
    if tile_hw is None:
        tile_hw = _pick_tile(HW, C_in, C_out, H, W, int(vmem_limit * 0.6))
    if HW % tile_hw != 0 or (tile_hw % 128 != 0 and tile_hw != HW):
        tile_hw = HW                       # fall back to full-spatial tiles
    n_tiles = HW // tile_hw
    grid = (N, n_tiles)

    # NCHW -> flat views (pure reshapes of the same contiguous buffer).
    x_flat = x_nchw.reshape(N, C_in, HW)
    # Zero-padded flat view so every static predictor tap window is in range.
    x_pad = jnp.pad(x_flat, ((0, 0), (0, 0), (P, P)))
    # (C_in*H, W) view for the separable deformable gather, bf16 for the MXU.
    x_mat = x_nchw.astype(jnp.bfloat16).reshape(N, C_in * H, W)
    # TODO(synk): for very large C_in*H*W, keep x in memory_space=pl.ANY and
    # pipeline HW-chunks of the gather via manual DMA instead of holding the
    # whole feature map resident in VMEM.

    # Precomputed output-pixel (row, col) coordinates (avoids in-kernel div/mod).
    pix = jnp.arange(HW, dtype=jnp.int32)
    coords = jnp.stack([pix // W, pix % W]).astype(jnp.float32)      # (2, H*W)

    # De-interleave predictor channels: [y0,x0,y1,x1,...,m0..m8] -> [y*, x*, m*].
    perm = jnp.concatenate([jnp.arange(0, 2 * KK, 2),
                            jnp.arange(1, 2 * KK, 2),
                            jnp.arange(2 * KK, 3 * KK)])
    # Weights as (out, tap-major 9*C_in) matrices: column k*C_in + c <-> tap k,
    # input channel c (tap k = ki*3 + kj).
    w_off_mat = jnp.transpose(params["w_off"][perm], (0, 2, 3, 1)
                              ).reshape(3 * KK, KK * C_in)
    b_off_col = params["b_off"][perm].reshape(3 * KK, 1)
    w_dcn_mat = jnp.transpose(params["w_dcn"], (0, 2, 3, 1)
                              ).reshape(C_out, KK * C_in)

    # Fold DCN bias + inference BatchNorm into per-channel scale/shift.
    inv_std = 1.0 / jnp.sqrt(params["bn_var"] + params["bn_eps"])
    scale_v = params["bn_gamma"] * inv_std
    shift_v = scale_v * (params["b_dcn"] - params["bn_mean"]) + params["bn_beta"]
    scale = scale_v.reshape(C_out, 1).astype(jnp.float32)
    shift = shift_v.reshape(C_out, 1).astype(jnp.float32)

    kernel = functools.partial(_fused_dcn_kernel, H=H, W=W, C_in=C_in,
                               tile=tile_hw, n_tiles=n_tiles)

    flops = N * n_tiles * (
        KK * 2 * (C_in * H) * W * tile_hw          # separable gather matmuls
        + 2 * (3 * KK) * (KK * C_in) * tile_hw     # predictor contraction
        + 2 * C_out * (KK * C_in) * tile_hw)       # main contraction
    bytes_accessed = (4 * N * C_in * (HW + 2 * P)  # x_pad
                      + 2 * N * C_in * HW          # x_mat (bf16)
                      + 4 * N * C_out * HW         # output
                      + 4 * 2 * HW)                # coords

    # TODO(synk): single-buffer (pl.Buffered(1)) the batch-constant x / weight
    # blocks on VMEM-tight chips once pipeline_mode tuning is validated.
    out_flat = pl.pallas_call(
        kernel,
        out_shape=jax.ShapeDtypeStruct((N, C_out, HW), dt),
        grid_spec=pltpu.PrefetchScalarGridSpec(
            num_scalar_prefetch=0,
            grid=grid,
            in_specs=[
                pl.BlockSpec((2, tile_hw), lambda b, j: (0, j)),
                pl.BlockSpec((1, C_in, HW + 2 * P), lambda b, j: (b, 0, 0)),
                pl.BlockSpec((1, C_in * H, W), lambda b, j: (b, 0, 0)),
                pl.BlockSpec((3 * KK, KK * C_in), lambda b, j: (0, 0)),
                pl.BlockSpec((3 * KK, 1), lambda b, j: (0, 0)),
                pl.BlockSpec((C_out, KK * C_in), lambda b, j: (0, 0)),
                pl.BlockSpec((C_out, 1), lambda b, j: (0, 0)),
                pl.BlockSpec((C_out, 1), lambda b, j: (0, 0)),
            ],
            out_specs=pl.BlockSpec((1, C_out, tile_hw), lambda b, j: (b, 0, j)),
            scratch_shapes=[pltpu.VMEM((KK * C_in, tile_hw), jnp.float32)],
        ),
        compiler_params=pltpu.CompilerParams(
            dimension_semantics=("parallel", "parallel"),
            vmem_limit_bytes=vmem_limit),
        cost_estimate=pl.CostEstimate(
            flops=int(flops),
            transcendentals=int(KK * HW * N),
            bytes_accessed=int(bytes_accessed)),
    )(coords, x_pad, x_mat, w_off_mat, b_off_col, w_dcn_mat, scale, shift)

    return out_flat.reshape(N, C_out, H, W)


# ----------------------------- pure-JAX reference -----------------------------

def _bilinear_sample(x, py, px):
    """x: (N, C, H, W); py/px: (N, H, W) float coords; zero padding outside."""
    N, C, H, W = x.shape
    x_flat = x.reshape(N, C, H * W)
    y0 = jnp.floor(py)
    x0 = jnp.floor(px)
    ly, lx = py - y0, px - x0
    hy, hx = 1.0 - ly, 1.0 - lx
    out = jnp.zeros((N, C, H, W), x.dtype)
    for cy, cx, wgt in ((y0, x0, hy * hx), (y0, x0 + 1.0, hy * lx),
                        (y0 + 1.0, x0, ly * hx), (y0 + 1.0, x0 + 1.0, ly * lx)):
        valid = ((cy >= 0) & (cy <= H - 1) & (cx >= 0) & (cx <= W - 1))
        cyi = jnp.clip(cy, 0, H - 1).astype(jnp.int32)
        cxi = jnp.clip(cx, 0, W - 1).astype(jnp.int32)
        idx = (cyi * W + cxi).reshape(N, 1, H * W)
        v = jnp.take_along_axis(x_flat, jnp.broadcast_to(idx, (N, C, H * W)), axis=2)
        out = out + v.reshape(N, C, H, W) * (wgt * valid.astype(x.dtype))[:, None]
    return out


def reference_deform_conv(x, params):
    N, C_in, H, W = x.shape
    C_out = params["w_dcn"].shape[0]
    hp = jax.lax.Precision.HIGHEST
    om = jax.lax.conv_general_dilated(
        x, params["w_off"], window_strides=(1, 1), padding=((1, 1), (1, 1)),
        dimension_numbers=("NCHW", "OIHW", "NCHW"), precision=hp)
    om = om + params["b_off"][None, :, None, None]
    offs, mask = om[:, :2 * KK], jax.nn.sigmoid(om[:, 2 * KK:])
    hh, ww = jnp.meshgrid(jnp.arange(H, dtype=jnp.float32),
                          jnp.arange(W, dtype=jnp.float32), indexing="ij")
    acc = jnp.zeros((N, C_out, H, W), jnp.float32)
    for k in range(KK):
        ki, kj = k // KSIZE, k % KSIZE
        py = hh[None] + (ki - 1) + offs[:, 2 * k]
        px = ww[None] + (kj - 1) + offs[:, 2 * k + 1]
        val = _bilinear_sample(x, py, px) * mask[:, k][:, None]
        acc = acc + jnp.einsum("oi,nihw->nohw", params["w_dcn"][:, :, ki, kj],
                               val, precision=hp)
    acc = acc + params["b_dcn"][None, :, None, None]
    inv_std = 1.0 / jnp.sqrt(params["bn_var"] + params["bn_eps"])
    y = ((acc - params["bn_mean"][None, :, None, None])
         * (params["bn_gamma"] * inv_std)[None, :, None, None]
         + params["bn_beta"][None, :, None, None])
    return jnp.maximum(y, 0.0)


if __name__ == "__main__":
    # Small shapes consistent with the module: chi=4, cho=4, 16x16 feature map.
    N, C_in, H, W = 2, 4, 16, 16
    C_out = 4

    key = jax.random.PRNGKey(0)
    ks = jax.random.split(key, 9)
    x = jax.random.normal(ks[0], (N, C_in, H, W), dtype=jnp.float32)
    params = {
        # offset/mask predictor conv: C_in -> 27 (18 offsets + 9 mask logits)
        "w_off": jax.random.normal(ks[1], (3 * KK, C_in, KSIZE, KSIZE), jnp.float32) * 0.1,
        "b_off": jax.random.normal(ks[2], (3 * KK,), jnp.float32) * 0.1,
        # main DCN weight/bias
        "w_dcn": jax.random.normal(ks[3], (C_out, C_in, KSIZE, KSIZE), jnp.float32) * 0.1,
        "b_dcn": jax.random.normal(ks[4], (C_out,), jnp.float32) * 0.1,
        # BatchNorm2d(cho) params + running stats (inference mode)
        "bn_gamma": 1.0 + 0.1 * jax.random.normal(ks[5], (C_out,), jnp.float32),
        "bn_beta": 0.1 * jax.random.normal(ks[6], (C_out,), jnp.float32),
        "bn_mean": 0.1 * jax.random.normal(ks[7], (C_out,), jnp.float32),
        "bn_var": jax.random.uniform(ks[8], (C_out,), jnp.float32, 0.5, 1.5),
        "bn_eps": 1e-5,
    }

    out = deform_conv_forward(x, params)
    out = jax.block_until_ready(out)

    ref = reference_deform_conv(x, params)
    assert out.shape == (N, C_out, H, W)
    max_diff = float(jnp.max(jnp.abs(out - ref)))
    assert jnp.allclose(out, ref, atol=2e-2, rtol=2e-2), (
        f"mismatch vs reference: max abs diff {max_diff}")

    print("KERNEL_OK")
</pallas_src>

<mosaic_0001>
module attributes {stable_mosaic.version = 11 : i64} {
  func.func @_fused_dcn_kernel(%arg0: i32, %arg1: i32, %arg2: memref<2x256xf32, #tpu.memory_space<vmem>>, %arg3: memref<1x4x290xf32, #tpu.memory_space<vmem>>, %arg4: memref<1x64x16xbf16, #tpu.memory_space<vmem>>, %arg5: memref<27x36xf32, #tpu.memory_space<vmem>>, %arg6: memref<27x1xf32, #tpu.memory_space<vmem>>, %arg7: memref<4x36xf32, #tpu.memory_space<vmem>>, %arg8: memref<4x1xf32, #tpu.memory_space<vmem>>, %arg9: memref<4x1xf32, #tpu.memory_space<vmem>>, %arg10: memref<1x4x256xf32, #tpu.memory_space<vmem>>, %arg11: memref<36x256xf32, #tpu.memory_space<vmem>>) attributes {dimension_semantics = [#tpu.dimension_semantics<parallel>, #tpu.dimension_semantics<parallel>], iteration_bounds = array<i64: 2, 1>, scalar_prefetch = 0 : i64, scratch_operands = 1 : i64, tpu.core_type = #tpu.core_type<tc>, window_params = [{transform_indices = @transform_0, window_bounds = array<i64: 2, 256>}, {transform_indices = @transform_1, window_bounds = array<i64: 1, 4, 290>}, {transform_indices = @transform_2, window_bounds = array<i64: 1, 64, 16>}, {pipeline_mode = #tpu.pipeline_mode<synchronous>, transform_indices = @transform_3, window_bounds = array<i64: 27, 36>}, {pipeline_mode = #tpu.pipeline_mode<synchronous>, transform_indices = @transform_4, window_bounds = array<i64: 27, 1>}, {pipeline_mode = #tpu.pipeline_mode<synchronous>, transform_indices = @transform_5, window_bounds = array<i64: 4, 36>}, {pipeline_mode = #tpu.pipeline_mode<synchronous>, transform_indices = @transform_6, window_bounds = array<i64: 4, 1>}, {pipeline_mode = #tpu.pipeline_mode<synchronous>, transform_indices = @transform_7, window_bounds = array<i64: 4, 1>}, {transform_indices = @transform_8, window_bounds = array<i64: 1, 4, 256>}]} {
    %c0 = arith.constant 0 : index
    %c0_0 = arith.constant 0 : index
    %0 = vector.load %arg2[%c0, %c0_0] : memref<2x256xf32, #tpu.memory_space<vmem>>, vector<1x256xf32>
    %c1 = arith.constant 1 : index
    %c0_1 = arith.constant 0 : index
    %1 = vector.load %arg2[%c1, %c0_1] : memref<2x256xf32, #tpu.memory_space<vmem>>, vector<1x256xf32>
    %c0_2 = arith.constant 0 : index
    %c0_3 = arith.constant 0 : index
    %c0_4 = arith.constant 0 : index
    %2 = vector.load %arg3[%c0_2, %c0_3, %c0_4] : memref<1x4x290xf32, #tpu.memory_space<vmem>>, vector<1x4x290xf32>
    %3 = vector.shape_cast %2 : vector<1x4x290xf32> to vector<4x290xf32>
    %4 = vector.extract_strided_slice %3 {offsets = [0, 0], sizes = [4, 256], strides = [1, 1]} : vector<4x290xf32> to vector<4x256xf32>
    %cst = arith.constant -1.000000e+00 : f32
    %5 = vector.broadcast %cst : f32 to vector<1x256xf32>
    %6 = arith.addf %0, %5 : vector<1x256xf32>
    %cst_5 = arith.constant 0.000000e+00 : f32
    %7 = vector.broadcast %cst_5 : f32 to vector<1x256xf32>
    %8 = arith.cmpf oge, %6, %7 : vector<1x256xf32>
    %cst_6 = arith.constant -1.000000e+00 : f32
    %9 = vector.broadcast %cst_6 : f32 to vector<1x256xf32>
    %10 = arith.addf %0, %9 : vector<1x256xf32>
    %cst_7 = arith.constant 1.500000e+01 : f32
    %11 = vector.broadcast %cst_7 : f32 to vector<1x256xf32>
    %12 = arith.cmpf ole, %10, %11 : vector<1x256xf32>
    %13 = arith.andi %8, %12 : vector<1x256xi1>
    %cst_8 = arith.constant -1.000000e+00 : f32
    %14 = vector.broadcast %cst_8 : f32 to vector<1x256xf32>
    %15 = arith.addf %1, %14 : vector<1x256xf32>
    %cst_9 = arith.constant 0.000000e+00 : f32
    %16 = vector.broadcast %cst_9 : f32 to vector<1x256xf32>
    %17 = arith.cmpf oge, %15, %16 : vector<1x256xf32>
    %18 = arith.andi %13, %17 : vector<1x256xi1>
    %cst_10 = arith.constant -1.000000e+00 : f32
    %19 = vector.broadcast %cst_10 : f32 to vector<1x256xf32>
    %20 = arith.addf %1, %19 : vector<1x256xf32>
    %cst_11 = arith.constant 1.500000e+01 : f32
    %21 = vector.broadcast %cst_11 : f32 to vector<1x256xf32>
    %22 = arith.cmpf ole, %20, %21 : vector<1x256xf32>
    %23 = arith.andi %18, %22 : vector<1x256xi1>
    %24 = arith.extui %23 : vector<1x256xi1> to vector<1x256xi32>
    %25 = arith.sitofp %24 : vector<1x256xi32> to vector<1x256xf32>
    %26 = vector.broadcast %25 : vector<1x256xf32> to vector<4x256xf32>
    %27 = arith.mulf %4, %26 : vector<4x256xf32>
    %c0_12 = arith.constant 0 : index
    %c0_13 = arith.constant 0 : index
    %28 = vector.load %arg11[%c0_12, %c0_13] : memref<36x256xf32, #tpu.memory_space<vmem>>, vector<4x256xf32>
    tpu.vector_store %arg11[%c0_12, %c0_13], %27 {strides = array<i32>} : memref<36x256xf32, #tpu.memory_space<vmem>>, vector<4x256xf32>,
    %29 = vector.extract_strided_slice %3 {offsets = [0, 1], sizes = [4, 256], strides = [1, 1]} : vector<4x290xf32> to vector<4x256xf32>
    %cst_14 = arith.constant -1.000000e+00 : f32
    %30 = vector.broadcast %cst_14 : f32 to vector<1x256xf32>
    %31 = arith.addf %0, %30 : vector<1x256xf32>
    %cst_15 = arith.constant 0.000000e+00 : f32
    %32 = vector.broadcast %cst_15 : f32 to vector<1x256xf32>
    %33 = arith.cmpf oge, %31, %32 : vector<1x256xf32>
    %cst_16 = arith.constant -1.000000e+00 : f32
    %34 = vector.broadcast %cst_16 : f32 to vector<1x256xf32>
    %35 = arith.addf %0, %34 : vector<1x256xf32>
    %cst_17 = arith.constant 1.500000e+01 : f32
    %36 = vector.broadcast %cst_17 : f32 to vector<1x256xf32>
    %37 = arith.cmpf ole, %35, %36 : vector<1x256xf32>
    %38 = arith.andi %33, %37 : vector<1x256xi1>
    %cst_18 = arith.constant 0.000000e+00 : f32
    %39 = vector.broadcast %cst_18 : f32 to vector<1x256xf32>
    %40 = arith.addf %1, %39 : vector<1x256xf32>
    %cst_19 = arith.constant 0.000000e+00 : f32
    %41 = vector.broadcast %cst_19 : f32 to vector<1x256xf32>
    %42 = arith.cmpf oge, %40, %41 : vector<1x256xf32>
    %43 = arith.andi %38, %42 : vector<1x256xi1>
    %cst_20 = arith.constant 0.000000e+00 : f32
    %44 = vector.broadcast %cst_20 : f32 to vector<1x256xf32>
    %45 = arith.addf %1, %44 : vector<1x256xf32>
    %cst_21 = arith.constant 1.500000e+01 : f32
    %46 = vector.broadcast %cst_21 : f32 to vector<1x256xf32>
    %47 = arith.cmpf ole, %45, %46 : vector<1x256xf32>
    %48 = arith.andi %43, %47 : vector<1x256xi1>
    %49 = arith.extui %48 : vector<1x256xi1> to vector<1x256xi32>
    %50 = arith.sitofp %49 : vector<1x256xi32> to vector<1x256xf32>
    %51 = vector.broadcast %50 : vector<1x256xf32> to vector<4x256xf32>
    %52 = arith.mulf %29, %51 : vector<4x256xf32>
    %c4 = arith.constant 4 : index
    %c0_22 = arith.constant 0 : index
    %53 = vector.load %arg11[%c4, %c0_22] : memref<36x256xf32, #tpu.memory_space<vmem>>, vector<4x256xf32>
    tpu.vector_store %arg11[%c4, %c0_22], %52 {strides = array<i32>} : memref<36x256xf32, #tpu.memory_space<vmem>>, vector<4x256xf32>,
    %54 = vector.extract_strided_slice %3 {offsets = [0, 2], sizes = [4, 256], strides = [1, 1]} : vector<4x290xf32> to vector<4x256xf32>
    %cst_23 = arith.constant -1.000000e+00 : f32
    %55 = vector.broadcast %cst_23 : f32 to vector<1x256xf32>
    %56 = arith.addf %0, %55 : vector<1x256xf32>
    %cst_24 = arith.constant 0.000000e+00 : f32
    %57 = vector.broadcast %cst_24 : f32 to vector<1x256xf32>
    %58 = arith.cmpf oge, %56, %57 : vector<1x256xf32>
    %cst_25 = arith.constant -1.000000e+00 : f32
    %59 = vector.broadcast %cst_25 : f32 to vector<1x256xf32>
    %60 = arith.addf %0, %59 : vector<1x256xf32>
    %cst_26 = arith.constant 1.500000e+01 : f32
    %61 = vector.broadcast %cst_26 : f32 to vector<1x256xf32>
    %62 = arith.cmpf ole, %60, %61 : vector<1x256xf32>
    %63 = arith.andi %58, %62 : vector<1x256xi1>
    %cst_27 = arith.constant 1.000000e+00 : f32
    %64 = vector.broadcast %cst_27 : f32 to vector<1x256xf32>
    %65 = arith.addf %1, %64 : vector<1x256xf32>
    %cst_28 = arith.constant 0.000000e+00 : f32
    %66 = vector.broadcast %cst_28 : f32 to vector<1x256xf32>
    %67 = arith.cmpf oge, %65, %66 : vector<1x256xf32>
    %68 = arith.andi %63, %67 : vector<1x256xi1>
    %cst_29 = arith.constant 1.000000e+00 : f32
    %69 = vector.broadcast %cst_29 : f32 to vector<1x256xf32>
    %70 = arith.addf %1, %69 : vector<1x256xf32>
    %cst_30 = arith.constant 1.500000e+01 : f32
    %71 = vector.broadcast %cst_30 : f32 to vector<1x256xf32>
    %72 = arith.cmpf ole, %70, %71 : vector<1x256xf32>
    %73 = arith.andi %68, %72 : vector<1x256xi1>
    %74 = arith.extui %73 : vector<1x256xi1> to vector<1x256xi32>
    %75 = arith.sitofp %74 : vector<1x256xi32> to vector<1x256xf32>
    %76 = vector.broadcast %75 : vector<1x256xf32> to vector<4x256xf32>
    %77 = arith.mulf %54, %76 : vector<4x256xf32>
    %c8 = arith.constant 8 : index
    %c0_31 = arith.constant 0 : index
    %78 = vector.load %arg11[%c8, %c0_31] : memref<36x256xf32, #tpu.memory_space<vmem>>, vector<4x256xf32>
    tpu.vector_store %arg11[%c8, %c0_31], %77 {strides = array<i32>} : memref<36x256xf32, #tpu.memory_space<vmem>>, vector<4x256xf32>,
    %79 = vector.extract_strided_slice %3 {offsets = [0, 16], sizes = [4, 256], strides = [1, 1]} : vector<4x290xf32> to vector<4x256xf32>
    %cst_32 = arith.constant 0.000000e+00 : f32
    %80 = vector.broadcast %cst_32 : f32 to vector<1x256xf32>
    %81 = arith.addf %0, %80 : vector<1x256xf32>
    %cst_33 = arith.constant 0.000000e+00 : f32
    %82 = vector.broadcast %cst_33 : f32 to vector<1x256xf32>
    %83 = arith.cmpf oge, %81, %82 : vector<1x256xf32>
    %cst_34 = arith.constant 0.000000e+00 : f32
    %84 = vector.broadcast %cst_34 : f32 to vector<1x256xf32>
    %85 = arith.addf %0, %84 : vector<1x256xf32>
    %cst_35 = arith.constant 1.500000e+01 : f32
    %86 = vector.broadcast %cst_35 : f32 to vector<1x256xf32>
    %87 = arith.cmpf ole, %85, %86 : vector<1x256xf32>
    %88 = arith.andi %83, %87 : vector<1x256xi1>
    %cst_36 = arith.constant -1.000000e+00 : f32
    %89 = vector.broadcast %cst_36 : f32 to vector<1x256xf32>
    %90 = arith.addf %1, %89 : vector<1x256xf32>
    %cst_37 = arith.constant 0.000000e+00 : f32
    %91 = vector.broadcast %cst_37 : f32 to vector<1x256xf32>
    %92 = arith.cmpf oge, %90, %91 : vector<1x256xf32>
    %93 = arith.andi %88, %92 : vector<1x256xi1>
    %cst_38 = arith.constant -1.000000e+00 : f32
    %94 = vector.broadcast %cst_38 : f32 to vector<1x256xf32>
    %95 = arith.addf %1, %94 : vector<1x256xf32>
    %cst_39 = arith.constant 1.500000e+01 : f32
    %96 = vector.broadcast %cst_39 : f32 to vector<1x256xf32>
    %97 = arith.cmpf ole, %95, %96 : vector<1x256xf32>
    %98 = arith.andi %93, %97 : vector<1x256xi1>
    %99 = arith.extui %98 : vector<1x256xi1> to vector<1x256xi32>
    %100 = arith.sitofp %99 : vector<1x256xi32> to vector<1x256xf32>
    %101 = vector.broadcast %100 : vector<1x256xf32> to vector<4x256xf32>
    %102 = arith.mulf %79, %101 : vector<4x256xf32>
    %c12 = arith.constant 12 : index
    %c0_40 = arith.constant 0 : index
    %103 = vector.load %arg11[%c12, %c0_40] : memref<36x256xf32, #tpu.memory_space<vmem>>, vector<4x256xf32>
    tpu.vector_store %arg11[%c12, %c0_40], %102 {strides = array<i32>} : memref<36x256xf32, #tpu.memory_space<vmem>>, vector<4x256xf32>,
    %104 = vector.extract_strided_slice %3 {offsets = [0, 17], sizes = [4, 256], strides = [1, 1]} : vector<4x290xf32> to vector<4x256xf32>
    %cst_41 = arith.constant 0.000000e+00 : f32
    %105 = vector.broadcast %cst_41 : f32 to vector<1x256xf32>
    %106 = arith.addf %0, %105 : vector<1x256xf32>
    %cst_42 = arith.constant 0.000000e+00 : f32
    %107 = vector.broadcast %cst_42 : f32 to vector<1x256xf32>
    %108 = arith.cmpf oge, %106, %107 : vector<1x256xf32>
    %cst_43 = arith.constant 0.000000e+00 : f32
    %109 = vector.broadcast %cst_43 : f32 to vector<1x256xf32>
    %110 = arith.addf %0, %109 : vector<1x256xf32>
    %cst_44 = arith.constant 1.500000e+01 : f32
    %111 = vector.broadcast %cst_44 : f32 to vector<1x256xf32>
    %112 = arith.cmpf ole, %110, %111 : vector<1x256xf32>
    %113 = arith.andi %108, %112 : vector<1x256xi1>
    %cst_45 = arith.constant 0.000000e+00 : f32
    %114 = vector.broadcast %cst_45 : f32 to vector<1x256xf32>
    %115 = arith.addf %1, %114 : vector<1x256xf32>
    %cst_46 = arith.constant 0.000000e+00 : f32
    %116 = vector.broadcast %cst_46 : f32 to vector<1x256xf32>
    %117 = arith.cmpf oge, %115, %116 : vector<1x256xf32>
    %118 = arith.andi %113, %117 : vector<1x256xi1>
    %cst_47 = arith.constant 0.000000e+00 : f32
    %119 = vector.broadcast %cst_47 : f32 to vector<1x256xf32>
    %120 = arith.addf %1, %119 : vector<1x256xf32>
    %cst_48 = arith.constant 1.500000e+01 : f32
    %121 = vector.broadcast %cst_48 : f32 to vector<1x256xf32>
    %122 = arith.cmpf ole, %120, %121 : vector<1x256xf32>
    %123 = arith.andi %118, %122 : vector<1x256xi1>
    %124 = arith.extui %123 : vector<1x256xi1> to vector<1x256xi32>
    %125 = arith.sitofp %124 : vector<1x256xi32> to vector<1x256xf32>
    %126 = vector.broadcast %125 : vector<1x256xf32> to vector<4x256xf32>
    %127 = arith.mulf %104, %126 : vector<4x256xf32>
    %c16 = arith.constant 16 : index
    %c0_49 = arith.constant 0 : index
    %128 = vector.load %arg11[%c16, %c0_49] : memref<36x256xf32, #tpu.memory_space<vmem>>, vector<4x256xf32>
    tpu.vector_store %arg11[%c16, %c0_49], %127 {strides = array<i32>} : memref<36x256xf32, #tpu.memory_space<vmem>>, vector<4x256xf32>,
    %129 = vector.extract_strided_slice %3 {offsets = [0, 18], sizes = [4, 256], strides = [1, 1]} : vector<4x290xf32> to vector<4x256xf32>
    %cst_50 = arith.constant 0.000000e+00 : f32
    %130 = vector.broadcast %cst_50 : f32 to vector<1x256xf32>
    %131 = arith.addf %0, %130 : vector<1x256xf32>
    %cst_51 = arith.constant 0.000000e+00 : f32
    %132 = vector.broadcast %cst_51 : f32 to vector<1x256xf32>
    %133 = arith.cmpf oge, %131, %132 : vector<1x256xf32>
    %cst_52 = arith.constant 0.000000e+00 : f32
    %134 = vector.broadcast %cst_52 : f32 to vector<1x256xf32>
    %135 = arith.addf %0, %134 : vector<1x256xf32>
    %cst_53 = arith.constant 1.500000e+01 : f32
    %136 = vector.broadcast %cst_53 : f32 to vector<1x256xf32>
    %137 = arith.cmpf ole, %135, %136 : vector<1x256xf32>
    %138 = arith.andi %133, %137 : vector<1x256xi1>
    %cst_54 = arith.constant 1.000000e+00 : f32
    %139 = vector.broadcast %cst_54 : f32 to vector<1x256xf32>
    %140 = arith.addf %1, %139 : vector<1x256xf32>
    %cst_55 = arith.constant 0.000000e+00 : f32
    %141 = vector.broadcast %cst_55 : f32 to vector<1x256xf32>
    %142 = arith.cmpf oge, %140, %141 : vector<1x256xf32>
    %143 = arith.andi %138, %142 : vector<1x256xi1>
    %cst_56 = arith.constant 1.000000e+00 : f32
    %144 = vector.broadcast %cst_56 : f32 to vector<1x256xf32>
    %145 = arith.addf %1, %144 : vector<1x256xf32>
    %cst_57 = arith.constant 1.500000e+01 : f32
    %146 = vector.broadcast %cst_57 : f32 to vector<1x256xf32>
    %147 = arith.cmpf ole, %145, %146 : vector<1x256xf32>
    %148 = arith.andi %143, %147 : vector<1x256xi1>
    %149 = arith.extui %148 : vector<1x256xi1> to vector<1x256xi32>
    %150 = arith.sitofp %149 : vector<1x256xi32> to vector<1x256xf32>
    %151 = vector.broadcast %150 : vector<1x256xf32> to vector<4x256xf32>
    %152 = arith.mulf %129, %151 : vector<4x256xf32>
    %c20 = arith.constant 20 : index
    %c0_58 = arith.constant 0 : index
    %153 = vector.load %arg11[%c20, %c0_58] : memref<36x256xf32, #tpu.memory_space<vmem>>, vector<4x256xf32>
    tpu.vector_store %arg11[%c20, %c0_58], %152 {strides = array<i32>} : memref<36x256xf32, #tpu.memory_space<vmem>>, vector<4x256xf32>,
    %154 = vector.extract_strided_slice %3 {offsets = [0, 32], sizes = [4, 256], strides = [1, 1]} : vector<4x290xf32> to vector<4x256xf32>
    %cst_59 = arith.constant 1.000000e+00 : f32
    %155 = vector.broadcast %cst_59 : f32 to vector<1x256xf32>
    %156 = arith.addf %0, %155 : vector<1x256xf32>
    %cst_60 = arith.constant 0.000000e+00 : f32
    %157 = vector.broadcast %cst_60 : f32 to vector<1x256xf32>
    %158 = arith.cmpf oge, %156, %157 : vector<1x256xf32>
    %cst_61 = arith.constant 1.000000e+00 : f32
    %159 = vector.broadcast %cst_61 : f32 to vector<1x256xf32>
    %160 = arith.addf %0, %159 : vector<1x256xf32>
    %cst_62 = arith.constant 1.500000e+01 : f32
    %161 = vector.broadcast %cst_62 : f32 to vector<1x256xf32>
    %162 = arith.cmpf ole, %160, %161 : vector<1x256xf32>
    %163 = arith.andi %158, %162 : vector<1x256xi1>
    %cst_63 = arith.constant -1.000000e+00 : f32
    %164 = vector.broadcast %cst_63 : f32 to vector<1x256xf32>
    %165 = arith.addf %1, %164 : vector<1x256xf32>
    %cst_64 = arith.constant 0.000000e+00 : f32
    %166 = vector.broadcast %cst_64 : f32 to vector<1x256xf32>
    %167 = arith.cmpf oge, %165, %166 : vector<1x256xf32>
    %168 = arith.andi %163, %167 : vector<1x256xi1>
    %cst_65 = arith.constant -1.000000e+00 : f32
    %169 = vector.broadcast %cst_65 : f32 to vector<1x256xf32>
    %170 = arith.addf %1, %169 : vector<1x256xf32>
    %cst_66 = arith.constant 1.500000e+01 : f32
    %171 = vector.broadcast %cst_66 : f32 to vector<1x256xf32>
    %172 = arith.cmpf ole, %170, %171 : vector<1x256xf32>
    %173 = arith.andi %168, %172 : vector<1x256xi1>
    %174 = arith.extui %173 : vector<1x256xi1> to vector<1x256xi32>
    %175 = arith.sitofp %174 : vector<1x256xi32> to vector<1x256xf32>
    %176 = vector.broadcast %175 : vector<1x256xf32> to vector<4x256xf32>
    %177 = arith.mulf %154, %176 : vector<4x256xf32>
    %c24 = arith.constant 24 : index
    %c0_67 = arith.constant 0 : index
    %178 = vector.load %arg11[%c24, %c0_67] : memref<36x256xf32, #tpu.memory_space<vmem>>, vector<4x256xf32>
    tpu.vector_store %arg11[%c24, %c0_67], %177 {strides = array<i32>} : memref<36x256xf32, #tpu.memory_space<vmem>>, vector<4x256xf32>,
    %179 = vector.extract_strided_slice %3 {offsets = [0, 33], sizes = [4, 256], strides = [1, 1]} : vector<4x290xf32> to vector<4x256xf32>
    %cst_68 = arith.constant 1.000000e+00 : f32
    %180 = vector.broadcast %cst_68 : f32 to vector<1x256xf32>
    %181 = arith.addf %0, %180 : vector<1x256xf32>
    %cst_69 = arith.constant 0.000000e+00 : f32
    %182 = vector.broadcast %cst_69 : f32 to vector<1x256xf32>
    %183 = arith.cmpf oge, %181, %182 : vector<1x256xf32>
    %cst_70 = arith.constant 1.000000e+00 : f32
    %184 = vector.broadcast %cst_70 : f32 to vector<1x256xf32>
    %185 = arith.addf %0, %184 : vector<1x256xf32>
    %cst_71 = arith.constant 1.500000e+01 : f32
    %186 = vector.broadcast %cst_71 : f32 to vector<1x256xf32>
    %187 = arith.cmpf ole, %185, %186 : vector<1x256xf32>
    %188 = arith.andi %183, %187 : vector<1x256xi1>
    %cst_72 = arith.constant 0.000000e+00 : f32
    %189 = vector.broadcast %cst_72 : f32 to vector<1x256xf32>
    %190 = arith.addf %1, %189 : vector<1x256xf32>
    %cst_73 = arith.constant 0.000000e+00 : f32
    %191 = vector.broadcast %cst_73 : f32 to vector<1x256xf32>
    %192 = arith.cmpf oge, %190, %191 : vector<1x256xf32>
    %193 = arith.andi %188, %192 : vector<1x256xi1>
    %cst_74 = arith.constant 0.000000e+00 : f32
    %194 = vector.broadcast %cst_74 : f32 to vector<1x256xf32>
    %195 = arith.addf %1, %194 : vector<1x256xf32>
    %cst_75 = arith.constant 1.500000e+01 : f32
    %196 = vector.broadcast %cst_75 : f32 to vector<1x256xf32>
    %197 = arith.cmpf ole, %195, %196 : vector<1x256xf32>
    %198 = arith.andi %193, %197 : vector<1x256xi1>
    %199 = arith.extui %198 : vector<1x256xi1> to vector<1x256xi32>
    %200 = arith.sitofp %199 : vector<1x256xi32> to vector<1x256xf32>
    %201 = vector.broadcast %200 : vector<1x256xf32> to vector<4x256xf32>
    %202 = arith.mulf %179, %201 : vector<4x256xf32>
    %c28 = arith.constant 28 : index
    %c0_76 = arith.constant 0 : index
    %203 = vector.load %arg11[%c28, %c0_76] : memref<36x256xf32, #tpu.memory_space<vmem>>, vector<4x256xf32>
    tpu.vector_store %arg11[%c28, %c0_76], %202 {strides = array<i32>} : memref<36x256xf32, #tpu.memory_space<vmem>>, vector<4x256xf32>,
    %204 = vector.extract_strided_slice %3 {offsets = [0, 34], sizes = [4, 256], strides = [1, 1]} : vector<4x290xf32> to vector<4x256xf32>
    %cst_77 = arith.constant 1.000000e+00 : f32
    %205 = vector.broadcast %cst_77 : f32 to vector<1x256xf32>
    %206 = arith.addf %0, %205 : vector<1x256xf32>
    %cst_78 = arith.constant 0.000000e+00 : f32
    %207 = vector.broadcast %cst_78 : f32 to vector<1x256xf32>
    %208 = arith.cmpf oge, %206, %207 : vector<1x256xf32>
    %cst_79 = arith.constant 1.000000e+00 : f32
    %209 = vector.broadcast %cst_79 : f32 to vector<1x256xf32>
    %210 = arith.addf %0, %209 : vector<1x256xf32>
    %cst_80 = arith.constant 1.500000e+01 : f32
    %211 = vector.broadcast %cst_80 : f32 to vector<1x256xf32>
    %212 = arith.cmpf ole, %210, %211 : vector<1x256xf32>
    %213 = arith.andi %208, %212 : vector<1x256xi1>
    %cst_81 = arith.constant 1.000000e+00 : f32
    %214 = vector.broadcast %cst_81 : f32 to vector<1x256xf32>
    %215 = arith.addf %1, %214 : vector<1x256xf32>
    %cst_82 = arith.constant 0.000000e+00 : f32
    %216 = vector.broadcast %cst_82 : f32 to vector<1x256xf32>
    %217 = arith.cmpf oge, %215, %216 : vector<1x256xf32>
    %218 = arith.andi %213, %217 : vector<1x256xi1>
    %cst_83 = arith.constant 1.000000e+00 : f32
    %219 = vector.broadcast %cst_83 : f32 to vector<1x256xf32>
    %220 = arith.addf %1, %219 : vector<1x256xf32>
    %cst_84 = arith.constant 1.500000e+01 : f32
    %221 = vector.broadcast %cst_84 : f32 to vector<1x256xf32>
    %222 = arith.cmpf ole, %220, %221 : vector<1x256xf32>
    %223 = arith.andi %218, %222 : vector<1x256xi1>
    %224 = arith.extui %223 : vector<1x256xi1> to vector<1x256xi32>
    %225 = arith.sitofp %224 : vector<1x256xi32> to vector<1x256xf32>
    %226 = vector.broadcast %225 : vector<1x256xf32> to vector<4x256xf32>
    %227 = arith.mulf %204, %226 : vector<4x256xf32>
    %c32 = arith.constant 32 : index
    %c0_85 = arith.constant 0 : index
    %228 = vector.load %arg11[%c32, %c0_85] : memref<36x256xf32, #tpu.memory_space<vmem>>, vector<4x256xf32>
    tpu.vector_store %arg11[%c32, %c0_85], %227 {strides = array<i32>} : memref<36x256xf32, #tpu.memory_space<vmem>>, vector<4x256xf32>,
    %c0_86 = arith.constant 0 : index
    %c0_87 = arith.constant 0 : index
    %229 = vector.load %arg5[%c0_86, %c0_87] : memref<27x36xf32, #tpu.memory_space<vmem>>, vector<27x36xf32>
    %c0_88 = arith.constant 0 : index
    %c0_89 = arith.constant 0 : index
    %230 = vector.load %arg11[%c0_88, %c0_89] : memref<36x256xf32, #tpu.memory_space<vmem>>, vector<36x256xf32>
    %cst_90 = arith.constant dense<0.000000e+00> : vector<27x256xf32>
    %231 = tpu.matmul %229, %230, %cst_90 {dimension_numbers = #tpu.dot_dimension_numbers<[1], [0], [0], [1], [0, 0, 1, 1], [], []>} : vector<27x36xf32>, vector<36x256xf32>, vector<27x256xf32> -> vector<27x256xf32>
    %c0_91 = arith.constant 0 : index
    %c0_92 = arith.constant 0 : index
    %232 = vector.load %arg6[%c0_91, %c0_92] : memref<27x1xf32, #tpu.memory_space<vmem>>, vector<27x1xf32>
    %233 = vector.broadcast %232 : vector<27x1xf32> to vector<27x256xf32>
    %234 = arith.addf %231, %233 : vector<27x256xf32>
    %235 = vector.extract_strided_slice %234 {offsets = [0, 0], sizes = [9, 256], strides = [1, 1]} : vector<27x256xf32> to vector<9x256xf32>
    %236 = vector.extract_strided_slice %234 {offsets = [9, 0], sizes = [9, 256], strides = [1, 1]} : vector<27x256xf32> to vector<9x256xf32>
    %237 = vector.extract_strided_slice %234 {offsets = [18, 0], sizes = [9, 256], strides = [1, 1]} : vector<27x256xf32> to vector<9x256xf32>
    %238 = arith.negf %237 : vector<9x256xf32>
    %239 = math.exp %238 : vector<9x256xf32>
    %cst_93 = arith.constant 1.000000e+00 : f32
    %240 = vector.broadcast %cst_93 : f32 to vector<9x256xf32>
    %241 = arith.addf %240, %239 : vector<9x256xf32>
    %242 = arith.divf %240, %241 : vector<9x256xf32>
    %c0_94 = arith.constant 0 : index
    %c0_95 = arith.constant 0 : index
    %c0_96 = arith.constant 0 : index
    %243 = vector.load %arg4[%c0_94, %c0_95, %c0_96] : memref<1x64x16xbf16, #tpu.memory_space<vmem>>, vector<1x64x16xbf16>
    %244 = vector.shape_cast %243 : vector<1x64x16xbf16> to vector<64x16xbf16>
    %245 = tpu.iota {dimensions = array<i32: 0>} : vector<16x256xi32>
    %246 = tpu.iota {dimensions = array<i32: 0>} : vector<16x256xi32>
    %cst_97 = arith.constant -1.000000e+00 : f32
    %247 = vector.broadcast %cst_97 : f32 to vector<1x256xf32>
    %248 = arith.addf %0, %247 : vector<1x256xf32>
    %249 = vector.extract_strided_slice %235 {offsets = [0, 0], sizes = [1, 256], strides = [1, 1]} : vector<9x256xf32> to vector<1x256xf32>
    %250 = arith.addf %248, %249 : vector<1x256xf32>
    %cst_98 = arith.constant -1.000000e+00 : f32
    %251 = vector.broadcast %cst_98 : f32 to vector<1x256xf32>
    %252 = arith.addf %1, %251 : vector<1x256xf32>
    %253 = vector.extract_strided_slice %236 {offsets = [0, 0], sizes = [1, 256], strides = [1, 1]} : vector<9x256xf32> to vector<1x256xf32>
    %254 = arith.addf %252, %253 : vector<1x256xf32>
    %255 = math.floor %250 : vector<1x256xf32>
    %256 = math.floor %254 : vector<1x256xf32>
    %257 = arith.subf %250, %255 : vector<1x256xf32>
    %258 = arith.subf %254, %256 : vector<1x256xf32>
    %cst_99 = arith.constant 1.000000e+00 : f32
    %259 = vector.broadcast %cst_99 : f32 to vector<1x256xf32>
    %260 = arith.subf %259, %257 : vector<1x256xf32>
    %cst_100 = arith.constant 1.000000e+00 : f32
    %261 = vector.broadcast %cst_100 : f32 to vector<1x256xf32>
    %262 = arith.subf %261, %258 : vector<1x256xf32>
    %263 = arith.fptosi %255 : vector<1x256xf32> to vector<1x256xi32>
    %264 = arith.fptosi %256 : vector<1x256xf32> to vector<1x256xi32>
    %265 = vector.broadcast %263 : vector<1x256xi32> to vector<16x256xi32>
    %266 = arith.cmpi eq, %245, %265 : vector<16x256xi32>
    %cst_101 = arith.constant 0.000000e+00 : f32
    %267 = vector.shape_cast %260 : vector<1x256xf32> to vector<1x256xf32>
    %268 = vector.broadcast %267 : vector<1x256xf32> to vector<16x256xf32>
    %269 = vector.broadcast %cst_101 : f32 to vector<16x256xf32>
    %270 = arith.select %266, %268, %269 : vector<16x256xi1>, vector<16x256xf32>
    %c1_i32 = arith.constant 1 : i32
    %271 = vector.broadcast %c1_i32 : i32 to vector<1x256xi32>
    %272 = arith.addi %263, %271 : vector<1x256xi32>
    %273 = vector.broadcast %272 : vector<1x256xi32> to vector<16x256xi32>
    %274 = arith.cmpi eq, %245, %273 : vector<16x256xi32>
    %cst_102 = arith.constant 0.000000e+00 : f32
    %275 = vector.shape_cast %257 : vector<1x256xf32> to vector<1x256xf32>
    %276 = vector.broadcast %275 : vector<1x256xf32> to vector<16x256xf32>
    %277 = vector.broadcast %cst_102 : f32 to vector<16x256xf32>
    %278 = arith.select %274, %276, %277 : vector<16x256xi1>, vector<16x256xf32>
    %279 = arith.addf %270, %278 : vector<16x256xf32>
    %280 = vector.broadcast %264 : vector<1x256xi32> to vector<16x256xi32>
    %281 = arith.cmpi eq, %246, %280 : vector<16x256xi32>
    %cst_103 = arith.constant 0.000000e+00 : f32
    %282 = vector.shape_cast %262 : vector<1x256xf32> to vector<1x256xf32>
    %283 = vector.broadcast %282 : vector<1x256xf32> to vector<16x256xf32>
    %284 = vector.broadcast %cst_103 : f32 to vector<16x256xf32>
    %285 = arith.select %281, %283, %284 : vector<16x256xi1>, vector<16x256xf32>
    %c1_i32_104 = arith.constant 1 : i32
    %286 = vector.broadcast %c1_i32_104 : i32 to vector<1x256xi32>
    %287 = arith.addi %264, %286 : vector<1x256xi32>
    %288 = vector.broadcast %287 : vector<1x256xi32> to vector<16x256xi32>
    %289 = arith.cmpi eq, %246, %288 : vector<16x256xi32>
    %cst_105 = arith.constant 0.000000e+00 : f32
    %290 = vector.shape_cast %258 : vector<1x256xf32> to vector<1x256xf32>
    %291 = vector.broadcast %290 : vector<1x256xf32> to vector<16x256xf32>
    %292 = vector.broadcast %cst_105 : f32 to vector<16x256xf32>
    %293 = arith.select %289, %291, %292 : vector<16x256xi1>, vector<16x256xf32>
    %294 = arith.addf %285, %293 : vector<16x256xf32>
    %295 = arith.truncf %294 : vector<16x256xf32> to vector<16x256xbf16>
    %cst_106 = arith.constant dense<0.000000e+00> : vector<64x256xf32>
    %296 = tpu.matmul %244, %295, %cst_106 {dimension_numbers = #tpu.dot_dimension_numbers<[1], [0], [0], [1], [0, 0, 1, 1], [], []>} : vector<64x16xbf16>, vector<16x256xbf16>, vector<64x256xf32> -> vector<64x256xf32>
    %297 = vector.shape_cast %296 : vector<64x256xf32> to vector<4x16x256xf32>
    %298 = vector.shape_cast %279 : vector<16x256xf32> to vector<1x16x256xf32>
    %299 = vector.broadcast %298 : vector<1x16x256xf32> to vector<4x16x256xf32>
    %300 = arith.mulf %297, %299 : vector<4x16x256xf32>
    %cst_107 = arith.constant dense<0.000000e+00> : vector<4x256xf32>
    %301 = vector.multi_reduction <add>, %300, %cst_107 [1] : vector<4x16x256xf32> to vector<4x256xf32>
    %302 = vector.extract_strided_slice %242 {offsets = [0, 0], sizes = [1, 256], strides = [1, 1]} : vector<9x256xf32> to vector<1x256xf32>
    %303 = vector.broadcast %302 : vector<1x256xf32> to vector<4x256xf32>
    %304 = arith.mulf %301, %303 : vector<4x256xf32>
    %c0_108 = arith.constant 0 : index
    %c0_109 = arith.constant 0 : index
    %305 = vector.load %arg11[%c0_108, %c0_109] : memref<36x256xf32, #tpu.memory_space<vmem>>, vector<4x256xf32>
    tpu.vector_store %arg11[%c0_108, %c0_109], %304 {strides = array<i32>} : memref<36x256xf32, #tpu.memory_space<vmem>>, vector<4x256xf32>,
    %cst_110 = arith.constant -1.000000e+00 : f32
    %306 = vector.broadcast %cst_110 : f32 to vector<1x256xf32>
    %307 = arith.addf %0, %306 : vector<1x256xf32>
    %308 = vector.extract_strided_slice %235 {offsets = [1, 0], sizes = [1, 256], strides = [1, 1]} : vector<9x256xf32> to vector<1x256xf32>
    %309 = arith.addf %307, %308 : vector<1x256xf32>
    %cst_111 = arith.constant 0.000000e+00 : f32
    %310 = vector.broadcast %cst_111 : f32 to vector<1x256xf32>
    %311 = arith.addf %1, %310 : vector<1x256xf32>
    %312 = vector.extract_strided_slice %236 {offsets = [1, 0], sizes = [1, 256], strides = [1, 1]} : vector<9x256xf32> to vector<1x256xf32>
    %313 = arith.addf %311, %312 : vector<1x256xf32>
    %314 = math.floor %309 : vector<1x256xf32>
    %315 = math.floor %313 : vector<1x256xf32>
    %316 = arith.subf %309, %314 : vector<1x256xf32>
    %317 = arith.subf %313, %315 : vector<1x256xf32>
    %cst_112 = arith.constant 1.000000e+00 : f32
    %318 = vector.broadcast %cst_112 : f32 to vector<1x256xf32>
    %319 = arith.subf %318, %316 : vector<1x256xf32>
    %cst_113 = arith.constant 1.000000e+00 : f32
    %320 = vector.broadcast %cst_113 : f32 to vector<1x256xf32>
    %321 = arith.subf %320, %317 : vector<1x256xf32>
    %322 = arith.fptosi %314 : vector<1x256xf32> to vector<1x256xi32>
    %323 = arith.fptosi %315 : vector<1x256xf32> to vector<1x256xi32>
    %324 = vector.broadcast %322 : vector<1x256xi32> to vector<16x256xi32>
    %325 = arith.cmpi eq, %245, %324 : vector<16x256xi32>
    %cst_114 = arith.constant 0.000000e+00 : f32
    %326 = vector.shape_cast %319 : vector<1x256xf32> to vector<1x256xf32>
    %327 = vector.broadcast %326 : vector<1x256xf32> to vector<16x256xf32>
    %328 = vector.broadcast %cst_114 : f32 to vector<16x256xf32>
    %329 = arith.select %325, %327, %328 : vector<16x256xi1>, vector<16x256xf32>
    %c1_i32_115 = arith.constant 1 : i32
    %330 = vector.broadcast %c1_i32_115 : i32 to vector<1x256xi32>
    %331 = arith.addi %322, %330 : vector<1x256xi32>
    %332 = vector.broadcast %331 : vector<1x256xi32> to vector<16x256xi32>
    %333 = arith.cmpi eq, %245, %332 : vector<16x256xi32>
    %cst_116 = arith.constant 0.000000e+00 : f32
    %334 = vector.shape_cast %316 : vector<1x256xf32> to vector<1x256xf32>
    %335 = vector.broadcast %334 : vector<1x256xf32> to vector<16x256xf32>
    %336 = vector.broadcast %cst_116 : f32 to vector<16x256xf32>
    %337 = arith.select %333, %335, %336 : vector<16x256xi1>, vector<16x256xf32>
    %338 = arith.addf %329, %337 : vector<16x256xf32>
    %339 = vector.broadcast %323 : vector<1x256xi32> to vector<16x256xi32>
    %340 = arith.cmpi eq, %246, %339 : vector<16x256xi32>
    %cst_117 = arith.constant 0.000000e+00 : f32
    %341 = vector.shape_cast %321 : vector<1x256xf32> to vector<1x256xf32>
    %342 = vector.broadcast %341 : vector<1x256xf32> to vector<16x256xf32>
    %343 = vector.broadcast %cst_117 : f32 to vector<16x256xf32>
    %344 = arith.select %340, %342, %343 : vector<16x256xi1>, vector<16x256xf32>
    %c1_i32_118 = arith.constant 1 : i32
    %345 = vector.broadcast %c1_i32_118 : i32 to vector<1x256xi32>
    %346 = arith.addi %323, %345 : vector<1x256xi32>
    %347 = vector.broadcast %346 : vector<1x256xi32> to vector<16x256xi32>
    %348 = arith.cmpi eq, %246, %347 : vector<16x256xi32>
    %cst_119 = arith.constant 0.000000e+00 : f32
    %349 = vector.shape_cast %317 : vector<1x256xf32> to vector<1x256xf32>
    %350 = vector.broadcast %349 : vector<1x256xf32> to vector<16x256xf32>
    %351 = vector.broadcast %cst_119 : f32 to vector<16x256xf32>
    %352 = arith.select %348, %350, %351 : vector<16x256xi1>, vector<16x256xf32>
    %353 = arith.addf %344, %352 : vector<16x256xf32>
    %354 = arith.truncf %353 : vector<16x256xf32> to vector<16x256xbf16>
    %cst_120 = arith.constant dense<0.000000e+00> : vector<64x256xf32>
    %355 = tpu.matmul %244, %354, %cst_120 {dimension_numbers = #tpu.dot_dimension_numbers<[1], [0], [0], [1], [0, 0, 1, 1], [], []>} : vector<64x16xbf16>, vector<16x256xbf16>, vector<64x256xf32> -> vector<64x256xf32>
    %356 = vector.shape_cast %355 : vector<64x256xf32> to vector<4x16x256xf32>
    %357 = vector.shape_cast %338 : vector<16x256xf32> to vector<1x16x256xf32>
    %358 = vector.broadcast %357 : vector<1x16x256xf32> to vector<4x16x256xf32>
    %359 = arith.mulf %356, %358 : vector<4x16x256xf32>
    %cst_121 = arith.constant dense<0.000000e+00> : vector<4x256xf32>
    %360 = vector.multi_reduction <add>, %359, %cst_121 [1] : vector<4x16x256xf32> to vector<4x256xf32>
    %361 = vector.extract_strided_slice %242 {offsets = [1, 0], sizes = [1, 256], strides = [1, 1]} : vector<9x256xf32> to vector<1x256xf32>
    %362 = vector.broadcast %361 : vector<1x256xf32> to vector<4x256xf32>
    %363 = arith.mulf %360, %362 : vector<4x256xf32>
    %c4_122 = arith.constant 4 : index
    %c0_123 = arith.constant 0 : index
    %364 = vector.load %arg11[%c4_122, %c0_123] : memref<36x256xf32, #tpu.memory_space<vmem>>, vector<4x256xf32>
    tpu.vector_store %arg11[%c4_122, %c0_123], %363 {strides = array<i32>} : memref<36x256xf32, #tpu.memory_space<vmem>>, vector<4x256xf32>,
    %cst_124 = arith.constant -1.000000e+00 : f32
    %365 = vector.broadcast %cst_124 : f32 to vector<1x256xf32>
    %366 = arith.addf %0, %365 : vector<1x256xf32>
    %367 = vector.extract_strided_slice %235 {offsets = [2, 0], sizes = [1, 256], strides = [1, 1]} : vector<9x256xf32> to vector<1x256xf32>
    %368 = arith.addf %366, %367 : vector<1x256xf32>
    %cst_125 = arith.constant 1.000000e+00 : f32
    %369 = vector.broadcast %cst_125 : f32 to vector<1x256xf32>
    %370 = arith.addf %1, %369 : vector<1x256xf32>
    %371 = vector.extract_strided_slice %236 {offsets = [2, 0], sizes = [1, 256], strides = [1, 1]} : vector<9x256xf32> to vector<1x256xf32>
    %372 = arith.addf %370, %371 : vector<1x256xf32>
    %373 = math.floor %368 : vector<1x256xf32>
    %374 = math.floor %372 : vector<1x256xf32>
    %375 = arith.subf %368, %373 : vector<1x256xf32>
    %376 = arith.subf %372, %374 : vector<1x256xf32>
    %cst_126 = arith.constant 1.000000e+00 : f32
    %377 = vector.broadcast %cst_126 : f32 to vector<1x256xf32>
    %378 = arith.subf %377, %375 : vector<1x256xf32>
    %cst_127 = arith.constant 1.000000e+00 : f32
    %379 = vector.broadcast %cst_127 : f32 to vector<1x256xf32>
    %380 = arith.subf %379, %376 : vector<1x256xf32>
    %381 = arith.fptosi %373 : vector<1x256xf32> to vector<1x256xi32>
    %382 = arith.fptosi %374 : vector<1x256xf32> to vector<1x256xi32>
    %383 = vector.broadcast %381 : vector<1x256xi32> to vector<16x256xi32>
    %384 = arith.cmpi eq, %245, %383 : vector<16x256xi32>
    %cst_128 = arith.constant 0.000000e+00 : f32
    %385 = vector.shape_cast %378 : vector<1x256xf32> to vector<1x256xf32>
    %386 = vector.broadcast %385 : vector<1x256xf32> to vector<16x256xf32>
    %387 = vector.broadcast %cst_128 : f32 to vector<16x256xf32>
    %388 = arith.select %384, %386, %387 : vector<16x256xi1>, vector<16x256xf32>
    %c1_i32_129 = arith.constant 1 : i32
    %389 = vector.broadcast %c1_i32_129 : i32 to vector<1x256xi32>
    %390 = arith.addi %381, %389 : vector<1x256xi32>
    %391 = vector.broadcast %390 : vector<1x256xi32> to vector<16x256xi32>
    %392 = arith.cmpi eq, %245, %391 : vector<16x256xi32>
    %cst_130 = arith.constant 0.000000e+00 : f32
    %393 = vector.shape_cast %375 : vector<1x256xf32> to vector<1x256xf32>
    %394 = vector.broadcast %393 : vector<1x256xf32> to vector<16x256xf32>
    %395 = vector.broadcast %cst_130 : f32 to vector<16x256xf32>
    %396 = arith.select %392, %394, %395 : vector<16x256xi1>, vector<16x256xf32>
    %397 = arith.addf %388, %396 : vector<16x256xf32>
    %398 = vector.broadcast %382 : vector<1x256xi32> to vector<16x256xi32>
    %399 = arith.cmpi eq, %246, %398 : vector<16x256xi32>
    %cst_131 = arith.constant 0.000000e+00 : f32
    %400 = vector.shape_cast %380 : vector<1x256xf32> to vector<1x256xf32>
    %401 = vector.broadcast %400 : vector<1x256xf32> to vector<16x256xf32>
    %402 = vector.broadcast %cst_131 : f32 to vector<16x256xf32>
    %403 = arith.select %399, %401, %402 : vector<16x256xi1>, vector<16x256xf32>
    %c1_i32_132 = arith.constant 1 : i32
    %404 = vector.broadcast %c1_i32_132 : i32 to vector<1x256xi32>
    %405 = arith.addi %382, %404 : vector<1x256xi32>
    %406 = vector.broadcast %405 : vector<1x256xi32> to vector<16x256xi32>
    %407 = arith.cmpi eq, %246, %406 : vector<16x256xi32>
    %cst_133 = arith.constant 0.000000e+00 : f32
    %408 = vector.shape_cast %376 : vector<1x256xf32> to vector<1x256xf32>
    %409 = vector.broadcast %408 : vector<1x256xf32> to vector<16x256xf32>
    %410 = vector.broadcast %cst_133 : f32 to vector<16x256xf32>
    %411 = arith.select %407, %409, %410 : vector<16x256xi1>, vector<16x256xf32>
    %412 = arith.addf %403, %411 : vector<16x256xf32>
    %413 = arith.truncf %412 : vector<16x256xf32> to vector<16x256xbf16>
    %cst_134 = arith.constant dense<0.000000e+00> : vector<64x256xf32>
    %414 = tpu.matmul %244, %413, %cst_134 {dimension_numbers = #tpu.dot_dimension_numbers<[1], [0], [0], [1], [0, 0, 1, 1], [], []>} : vector<64x16xbf16>, vector<16x256xbf16>, vector<64x256xf32> -> vector<64x256xf32>
    %415 = vector.shape_cast %414 : vector<64x256xf32> to vector<4x16x256xf32>
    %416 = vector.shape_cast %397 : vector<16x256xf32> to vector<1x16x256xf32>
    %417 = vector.broadcast %416 : vector<1x16x256xf32> to vector<4x16x256xf32>
    %418 = arith.mulf %415, %417 : vector<4x16x256xf32>
    %cst_135 = arith.constant dense<0.000000e+00> : vector<4x256xf32>
    %419 = vector.multi_reduction <add>, %418, %cst_135 [1] : vector<4x16x256xf32> to vector<4x256xf32>
    %420 = vector.extract_strided_slice %242 {offsets = [2, 0], sizes = [1, 256], strides = [1, 1]} : vector<9x256xf32> to vector<1x256xf32>
    %421 = vector.broadcast %420 : vector<1x256xf32> to vector<4x256xf32>
    %422 = arith.mulf %419, %421 : vector<4x256xf32>
    %c8_136 = arith.constant 8 : index
    %c0_137 = arith.constant 0 : index
    %423 = vector.load %arg11[%c8_136, %c0_137] : memref<36x256xf32, #tpu.memory_space<vmem>>, vector<4x256xf32>
    tpu.vector_store %arg11[%c8_136, %c0_137], %422 {strides = array<i32>} : memref<36x256xf32, #tpu.memory_space<vmem>>, vector<4x256xf32>,
    %cst_138 = arith.constant 0.000000e+00 : f32
    %424 = vector.broadcast %cst_138 : f32 to vector<1x256xf32>
    %425 = arith.addf %0, %424 : vector<1x256xf32>
    %426 = vector.extract_strided_slice %235 {offsets = [3, 0], sizes = [1, 256], strides = [1, 1]} : vector<9x256xf32> to vector<1x256xf32>
    %427 = arith.addf %425, %426 : vector<1x256xf32>
    %cst_139 = arith.constant -1.000000e+00 : f32
    %428 = vector.broadcast %cst_139 : f32 to vector<1x256xf32>
    %429 = arith.addf %1, %428 : vector<1x256xf32>
    %430 = vector.extract_strided_slice %236 {offsets = [3, 0], sizes = [1, 256], strides = [1, 1]} : vector<9x256xf32> to vector<1x256xf32>
    %431 = arith.addf %429, %430 : vector<1x256xf32>
    %432 = math.floor %427 : vector<1x256xf32>
    %433 = math.floor %431 : vector<1x256xf32>
    %434 = arith.subf %427, %432 : vector<1x256xf32>
    %435 = arith.subf %431, %433 : vector<1x256xf32>
    %cst_140 = arith.constant 1.000000e+00 : f32
    %436 = vector.broadcast %cst_140 : f32 to vector<1x256xf32>
    %437 = arith.subf %436, %434 : vector<1x256xf32>
    %cst_141 = arith.constant 1.000000e+00 : f32
    %438 = vector.broadcast %cst_141 : f32 to vector<1x256xf32>
    %439 = arith.subf %438, %435 : vector<1x256xf32>
    %440 = arith.fptosi %432 : vector<1x256xf32> to vector<1x256xi32>
    %441 = arith.fptosi %433 : vector<1x256xf32> to vector<1x256xi32>
    %442 = vector.broadcast %440 : vector<1x256xi32> to vector<16x256xi32>
    %443 = arith.cmpi eq, %245, %442 : vector<16x256xi32>
    %cst_142 = arith.constant 0.000000e+00 : f32
    %444 = vector.shape_cast %437 : vector<1x256xf32> to vector<1x256xf32>
    %445 = vector.broadcast %444 : vector<1x256xf32> to vector<16x256xf32>
    %446 = vector.broadcast %cst_142 : f32 to vector<16x256xf32>
    %447 = arith.select %443, %445, %446 : vector<16x256xi1>, vector<16x256xf32>
    %c1_i32_143 = arith.constant 1 : i32
    %448 = vector.broadcast %c1_i32_143 : i32 to vector<1x256xi32>
    %449 = arith.addi %440, %448 : vector<1x256xi32>
    %450 = vector.broadcast %449 : vector<1x256xi32> to vector<16x256xi32>
    %451 = arith.cmpi eq, %245, %450 : vector<16x256xi32>
    %cst_144 = arith.constant 0.000000e+00 : f32
    %452 = vector.shape_cast %434 : vector<1x256xf32> to vector<1x256xf32>
    %453 = vector.broadcast %452 : vector<1x256xf32> to vector<16x256xf32>
    %454 = vector.broadcast %cst_144 : f32 to vector<16x256xf32>
    %455 = arith.select %451, %453, %454 : vector<16x256xi1>, vector<16x256xf32>
    %456 = arith.addf %447, %455 : vector<16x256xf32>
    %457 = vector.broadcast %441 : vector<1x256xi32> to vector<16x256xi32>
    %458 = arith.cmpi eq, %246, %457 : vector<16x256xi32>
    %cst_145 = arith.constant 0.000000e+00 : f32
    %459 = vector.shape_cast %439 : vector<1x256xf32> to vector<1x256xf32>
    %460 = vector.broadcast %459 : vector<1x256xf32> to vector<16x256xf32>
    %461 = vector.broadcast %cst_145 : f32 to vector<16x256xf32>
    %462 = arith.select %458, %460, %461 : vector<16x256xi1>, vector<16x256xf32>
    %c1_i32_146 = arith.constant 1 : i32
    %463 = vector.broadcast %c1_i32_146 : i32 to vector<1x256xi32>
    %464 = arith.addi %441, %463 : vector<1x256xi32>
    %465 = vector.broadcast %464 : vector<1x256xi32> to vector<16x256xi32>
    %466 = arith.cmpi eq, %246, %465 : vector<16x256xi32>
    %cst_147 = arith.constant 0.000000e+00 : f32
    %467 = vector.shape_cast %435 : vector<1x256xf32> to vector<1x256xf32>
    %468 = vector.broadcast %467 : vector<1x256xf32> to vector<16x256xf32>
    %469 = vector.broadcast %cst_147 : f32 to vector<16x256xf32>
    %470 = arith.select %466, %468, %469 : vector<16x256xi1>, vector<16x256xf32>
    %471 = arith.addf %462, %470 : vector<16x256xf32>
    %472 = arith.truncf %471 : vector<16x256xf32> to vector<16x256xbf16>
    %cst_148 = arith.constant dense<0.000000e+00> : vector<64x256xf32>
    %473 = tpu.matmul %244, %472, %cst_148 {dimension_numbers = #tpu.dot_dimension_numbers<[1], [0], [0], [1], [0, 0, 1, 1], [], []>} : vector<64x16xbf16>, vector<16x256xbf16>, vector<64x256xf32> -> vector<64x256xf32>
    %474 = vector.shape_cast %473 : vector<64x256xf32> to vector<4x16x256xf32>
    %475 = vector.shape_cast %456 : vector<16x256xf32> to vector<1x16x256xf32>
    %476 = vector.broadcast %475 : vector<1x16x256xf32> to vector<4x16x256xf32>
    %477 = arith.mulf %474, %476 : vector<4x16x256xf32>
    %cst_149 = arith.constant dense<0.000000e+00> : vector<4x256xf32>
    %478 = vector.multi_reduction <add>, %477, %cst_149 [1] : vector<4x16x256xf32> to vector<4x256xf32>
    %479 = vector.extract_strided_slice %242 {offsets = [3, 0], sizes = [1, 256], strides = [1, 1]} : vector<9x256xf32> to vector<1x256xf32>
    %480 = vector.broadcast %479 : vector<1x256xf32> to vector<4x256xf32>
    %481 = arith.mulf %478, %480 : vector<4x256xf32>
    %c12_150 = arith.constant 12 : index
    %c0_151 = arith.constant 0 : index
    %482 = vector.load %arg11[%c12_150, %c0_151] : memref<36x256xf32, #tpu.memory_space<vmem>>, vector<4x256xf32>
    tpu.vector_store %arg11[%c12_150, %c0_151], %481 {strides = array<i32>} : memref<36x256xf32, #tpu.memory_space<vmem>>, vector<4x256xf32>,
    %cst_152 = arith.constant 0.000000e+00 : f32
    %483 = vector.broadcast %cst_152 : f32 to vector<1x256xf32>
    %484 = arith.addf %0, %483 : vector<1x256xf32>
    %485 = vector.extract_strided_slice %235 {offsets = [4, 0], sizes = [1, 256], strides = [1, 1]} : vector<9x256xf32> to vector<1x256xf32>
    %486 = arith.addf %484, %485 : vector<1x256xf32>
    %cst_153 = arith.constant 0.000000e+00 : f32
    %487 = vector.broadcast %cst_153 : f32 to vector<1x256xf32>
    %488 = arith.addf %1, %487 : vector<1x256xf32>
    %489 = vector.extract_strided_slice %236 {offsets = [4, 0], sizes = [1, 256], strides = [1, 1]} : vector<9x256xf32> to vector<1x256xf32>
    %490 = arith.addf %488, %489 : vector<1x256xf32>
    %491 = math.floor %486 : vector<1x256xf32>
    %492 = math.floor %490 : vector<1x256xf32>
    %493 = arith.subf %486, %491 : vector<1x256xf32>
    %494 = arith.subf %490, %492 : vector<1x256xf32>
    %cst_154 = arith.constant 1.000000e+00 : f32
    %495 = vector.broadcast %cst_154 : f32 to vector<1x256xf32>
    %496 = arith.subf %495, %493 : vector<1x256xf32>
    %cst_155 = arith.constant 1.000000e+00 : f32
    %497 = vector.broadcast %cst_155 : f32 to vector<1x256xf32>
    %498 = arith.subf %497, %494 : vector<1x256xf32>
    %499 = arith.fptosi %491 : vector<1x256xf32> to vector<1x256xi32>
    %500 = arith.fptosi %492 : vector<1x256xf32> to vector<1x256xi32>
    %501 = vector.broadcast %499 : vector<1x256xi32> to vector<16x256xi32>
    %502 = arith.cmpi eq, %245, %501 : vector<16x256xi32>
    %cst_156 = arith.constant 0.000000e+00 : f32
    %503 = vector.shape_cast %496 : vector<1x256xf32> to vector<1x256xf32>
    %504 = vector.broadcast %503 : vector<1x256xf32> to vector<16x256xf32>
    %505 = vector.broadcast %cst_156 : f32 to vector<16x256xf32>
    %506 = arith.select %502, %504, %505 : vector<16x256xi1>, vector<16x256xf32>
    %c1_i32_157 = arith.constant 1 : i32
    %507 = vector.broadcast %c1_i32_157 : i32 to vector<1x256xi32>
    %508 = arith.addi %499, %507 : vector<1x256xi32>
    %509 = vector.broadcast %508 : vector<1x256xi32> to vector<16x256xi32>
    %510 = arith.cmpi eq, %245, %509 : vector<16x256xi32>
    %cst_158 = arith.constant 0.000000e+00 : f32
    %511 = vector.shape_cast %493 : vector<1x256xf32> to vector<1x256xf32>
    %512 = vector.broadcast %511 : vector<1x256xf32> to vector<16x256xf32>
    %513 = vector.broadcast %cst_158 : f32 to vector<16x256xf32>
    %514 = arith.select %510, %512, %513 : vector<16x256xi1>, vector<16x256xf32>
    %515 = arith.addf %506, %514 : vector<16x256xf32>
    %516 = vector.broadcast %500 : vector<1x256xi32> to vector<16x256xi32>
    %517 = arith.cmpi eq, %246, %516 : vector<16x256xi32>
    %cst_159 = arith.constant 0.000000e+00 : f32
    %518 = vector.shape_cast %498 : vector<1x256xf32> to vector<1x256xf32>
    %519 = vector.broadcast %518 : vector<1x256xf32> to vector<16x256xf32>
    %520 = vector.broadcast %cst_159 : f32 to vector<16x256xf32>
    %521 = arith.select %517, %519, %520 : vector<16x256xi1>, vector<16x256xf32>
    %c1_i32_160 = arith.constant 1 : i32
    %522 = vector.broadcast %c1_i32_160 : i32 to vector<1x256xi32>
    %523 = arith.addi %500, %522 : vector<1x256xi32>
    %524 = vector.broadcast %523 : vector<1x256xi32> to vector<16x256xi32>
    %525 = arith.cmpi eq, %246, %524 : vector<16x256xi32>
    %cst_161 = arith.constant 0.000000e+00 : f32
    %526 = vector.shape_cast %494 : vector<1x256xf32> to vector<1x256xf32>
    %527 = vector.broadcast %526 : vector<1x256xf32> to vector<16x256xf32>
    %528 = vector.broadcast %cst_161 : f32 to vector<16x256xf32>
    %529 = arith.select %525, %527, %528 : vector<16x256xi1>, vector<16x256xf32>
    %530 = arith.addf %521, %529 : vector<16x256xf32>
    %531 = arith.truncf %530 : vector<16x256xf32> to vector<16x256xbf16>
    %cst_162 = arith.constant dense<0.000000e+00> : vector<64x256xf32>
    %532 = tpu.matmul %244, %531, %cst_162 {dimension_numbers = #tpu.dot_dimension_numbers<[1], [0], [0], [1], [0, 0, 1, 1], [], []>} : vector<64x16xbf16>, vector<16x256xbf16>, vector<64x256xf32> -> vector<64x256xf32>
    %533 = vector.shape_cast %532 : vector<64x256xf32> to vector<4x16x256xf32>
    %534 = vector.shape_cast %515 : vector<16x256xf32> to vector<1x16x256xf32>
    %535 = vector.broadcast %534 : vector<1x16x256xf32> to vector<4x16x256xf32>
    %536 = arith.mulf %533, %535 : vector<4x16x256xf32>
    %cst_163 = arith.constant dense<0.000000e+00> : vector<4x256xf32>
    %537 = vector.multi_reduction <add>, %536, %cst_163 [1] : vector<4x16x256xf32> to vector<4x256xf32>
    %538 = vector.extract_strided_slice %242 {offsets = [4, 0], sizes = [1, 256], strides = [1, 1]} : vector<9x256xf32> to vector<1x256xf32>
    %539 = vector.broadcast %538 : vector<1x256xf32> to vector<4x256xf32>
    %540 = arith.mulf %537, %539 : vector<4x256xf32>
    %c16_164 = arith.constant 16 : index
    %c0_165 = arith.constant 0 : index
    %541 = vector.load %arg11[%c16_164, %c0_165] : memref<36x256xf32, #tpu.memory_space<vmem>>, vector<4x256xf32>
    tpu.vector_store %arg11[%c16_164, %c0_165], %540 {strides = array<i32>} : memref<36x256xf32, #tpu.memory_space<vmem>>, vector<4x256xf32>,
    %cst_166 = arith.constant 0.000000e+00 : f32
    %542 = vector.broadcast %cst_166 : f32 to vector<1x256xf32>
    %543 = arith.addf %0, %542 : vector<1x256xf32>
    %544 = vector.extract_strided_slice %235 {offsets = [5, 0], sizes = [1, 256], strides = [1, 1]} : vector<9x256xf32> to vector<1x256xf32>
    %545 = arith.addf %543, %544 : vector<1x256xf32>
    %cst_167 = arith.constant 1.000000e+00 : f32
    %546 = vector.broadcast %cst_167 : f32 to vector<1x256xf32>
    %547 = arith.addf %1, %546 : vector<1x256xf32>
    %548 = vector.extract_strided_slice %236 {offsets = [5, 0], sizes = [1, 256], strides = [1, 1]} : vector<9x256xf32> to vector<1x256xf32>
    %549 = arith.addf %547, %548 : vector<1x256xf32>
    %550 = math.floor %545 : vector<1x256xf32>
    %551 = math.floor %549 : vector<1x256xf32>
    %552 = arith.subf %545, %550 : vector<1x256xf32>
    %553 = arith.subf %549, %551 : vector<1x256xf32>
    %cst_168 = arith.constant 1.000000e+00 : f32
    %554 = vector.broadcast %cst_168 : f32 to vector<1x256xf32>
    %555 = arith.subf %554, %552 : vector<1x256xf32>
    %cst_169 = arith.constant 1.000000e+00 : f32
    %556 = vector.broadcast %cst_169 : f32 to vector<1x256xf32>
    %557 = arith.subf %556, %553 : vector<1x256xf32>
    %558 = arith.fptosi %550 : vector<1x256xf32> to vector<1x256xi32>
    %559 = arith.fptosi %551 : vector<1x256xf32> to vector<1x256xi32>
    %560 = vector.broadcast %558 : vector<1x256xi32> to vector<16x256xi32>
    %561 = arith.cmpi eq, %245, %560 : vector<16x256xi32>
    %cst_170 = arith.constant 0.000000e+00 : f32
    %562 = vector.shape_cast %555 : vector<1x256xf32> to vector<1x256xf32>
    %563 = vector.broadcast %562 : vector<1x256xf32> to vector<16x256xf32>
    %564 = vector.broadcast %cst_170 : f32 to vector<16x256xf32>
    %565 = arith.select %561, %563, %564 : vector<16x256xi1>, vector<16x256xf32>
    %c1_i32_171 = arith.constant 1 : i32
    %566 = vector.broadcast %c1_i32_171 : i32 to vector<1x256xi32>
    %567 = arith.addi %558, %566 : vector<1x256xi32>
    %568 = vector.broadcast %567 : vector<1x256xi32> to vector<16x256xi32>
    %569 = arith.cmpi eq, %245, %568 : vector<16x256xi32>
    %cst_172 = arith.constant 0.000000e+00 : f32
    %570 = vector.shape_cast %552 : vector<1x256xf32> to vector<1x256xf32>
    %571 = vector.broadcast %570 : vector<1x256xf32> to vector<16x256xf32>
    %572 = vector.broadcast %cst_172 : f32 to vector<16x256xf32>
    %573 = arith.select %569, %571, %572 : vector<16x256xi1>, vector<16x256xf32>
    %574 = arith.addf %565, %573 : vector<16x256xf32>
    %575 = vector.broadcast %559 : vector<1x256xi32> to vector<16x256xi32>
    %576 = arith.cmpi eq, %246, %575 : vector<16x256xi32>
    %cst_173 = arith.constant 0.000000e+00 : f32
    %577 = vector.shape_cast %557 : vector<1x256xf32> to vector<1x256xf32>
    %578 = vector.broadcast %577 : vector<1x256xf32> to vector<16x256xf32>
    %579 = vector.broadcast %cst_173 : f32 to vector<16x256xf32>
    %580 = arith.select %576, %578, %579 : vector<16x256xi1>, vector<16x256xf32>
    %c1_i32_174 = arith.constant 1 : i32
    %581 = vector.broadcast %c1_i32_174 : i32 to vector<1x256xi32>
    %582 = arith.addi %559, %581 : vector<1x256xi32>
    %583 = vector.broadcast %582 : vector<1x256xi32> to vector<16x256xi32>
    %584 = arith.cmpi eq, %246, %583 : vector<16x256xi32>
    %cst_175 = arith.constant 0.000000e+00 : f32
    %585 = vector.shape_cast %553 : vector<1x256xf32> to vector<1x256xf32>
    %586 = vector.broadcast %585 : vector<1x256xf32> to vector<16x256xf32>
    %587 = vector.broadcast %cst_175 : f32 to vector<16x256xf32>
    %588 = arith.select %584, %586, %587 : vector<16x256xi1>, vector<16x256xf32>
    %589 = arith.addf %580, %588 : vector<16x256xf32>
    %590 = arith.truncf %589 : vector<16x256xf32> to vector<16x256xbf16>
    %cst_176 = arith.constant dense<0.000000e+00> : vector<64x256xf32>
    %591 = tpu.matmul %244, %590, %cst_176 {dimension_numbers = #tpu.dot_dimension_numbers<[1], [0], [0], [1], [0, 0, 1, 1], [], []>} : vector<64x16xbf16>, vector<16x256xbf16>, vector<64x256xf32> -> vector<64x256xf32>
    %592 = vector.shape_cast %591 : vector<64x256xf32> to vector<4x16x256xf32>
    %593 = vector.shape_cast %574 : vector<16x256xf32> to vector<1x16x256xf32>
    %594 = vector.broadcast %593 : vector<1x16x256xf32> to vector<4x16x256xf32>
    %595 = arith.mulf %592, %594 : vector<4x16x256xf32>
    %cst_177 = arith.constant dense<0.000000e+00> : vector<4x256xf32>
    %596 = vector.multi_reduction <add>, %595, %cst_177 [1] : vector<4x16x256xf32> to vector<4x256xf32>
    %597 = vector.extract_strided_slice %242 {offsets = [5, 0], sizes = [1, 256], strides = [1, 1]} : vector<9x256xf32> to vector<1x256xf32>
    %598 = vector.broadcast %597 : vector<1x256xf32> to vector<4x256xf32>
    %599 = arith.mulf %596, %598 : vector<4x256xf32>
    %c20_178 = arith.constant 20 : index
    %c0_179 = arith.constant 0 : index
    %600 = vector.load %arg11[%c20_178, %c0_179] : memref<36x256xf32, #tpu.memory_space<vmem>>, vector<4x256xf32>
    tpu.vector_store %arg11[%c20_178, %c0_179], %599 {strides = array<i32>} : memref<36x256xf32, #tpu.memory_space<vmem>>, vector<4x256xf32>,
    %cst_180 = arith.constant 1.000000e+00 : f32
    %601 = vector.broadcast %cst_180 : f32 to vector<1x256xf32>
    %602 = arith.addf %0, %601 : vector<1x256xf32>
    %603 = vector.extract_strided_slice %235 {offsets = [6, 0], sizes = [1, 256], strides = [1, 1]} : vector<9x256xf32> to vector<1x256xf32>
    %604 = arith.addf %602, %603 : vector<1x256xf32>
    %cst_181 = arith.constant -1.000000e+00 : f32
    %605 = vector.broadcast %cst_181 : f32 to vector<1x256xf32>
    %606 = arith.addf %1, %605 : vector<1x256xf32>
    %607 = vector.extract_strided_slice %236 {offsets = [6, 0], sizes = [1, 256], strides = [1, 1]} : vector<9x256xf32> to vector<1x256xf32>
    %608 = arith.addf %606, %607 : vector<1x256xf32>
    %609 = math.floor %604 : vector<1x256xf32>
    %610 = math.floor %608 : vector<1x256xf32>
    %611 = arith.subf %604, %609 : vector<1x256xf32>
    %612 = arith.subf %608, %610 : vector<1x256xf32>
    %cst_182 = arith.constant 1.000000e+00 : f32
    %613 = vector.broadcast %cst_182 : f32 to vector<1x256xf32>
    %614 = arith.subf %613, %611 : vector<1x256xf32>
    %cst_183 = arith.constant 1.000000e+00 : f32
    %615 = vector.broadcast %cst_183 : f32 to vector<1x256xf32>
    %616 = arith.subf %615, %612 : vector<1x256xf32>
    %617 = arith.fptosi %609 : vector<1x256xf32> to vector<1x256xi32>
    %618 = arith.fptosi %610 : vector<1x256xf32> to vector<1x256xi32>
    %619 = vector.broadcast %617 : vector<1x256xi32> to vector<16x256xi32>
    %620 = arith.cmpi eq, %245, %619 : vector<16x256xi32>
    %cst_184 = arith.constant 0.000000e+00 : f32
    %621 = vector.shape_cast %614 : vector<1x256xf32> to vector<1x256xf32>
    %622 = vector.broadcast %621 : vector<1x256xf32> to vector<16x256xf32>
    %623 = vector.broadcast %cst_184 : f32 to vector<16x256xf32>
    %624 = arith.select %620, %622, %623 : vector<16x256xi1>, vector<16x256xf32>
    %c1_i32_185 = arith.constant 1 : i32
    %625 = vector.broadcast %c1_i32_185 : i32 to vector<1x256xi32>
    %626 = arith.addi %617, %625 : vector<1x256xi32>
    %627 = vector.broadcast %626 : vector<1x256xi32> to vector<16x256xi32>
    %628 = arith.cmpi eq, %245, %627 : vector<16x256xi32>
    %cst_186 = arith.constant 0.000000e+00 : f32
    %629 = vector.shape_cast %611 : vector<1x256xf32> to vector<1x256xf32>
    %630 = vector.broadcast %629 : vector<1x256xf32> to vector<16x256xf32>
    %631 = vector.broadcast %cst_186 : f32 to vector<16x256xf32>
    %632 = arith.select %628, %630, %631 : vector<16x256xi1>, vector<16x256xf32>
    %633 = arith.addf %624, %632 : vector<16x256xf32>
    %634 = vector.broadcast %618 : vector<1x256xi32> to vector<16x256xi32>
    %635 = arith.cmpi eq, %246, %634 : vector<16x256xi32>
    %cst_187 = arith.constant 0.000000e+00 : f32
    %636 = vector.shape_cast %616 : vector<1x256xf32> to vector<1x256xf32>
    %637 = vector.broadcast %636 : vector<1x256xf32> to vector<16x256xf32>
    %638 = vector.broadcast %cst_187 : f32 to vector<16x256xf32>
    %639 = arith.select %635, %637, %638 : vector<16x256xi1>, vector<16x256xf32>
    %c1_i32_188 = arith.constant 1 : i32
    %640 = vector.broadcast %c1_i32_188 : i32 to vector<1x256xi32>
    %641 = arith.addi %618, %640 : vector<1x256xi32>
    %642 = vector.broadcast %641 : vector<1x256xi32> to vector<16x256xi32>
    %643 = arith.cmpi eq, %246, %642 : vector<16x256xi32>
    %cst_189 = arith.constant 0.000000e+00 : f32
    %644 = vector.shape_cast %612 : vector<1x256xf32> to vector<1x256xf32>
    %645 = vector.broadcast %644 : vector<1x256xf32> to vector<16x256xf32>
    %646 = vector.broadcast %cst_189 : f32 to vector<16x256xf32>
    %647 = arith.select %643, %645, %646 : vector<16x256xi1>, vector<16x256xf32>
    %648 = arith.addf %639, %647 : vector<16x256xf32>
    %649 = arith.truncf %648 : vector<16x256xf32> to vector<16x256xbf16>
    %cst_190 = arith.constant dense<0.000000e+00> : vector<64x256xf32>
    %650 = tpu.matmul %244, %649, %cst_190 {dimension_numbers = #tpu.dot_dimension_numbers<[1], [0], [0], [1], [0, 0, 1, 1], [], []>} : vector<64x16xbf16>, vector<16x256xbf16>, vector<64x256xf32> -> vector<64x256xf32>
    %651 = vector.shape_cast %650 : vector<64x256xf32> to vector<4x16x256xf32>
    %652 = vector.shape_cast %633 : vector<16x256xf32> to vector<1x16x256xf32>
    %653 = vector.broadcast %652 : vector<1x16x256xf32> to vector<4x16x256xf32>
    %654 = arith.mulf %651, %653 : vector<4x16x256xf32>
    %cst_191 = arith.constant dense<0.000000e+00> : vector<4x256xf32>
    %655 = vector.multi_reduction <add>, %654, %cst_191 [1] : vector<4x16x256xf32> to vector<4x256xf32>
    %656 = vector.extract_strided_slice %242 {offsets = [6, 0], sizes = [1, 256], strides = [1, 1]} : vector<9x256xf32> to vector<1x256xf32>
    %657 = vector.broadcast %656 : vector<1x256xf32> to vector<4x256xf32>
    %658 = arith.mulf %655, %657 : vector<4x256xf32>
    %c24_192 = arith.constant 24 : index
    %c0_193 = arith.constant 0 : index
    %659 = vector.load %arg11[%c24_192, %c0_193] : memref<36x256xf32, #tpu.memory_space<vmem>>, vector<4x256xf32>
    tpu.vector_store %arg11[%c24_192, %c0_193], %658 {strides = array<i32>} : memref<36x256xf32, #tpu.memory_space<vmem>>, vector<4x256xf32>,
    %cst_194 = arith.constant 1.000000e+00 : f32
    %660 = vector.broadcast %cst_194 : f32 to vector<1x256xf32>
    %661 = arith.addf %0, %660 : vector<1x256xf32>
    %662 = vector.extract_strided_slice %235 {offsets = [7, 0], sizes = [1, 256], strides = [1, 1]} : vector<9x256xf32> to vector<1x256xf32>
    %663 = arith.addf %661, %662 : vector<1x256xf32>
    %cst_195 = arith.constant 0.000000e+00 : f32
    %664 = vector.broadcast %cst_195 : f32 to vector<1x256xf32>
    %665 = arith.addf %1, %664 : vector<1x256xf32>
    %666 = vector.extract_strided_slice %236 {offsets = [7, 0], sizes = [1, 256], strides = [1, 1]} : vector<9x256xf32> to vector<1x256xf32>
    %667 = arith.addf %665, %666 : vector<1x256xf32>
    %668 = math.floor %663 : vector<1x256xf32>
    %669 = math.floor %667 : vector<1x256xf32>
    %670 = arith.subf %663, %668 : vector<1x256xf32>
    %671 = arith.subf %667, %669 : vector<1x256xf32>
    %cst_196 = arith.constant 1.000000e+00 : f32
    %672 = vector.broadcast %cst_196 : f32 to vector<1x256xf32>
    %673 = arith.subf %672, %670 : vector<1x256xf32>
    %cst_197 = arith.constant 1.000000e+00 : f32
    %674 = vector.broadcast %cst_197 : f32 to vector<1x256xf32>
    %675 = arith.subf %674, %671 : vector<1x256xf32>
    %676 = arith.fptosi %668 : vector<1x256xf32> to vector<1x256xi32>
    %677 = arith.fptosi %669 : vector<1x256xf32> to vector<1x256xi32>
    %678 = vector.broadcast %676 : vector<1x256xi32> to vector<16x256xi32>
    %679 = arith.cmpi eq, %245, %678 : vector<16x256xi32>
    %cst_198 = arith.constant 0.000000e+00 : f32
    %680 = vector.shape_cast %673 : vector<1x256xf32> to vector<1x256xf32>
    %681 = vector.broadcast %680 : vector<1x256xf32> to vector<16x256xf32>
    %682 = vector.broadcast %cst_198 : f32 to vector<16x256xf32>
    %683 = arith.select %679, %681, %682 : vector<16x256xi1>, vector<16x256xf32>
    %c1_i32_199 = arith.constant 1 : i32
    %684 = vector.broadcast %c1_i32_199 : i32 to vector<1x256xi32>
    %685 = arith.addi %676, %684 : vector<1x256xi32>
    %686 = vector.broadcast %685 : vector<1x256xi32> to vector<16x256xi32>
    %687 = arith.cmpi eq, %245, %686 : vector<16x256xi32>
    %cst_200 = arith.constant 0.000000e+00 : f32
    %688 = vector.shape_cast %670 : vector<1x256xf32> to vector<1x256xf32>
    %689 = vector.broadcast %688 : vector<1x256xf32> to vector<16x256xf32>
    %690 = vector.broadcast %cst_200 : f32 to vector<16x256xf32>
    %691 = arith.select %687, %689, %690 : vector<16x256xi1>, vector<16x256xf32>
    %692 = arith.addf %683, %691 : vector<16x256xf32>
    %693 = vector.broadcast %677 : vector<1x256xi32> to vector<16x256xi32>
    %694 = arith.cmpi eq, %246, %693 : vector<16x256xi32>
    %cst_201 = arith.constant 0.000000e+00 : f32
    %695 = vector.shape_cast %675 : vector<1x256xf32> to vector<1x256xf32>
    %696 = vector.broadcast %695 : vector<1x256xf32> to vector<16x256xf32>
    %697 = vector.broadcast %cst_201 : f32 to vector<16x256xf32>
    %698 = arith.select %694, %696, %697 : vector<16x256xi1>, vector<16x256xf32>
    %c1_i32_202 = arith.constant 1 : i32
    %699 = vector.broadcast %c1_i32_202 : i32 to vector<1x256xi32>
    %700 = arith.addi %677, %699 : vector<1x256xi32>
    %701 = vector.broadcast %700 : vector<1x256xi32> to vector<16x256xi32>
    %702 = arith.cmpi eq, %246, %701 : vector<16x256xi32>
    %cst_203 = arith.constant 0.000000e+00 : f32
    %703 = vector.shape_cast %671 : vector<1x256xf32> to vector<1x256xf32>
    %704 = vector.broadcast %703 : vector<1x256xf32> to vector<16x256xf32>
    %705 = vector.broadcast %cst_203 : f32 to vector<16x256xf32>
    %706 = arith.select %702, %704, %705 : vector<16x256xi1>, vector<16x256xf32>
    %707 = arith.addf %698, %706 : vector<16x256xf32>
    %708 = arith.truncf %707 : vector<16x256xf32> to vector<16x256xbf16>
    %cst_204 = arith.constant dense<0.000000e+00> : vector<64x256xf32>
    %709 = tpu.matmul %244, %708, %cst_204 {dimension_numbers = #tpu.dot_dimension_numbers<[1], [0], [0], [1], [0, 0, 1, 1], [], []>} : vector<64x16xbf16>, vector<16x256xbf16>, vector<64x256xf32> -> vector<64x256xf32>
    %710 = vector.shape_cast %709 : vector<64x256xf32> to vector<4x16x256xf32>
    %711 = vector.shape_cast %692 : vector<16x256xf32> to vector<1x16x256xf32>
    %712 = vector.broadcast %711 : vector<1x16x256xf32> to vector<4x16x256xf32>
    %713 = arith.mulf %710, %712 : vector<4x16x256xf32>
    %cst_205 = arith.constant dense<0.000000e+00> : vector<4x256xf32>
    %714 = vector.multi_reduction <add>, %713, %cst_205 [1] : vector<4x16x256xf32> to vector<4x256xf32>
    %715 = vector.extract_strided_slice %242 {offsets = [7, 0], sizes = [1, 256], strides = [1, 1]} : vector<9x256xf32> to vector<1x256xf32>
    %716 = vector.broadcast %715 : vector<1x256xf32> to vector<4x256xf32>
    %717 = arith.mulf %714, %716 : vector<4x256xf32>
    %c28_206 = arith.constant 28 : index
    %c0_207 = arith.constant 0 : index
    %718 = vector.load %arg11[%c28_206, %c0_207] : memref<36x256xf32, #tpu.memory_space<vmem>>, vector<4x256xf32>
    tpu.vector_store %arg11[%c28_206, %c0_207], %717 {strides = array<i32>} : memref<36x256xf32, #tpu.memory_space<vmem>>, vector<4x256xf32>,
    %cst_208 = arith.constant 1.000000e+00 : f32
    %719 = vector.broadcast %cst_208 : f32 to vector<1x256xf32>
    %720 = arith.addf %0, %719 : vector<1x256xf32>
    %721 = vector.extract_strided_slice %235 {offsets = [8, 0], sizes = [1, 256], strides = [1, 1]} : vector<9x256xf32> to vector<1x256xf32>
    %722 = arith.addf %720, %721 : vector<1x256xf32>
    %cst_209 = arith.constant 1.000000e+00 : f32
    %723 = vector.broadcast %cst_209 : f32 to vector<1x256xf32>
    %724 = arith.addf %1, %723 : vector<1x256xf32>
    %725 = vector.extract_strided_slice %236 {offsets = [8, 0], sizes = [1, 256], strides = [1, 1]} : vector<9x256xf32> to vector<1x256xf32>
    %726 = arith.addf %724, %725 : vector<1x256xf32>
    %727 = math.floor %722 : vector<1x256xf32>
    %728 = math.floor %726 : vector<1x256xf32>
    %729 = arith.subf %722, %727 : vector<1x256xf32>
    %730 = arith.subf %726, %728 : vector<1x256xf32>
    %cst_210 = arith.constant 1.000000e+00 : f32
    %731 = vector.broadcast %cst_210 : f32 to vector<1x256xf32>
    %732 = arith.subf %731, %729 : vector<1x256xf32>
    %cst_211 = arith.constant 1.000000e+00 : f32
    %733 = vector.broadcast %cst_211 : f32 to vector<1x256xf32>
    %734 = arith.subf %733, %730 : vector<1x256xf32>
    %735 = arith.fptosi %727 : vector<1x256xf32> to vector<1x256xi32>
    %736 = arith.fptosi %728 : vector<1x256xf32> to vector<1x256xi32>
    %737 = vector.broadcast %735 : vector<1x256xi32> to vector<16x256xi32>
    %738 = arith.cmpi eq, %245, %737 : vector<16x256xi32>
    %cst_212 = arith.constant 0.000000e+00 : f32
    %739 = vector.shape_cast %732 : vector<1x256xf32> to vector<1x256xf32>
    %740 = vector.broadcast %739 : vector<1x256xf32> to vector<16x256xf32>
    %741 = vector.broadcast %cst_212 : f32 to vector<16x256xf32>
    %742 = arith.select %738, %740, %741 : vector<16x256xi1>, vector<16x256xf32>
    %c1_i32_213 = arith.constant 1 : i32
    %743 = vector.broadcast %c1_i32_213 : i32 to vector<1x256xi32>
    %744 = arith.addi %735, %743 : vector<1x256xi32>
    %745 = vector.broadcast %744 : vector<1x256xi32> to vector<16x256xi32>
    %746 = arith.cmpi eq, %245, %745 : vector<16x256xi32>
    %cst_214 = arith.constant 0.000000e+00 : f32
    %747 = vector.shape_cast %729 : vector<1x256xf32> to vector<1x256xf32>
    %748 = vector.broadcast %747 : vector<1x256xf32> to vector<16x256xf32>
    %749 = vector.broadcast %cst_214 : f32 to vector<16x256xf32>
    %750 = arith.select %746, %748, %749 : vector<16x256xi1>, vector<16x256xf32>
    %751 = arith.addf %742, %750 : vector<16x256xf32>
    %752 = vector.broadcast %736 : vector<1x256xi32> to vector<16x256xi32>
    %753 = arith.cmpi eq, %246, %752 : vector<16x256xi32>
    %cst_215 = arith.constant 0.000000e+00 : f32
    %754 = vector.shape_cast %734 : vector<1x256xf32> to vector<1x256xf32>
    %755 = vector.broadcast %754 : vector<1x256xf32> to vector<16x256xf32>
    %756 = vector.broadcast %cst_215 : f32 to vector<16x256xf32>
    %757 = arith.select %753, %755, %756 : vector<16x256xi1>, vector<16x256xf32>
    %c1_i32_216 = arith.constant 1 : i32
    %758 = vector.broadcast %c1_i32_216 : i32 to vector<1x256xi32>
    %759 = arith.addi %736, %758 : vector<1x256xi32>
    %760 = vector.broadcast %759 : vector<1x256xi32> to vector<16x256xi32>
    %761 = arith.cmpi eq, %246, %760 : vector<16x256xi32>
    %cst_217 = arith.constant 0.000000e+00 : f32
    %762 = vector.shape_cast %730 : vector<1x256xf32> to vector<1x256xf32>
    %763 = vector.broadcast %762 : vector<1x256xf32> to vector<16x256xf32>
    %764 = vector.broadcast %cst_217 : f32 to vector<16x256xf32>
    %765 = arith.select %761, %763, %764 : vector<16x256xi1>, vector<16x256xf32>
    %766 = arith.addf %757, %765 : vector<16x256xf32>
    %767 = arith.truncf %766 : vector<16x256xf32> to vector<16x256xbf16>
    %cst_218 = arith.constant dense<0.000000e+00> : vector<64x256xf32>
    %768 = tpu.matmul %244, %767, %cst_218 {dimension_numbers = #tpu.dot_dimension_numbers<[1], [0], [0], [1], [0, 0, 1, 1], [], []>} : vector<64x16xbf16>, vector<16x256xbf16>, vector<64x256xf32> -> vector<64x256xf32>
    %769 = vector.shape_cast %768 : vector<64x256xf32> to vector<4x16x256xf32>
    %770 = vector.shape_cast %751 : vector<16x256xf32> to vector<1x16x256xf32>
    %771 = vector.broadcast %770 : vector<1x16x256xf32> to vector<4x16x256xf32>
    %772 = arith.mulf %769, %771 : vector<4x16x256xf32>
    %cst_219 = arith.constant dense<0.000000e+00> : vector<4x256xf32>
    %773 = vector.multi_reduction <add>, %772, %cst_219 [1] : vector<4x16x256xf32> to vector<4x256xf32>
    %774 = vector.extract_strided_slice %242 {offsets = [8, 0], sizes = [1, 256], strides = [1, 1]} : vector<9x256xf32> to vector<1x256xf32>
    %775 = vector.broadcast %774 : vector<1x256xf32> to vector<4x256xf32>
    %776 = arith.mulf %773, %775 : vector<4x256xf32>
    %c32_220 = arith.constant 32 : index
    %c0_221 = arith.constant 0 : index
    %777 = vector.load %arg11[%c32_220, %c0_221] : memref<36x256xf32, #tpu.memory_space<vmem>>, vector<4x256xf32>
    tpu.vector_store %arg11[%c32_220, %c0_221], %776 {strides = array<i32>} : memref<36x256xf32, #tpu.memory_space<vmem>>, vector<4x256xf32>,
    %c0_222 = arith.constant 0 : index
    %c0_223 = arith.constant 0 : index
    %778 = vector.load %arg7[%c0_222, %c0_223] : memref<4x36xf32, #tpu.memory_space<vmem>>, vector<4x36xf32>
    %c0_224 = arith.constant 0 : index
    %c0_225 = arith.constant 0 : index
    %779 = vector.load %arg11[%c0_224, %c0_225] : memref<36x256xf32, #tpu.memory_space<vmem>>, vector<36x256xf32>
    %cst_226 = arith.constant dense<0.000000e+00> : vector<4x256xf32>
    %780 = tpu.matmul %778, %779, %cst_226 {dimension_numbers = #tpu.dot_dimension_numbers<[1], [0], [0], [1], [0, 0, 1, 1], [], []>} : vector<4x36xf32>, vector<36x256xf32>, vector<4x256xf32> -> vector<4x256xf32>
    %c0_227 = arith.constant 0 : index
    %c0_228 = arith.constant 0 : index
    %781 = vector.load %arg8[%c0_227, %c0_228] : memref<4x1xf32, #tpu.memory_space<vmem>>, vector<4x1xf32>
    %782 = vector.broadcast %781 : vector<4x1xf32> to vector<4x256xf32>
    %783 = arith.mulf %780, %782 : vector<4x256xf32>
    %c0_229 = arith.constant 0 : index
    %c0_230 = arith.constant 0 : index
    %784 = vector.load %arg9[%c0_229, %c0_230] : memref<4x1xf32, #tpu.memory_space<vmem>>, vector<4x1xf32>
    %785 = vector.broadcast %784 : vector<4x1xf32> to vector<4x256xf32>
    %786 = arith.addf %783, %785 : vector<4x256xf32>
    %cst_231 = arith.constant 0.000000e+00 : f32
    %787 = vector.broadcast %cst_231 : f32 to vector<4x256xf32>
    %788 = arith.maximumf %786, %787 : vector<4x256xf32>
    %c0_232 = arith.constant 0 : index
    %c0_233 = arith.constant 0 : index
    %c0_234 = arith.constant 0 : index
    %789 = vector.load %arg10[%c0_232, %c0_233, %c0_234] : memref<1x4x256xf32, #tpu.memory_space<vmem>>, vector<1x4x256xf32>
    %790 = vector.shape_cast %789 : vector<1x4x256xf32> to vector<4x256xf32>
    %791 = vector.shape_cast %788 : vector<4x256xf32> to vector<1x4x256xf32>
    tpu.vector_store %arg10[%c0_232, %c0_233, %c0_234], %791 {strides = array<i32>} : memref<1x4x256xf32, #tpu.memory_space<vmem>>, vector<1x4x256xf32>,
    return
  }
  func.func @transform_0(%arg0: i32, %arg1: i32) -> (i32, i32) {
    %c0_i32 = arith.constant 0 : i32
    %c0_i32_0 = arith.constant 0 : i32
    return %c0_i32, %arg1 : i32, i32
  }
  func.func @transform_1(%arg0: i32, %arg1: i32) -> (i32, i32, i32) {
    %c0_i32 = arith.constant 0 : i32
    %c0_i32_0 = arith.constant 0 : i32
    %c0_i32_1 = arith.constant 0 : i32
    return %arg0, %c0_i32, %c0_i32_0 : i32, i32, i32
  }
  func.func @transform_2(%arg0: i32, %arg1: i32) -> (i32, i32, i32) {
    %c0_i32 = arith.constant 0 : i32
    %c0_i32_0 = arith.constant 0 : i32
    %c0_i32_1 = arith.constant 0 : i32
    return %arg0, %c0_i32, %c0_i32_0 : i32, i32, i32
  }
  func.func @transform_3(%arg0: i32, %arg1: i32) -> (i32, i32) {
    %c0_i32 = arith.constant 0 : i32
    %c0_i32_0 = arith.constant 0 : i32
    %c0_i32_1 = arith.constant 0 : i32
    return %c0_i32, %c0_i32_0 : i32, i32
  }
  func.func @transform_4(%arg0: i32, %arg1: i32) -> (i32, i32) {
    %c0_i32 = arith.constant 0 : i32
    %c0_i32_0 = arith.constant 0 : i32
    %c0_i32_1 = arith.constant 0 : i32
    return %c0_i32, %c0_i32_0 : i32, i32
  }
  func.func @transform_5(%arg0: i32, %arg1: i32) -> (i32, i32) {
    %c0_i32 = arith.constant 0 : i32
    %c0_i32_0 = arith.constant 0 : i32
    %c0_i32_1 = arith.constant 0 : i32
    return %c0_i32, %c0_i32_0 : i32, i32
  }
  func.func @transform_6(%arg0: i32, %arg1: i32) -> (i32, i32) {
    %c0_i32 = arith.constant 0 : i32
    %c0_i32_0 = arith.constant 0 : i32
    %c0_i32_1 = arith.constant 0 : i32
    return %c0_i32, %c0_i32_0 : i32, i32
  }
  func.func @transform_7(%arg0: i32, %arg1: i32) -> (i32, i32) {
    %c0_i32 = arith.constant 0 : i32
    %c0_i32_0 = arith.constant 0 : i32
    %c0_i32_1 = arith.constant 0 : i32
    return %c0_i32, %c0_i32_0 : i32, i32
  }
  func.func @transform_8(%arg0: i32, %arg1: i32) -> (i32, i32, i32) {
    %c0_i32 = arith.constant 0 : i32
    %c0_i32_0 = arith.constant 0 : i32
    return %arg0, %c0_i32, %arg1 : i32, i32, i32
  }
}

</mosaic_0001>

<bundles_post_ra>
// kernel: tpu_custom_call.1
= control target key start
LH: loop header
LB: loop body
LE: loop exit
PB: predicated region body
PF: predicated region fallthrough
CT: control target
= control target key end

     0   :  { %13 = vsyncpa [#allocation4], 0  ;;  %s6420_s0 = inlined_call_operand.vmem [shape: f32[2,256], index: 0, kind: input, shape index: {}]   ;;  %s6421_s1 = inlined_call_operand.vmem [shape: f32[2,4,290], index: 1, kind: input, shape index: {}]   ;;  %s6422_s2 = inlined_call_operand.vmem [shape: bf16[2,64,16], index: 2, kind: input, shape index: {}]   ;;  %s6423_s3 = inlined_call_operand.vmem [shape: f32[27,36], index: 3, kind: input, shape index: {}]   ;;  %s6424_s4 = inlined_call_operand.vmem [shape: f32[27,1], index: 4, kind: input, shape index: {}]   ;;  %s6425_s5 = inlined_call_operand.vmem [shape: f32[4,36], index: 5, kind: input, shape index: {}]   ;;  %s6426_s6 = inlined_call_operand.vmem [shape: f32[4,1], index: 6, kind: input, shape index: {}]   ;;  %s6427_s7 = inlined_call_operand.vmem [shape: f32[4,1], index: 7, kind: input, shape index: {}]   ;;  %s6428_s8 = inlined_call_operand.hbm [shape: f32[2,4,256], index: 8, kind: output, shape index: {}]  }
   0x1   :  { %15 = vsyncpa [#allocation4 + $0x1], 0  ;;  %s4538_s27 = smov 0   ;;  %s4540_s28 = smov 0  }
   0x2   :  { %s4542_s29 = smov 0   ;;  %s4544_s30 = smov 0  }
   0x3   :  { %s4546_s9 = smov 0   ;;  %s4548_s10 = smov 0  }
   0x4 LB: > { %s4163_s11 = sadd.s32 4294967295, %s4471_s10   ;;  %s4164_s12 = sadd.s32 4294967294, %s4471_s10   ;;  %s4471_s10 = sphi %s4548_s10, %s21_s10   ;;  %s4467_s9 = sphi %s4546_s9, %s6589_s9   ;;  %s4463_s30 = sphi %s4544_s30, %s6588_s30   ;;  %s4459_s29 = sphi %s4542_s29, %s6587_s29   ;;  %s4455_s28 = sphi %s4540_s28, %s6586_s28   ;;  %s4451_s27 = sphi %s4538_s27, %s6585_s27  }
   0x5   : > { %s33_s13 = sadd.s32 1, %s4467_s9  ;;  %s225_s14 = sadd.s32 1, %s4459_s29 }
   0x6   : > { %p35_p0 = scmp.ge.s32.totalorder %s33_s13, 2  ;;  %p235_p1 = scmp.ne.s32.totalorder %s4459_s29, %s4455_s28 }
   0x7   : > { %p236_p2 = scmp.eq.s32.totalorder %s4163_s11, 1  ;;  %p241_p3 = scmp.ne.s32.totalorder %s4455_s28, %s4451_s27 }
   0x8   : > { %s6591_s13 = smov (%p35_p0, %s33_s13), 0  ;;  %p242_p5 = scmp.eq.s32.totalorder %s4164_s12, 1 }
   0x9   : > { %p4578_p4 = por %p236_p2, %p235_p1  ;;  %s220_s16 = ssub.s32 %s4467_s9, %s6591_s13 }
   0xa   : > { %p4168_p6 = scmp.ge.s32.totalorder %s4471_s10, 1  ;;  %p223_p7 = scmp.eq.s32.totalorder %s220_s16, 0 }
   0xb   : > { %p4585_p8 = por %p242_p5, %p241_p3  ;;  %p300_p9 = scmp.lt.s32.totalorder %s4471_s10, 3 }
   0xc   : > { %s4591_s18 = scalar_select %p223_p7, %s4459_s29, %s225_s14  }
   0xd   : > { %p301_p10 = pnand %p4168_p6, %p300_p9 }
   0xf   : > { %304 = sbr.rel (%p301_p10) target bundleno = 1266 (0x4f2), region = 52 }
  0x16   : > { %v362_v0 = vld [vmem:[%s6420_s0] ss:$2 sm:$0x3]  ;;  %v4599_v1 = vld [vmem:[%s6420_s0 + $0x1] ss:$2 sm:$0x3]  ;;  %v379_v2 = vlaneseq }
  0x17   : > { %vm396_vm0 = vcmp.ge.f32.partialorder %v4599_v1, 0.0  ;;  %vm481_vm1 = vcmp.ge.f32.partialorder %v362_v0, 0.0  ;;  %vm398_vm2 = vcmp.le.f32.partialorder %v4599_v1, 15.0  ;;  %vm482_vm3 = vcmp.le.f32.partialorder %v362_v0, 15.0  ;;  %p350_p11 = scmp.lt.s32.totalorder %s4463_s30, 1  ;;  %s4474_s14 = smov 17  }
  0x18   : > { %v4602_v3 = vshrl.u32 %v379_v2, 7  ;;  %v4605_v4 = vadd.f32 -1.0, %v362_v0  ;;  %v4473_v5 = vmov 0.0   ;;  %vm4609_vm4 = vmand %vm481_vm1, %vm482_vm3  ;;  %v4614_v7 = vadd.f32 -1.0, %v4599_v1  ;;  %s4475_s16 = smov 2   ;;  %s4476_s22 = smov 16  }
  0x19   : > { %847 = vmatprep.mubr.f32.mxu0 %v4473_v5  ;;  %v4617_v8 = vadd.f32 1.0, %v4599_v1  ;;  %vm524_vm5 = vmand %vm4609_vm4, %vm396_vm0  ;;  %s4632_s23 = scalar_select %p350_p11, %s4463_s30, 1  ;;  %v4671_v19 = vadd.f32 1.0, %v362_v0 }
  0x1a   : > { %v4620_v9 = vsub.s32 0, %v4602_v3  ;;  %v4623_v10 = vsub.s32 1, %v4602_v3  ;;  %vm368_vm6 = vcmp.ge.f32.partialorder %v4605_v4, 0.0  ;;  %vm369_vm7 = vcmp.le.f32.partialorder %v4605_v4, 15.0  ;;  %vm525_vm8 = vmand %vm524_vm5, %vm398_vm2  ;;  %s4479_s25 = smov 32   ;;  %s4480_s26 = smov 33  }
  0x1b   : > { %vm439_vm9 = vcmp.ge.f32.partialorder %v4617_v8, 0.0  ;;  %vm441_vm10 = vcmp.le.f32.partialorder %v4617_v8, 15.0  ;;  %v4178_v11 = vsel %vm525_vm8, 1.0, %v4473_v5  ;;  %vm4639_vm11 = vmand %vm368_vm6, %vm369_vm7  ;;  %s4241_s24 = sshll.u32 %s4632_s23, 5  ;;  %vm372_vm12 = vcmp.ge.f32.partialorder %v4614_v7, 0.0  ;;  %s4259_s12 = smul.u32 12, %s4632_s23 }
  0x1c   : > { %v532_v13 = vrot.slane %v4178_v11, %v4620_v9  ;;  %v536_v14 = vrot.slane %v4178_v11, %v4623_v10  ;;  %vm440_vm13 = vmand %vm4639_vm11, %vm439_vm9  ;;  %s4654_s11 = scalar_lea.vmem %s6422_s2, %s4241_s24  ;;  %vm374_vm15 = vcmp.le.f32.partialorder %v4614_v7, 15.0  ;;  %s4477_s23 = smov 1  }
  0x1d   : > { %vm442_vm14 = vmand %vm440_vm13, %vm441_vm10  ;;  %s4688_s21 = scalar_lea.vmem %s6421_s1, %s4259_s12  ;;  %vm604_vm13 = vcmp.ge.f32.partialorder %v4671_v19, 0.0  ;;  %s4478_s24 = smov 18  }
  0x1e   : > { %v537_v15 = vcombine.low %v532_v13, %v536_v14  ;;  %v4176_v16 = vsel %vm442_vm14, 1.0, %v4473_v5  ;;  %vm373_vm1 = vmand %vm4639_vm11, %vm372_vm12  ;;  %vm605_vm14 = vcmp.le.f32.partialorder %v4671_v19, 15.0  ;;  %v4706_v32 = vld [vmem:[%s4688_s21] sm:$0xff]  ;;  %s4481_s12 = smov 34   ;;  %v4744_v54 = vld [vmem:[%s4688_s21 + $0x8] sm:$0xf] }
  0x1f   : > { %v449_v17 = vrot.slane %v4176_v16, %v4620_v9  ;;  %v453_v18 = vrot.slane %v4176_v16, %v4623_v10  ;;  %vm484_vm3 = vmand %vm4609_vm4, %vm372_vm12  ;;  %s4484_s19 = smov 112   ;;  %s4485_s20 = smov 110  }
  0x20   : > { %538 = vrot.lane.b32.xlu1 %v537_v15, %s4474_s14  ;;  %vm485_vm5 = vmand %vm484_vm3, %vm374_vm15  ;;  %s4482_s14 = smov 111   ;;  %s4486_s21 = smov 96  }
  0x21   : > { %v454_v20 = vcombine.low %v449_v17, %v453_v18  ;;  %v4177_v21 = vsel %vm485_vm5, 1.0, %v4473_v5  ;;  %vm375_vm6 = vmand %vm373_vm1, %vm374_vm15 }
  0x22   : > { %v492_v22 = vrot.slane %v4177_v21, %v4620_v9  ;;  %v496_v23 = vrot.slane %v4177_v21, %v4623_v10  ;;  %v4174_v24 = vsel %vm375_vm6, 1.0, %v4473_v5  ;;  %vm397_vm7 = vmand %vm4639_vm11, %vm396_vm0 }
  0x23   : > { %455 = vrot.lane.b32.xlu0 %v454_v20, %s4475_s16  ;;  %v382_v25 = vrot.slane %v4174_v24, %v4620_v9  ;;  %v386_v26 = vrot.slane %v4174_v24, %v4623_v10  ;;  %vm399_vm8 = vmand %vm397_vm7, %vm398_vm2  ;;  %s4483_s16 = smov 126   ;;  %vm415_vm7 = vcmask 7168  }
  0x24   : > { %v497_v27 = vcombine.low %v492_v22, %v496_v23  ;;  %v4175_v28 = vsel %vm399_vm8, 1.0, %v4473_v5  ;;  %vm563_vm11 = vmand %vm4609_vm4, %vm439_vm9  ;;  %vm458_vm8 = vcmask 15360  }
  0x25   : > { %v387_v29 = vcombine.low %v382_v25, %v386_v26  ;;  %v406_v30 = vrot.slane %v4175_v28, %v4620_v9  ;;  %v410_v31 = vrot.slane %v4175_v28, %v4623_v10  ;;  %vm564_vm1 = vmand %vm563_vm11, %vm441_vm10  ;;  %vm703_vm11 = vcmask 277504  }
  0x26   : > { %498 = vrot.lane.b32.xlu1 %v497_v27, %s4476_s22  ;;  %v4179_v33 = vsel %vm564_vm1, 1.0, %v4473_v5  ;;  %vm4709_vm3 = vmand %vm604_vm13, %vm605_vm14  ;;  %s4487_s22 = smov 127   ;;  %vm663_vm13 = vcmask 269312   ;;  %vm624_vm14 = vcmask 261120   ;;  %vm517_vm1 = vcmask 916480  }
  0x27   : > { %v389_v35 = vmul.f32 %v387_v29, %v4706_v32  ;;  %v411_v36 = vcombine.low %v406_v30, %v410_v31  ;;  %v571_v37 = vrot.slane %v4179_v33, %v4620_v9  ;;  %v575_v38 = vrot.slane %v4179_v33, %v4623_v10  ;;  %vm607_vm4 = vmand %vm4709_vm3, %vm372_vm12 }
  0x28   : > { %vm608_vm5 = vmand %vm607_vm4, %vm374_vm15  ;;  %vm556_vm4 = vcmask 908288  }
  0x29   : > { %v391_v39 = vcombine.high %v389_v35, %v389_v35  ;;  %393 = vst [vmem:[#allocation2] sm:$0xf] %v389_v35  ;;  %412 = vrot.lane.b32.xlu0 %v411_v36, %s4477_s23  ;;  %v576_v40 = vcombine.low %v571_v37, %v575_v38  ;;  %v4180_v41 = vsel %vm608_vm5, 1.0, %v4473_v5  ;;  %vm646_vm6 = vmand %vm4709_vm3, %vm396_vm0  ;;  %s4488_s23 = smov 95   ;;  %vm679_vm5 = vcmask 777216  }
  0x2a   : > { %v615_v42 = vrot.slane %v4180_v41, %v4620_v9  ;;  %v619_v43 = vrot.slane %v4180_v41, %v4623_v10  ;;  %vm647_vm12 = vmand %vm646_vm6, %vm398_vm2  ;;  %vm541_vm2 = vcmask 138240   ;;  %vm431_vm6 = vcmask 1039360  }
  0x2b   : > { %394 = vst [vmem:[#allocation2 + $0x8] sm:$0xf] %v391_v39  ;;  %577 = vrot.lane.b32.xlu1 %v576_v40, %s4478_s24  ;;  %v4181_v44 = vsel %vm647_vm12, 1.0, %v4473_v5  ;;  %vm686_vm15 = vmand %vm4709_vm3, %vm439_vm9  ;;  %vm501_vm9 = vcmask 130048   ;;  %s4489_s24 = smov 94   ;;  %vm596_vm3 = vcmask 900096  }
  0x2c   : > { %v620_v45 = vcombine.low %v615_v42, %v619_v43  ;;  %v654_v46 = vrot.slane %v4181_v44, %v4620_v9  ;;  %v658_v47 = vrot.slane %v4181_v44, %v4623_v10  ;;  %vm687_vm0 = vmand %vm686_vm15, %vm441_vm10  ;;  %vm580_vm10 = vcmask 146432  }
  0x2d   : > { %v4182_v48 = vsel %vm687_vm0, 1.0, %v4473_v5  ;;  %vm473_vm12 = vcmask 1031168   ;;  %vm639_vm15 = vcmask 785408   ;;  %vm718_vm0 = vcmask 769024  }
  0x2e   : > { %621 = vrot.lane.b32.xlu0 %v620_v45, %s4479_s25  ;;  %v659_v49 = vcombine.low %v654_v46, %v658_v47  ;;  %v694_v50 = vrot.slane %v4182_v48, %v4620_v9  ;;  %v698_v51 = vrot.slane %v4182_v48, %v4623_v10 }
  0x30   : > { %v699_v52 = vcombine.low %v694_v50, %v698_v51 }
  0x32   : > { %660 = vrot.lane.b32.xlu0 %v659_v49, %s4480_s26  ;;  %700 = vrot.lane.b32.xlu1 %v699_v52, %s4481_s12  ;;  %v740_v52 = vld [vmem:[%s6424_s4 + $0x8] sm:$0xff]  ;;  %s341_s26 = sand.u32 1, %s4455_s28  }
  0x33   : > { %s4169_s12 = sshll.u32 %s341_s26, 3 }
  0x92   : > { %v539_v53 = vpop.permute.xlu1 %538 }
  0x93   : > { %v540_v55 = vrot.slane %v539_v53, 4 }
  0x95   : > { %v542_v56 = vsel %vm541_vm2, %v540_v55, %v539_v53  ;;  %v546_v57 = vmul.f32 %v540_v55, %v4744_v54  ;;  %v456_v58 = vpop.permute.xlu0 %455  ;;  %v4490_v53 = vmov 0   ;;  %v742_v55 = vld [vmem:[%s6424_s4 + $0x18] sm:$0x7]  ;;  %vm776_vm2 = vcmask 1043456  }
  0x96   : > { %v545_v59 = vmul.f32 %v542_v56, %v4706_v32  ;;  %v457_v60 = vrot.slane %v456_v58, 4  ;;  %4371 = vset.pattern.permute.xlu1 %v4490_v53  ;;  %4370 = vset.pattern.permute.xlu0 %v4490_v53  ;;  %v4034_v56 = vld [vmem:[%s6427_s7] sm:$0xf] }
  0x97   : > { %554 = vrot.lane.b32.xlu0 %v546_v57, %s4482_s14  ;;  %1138 = vmatprep.mubr.bf16.mxu1 %v4490_v53  ;;  %v4026_v57 = vld [vmem:[%s6426_s6] sm:$0xf] }
  0x98   : > { %v499_v61 = vpop.permute.xlu1 %498  ;;  %550 = vrot.lane.b32.xlu1 %v545_v59, %s4482_s14  ;;  %v463_v63 = vmul.f32 %v457_v60, %v4744_v54  ;;  %v459_v23 = vsel %vm458_vm8, %v457_v60, %v456_v58  ;;  %v549_v31 = vcombine.high %v545_v59, %v545_v59 }
  0x99   : > { %v500_v62 = vrot.slane %v499_v61, 4  ;;  %v462_v27 = vmul.f32 %v459_v23, %v4706_v32 }
  0x9b   : > { %v502_v0 = vsel %vm501_vm9, %v500_v62, %v499_v61  ;;  %v413_v2 = vpop.permute.xlu0 %412  ;;  %v506_v16 = vmul.f32 %v500_v62, %v4744_v54  ;;  %v466_v46 = vcombine.high %v462_v27, %v462_v27 }
  0x9c   : > { %v505_v6 = vmul.f32 %v502_v0, %v4706_v32  ;;  %471 = vrot.lane.b32.xlu1 %v463_v63, %s4483_s16  ;;  %v414_v13 = vrot.slane %v413_v2, 4 }
  0x9d   : > { %v578_v11 = vpop.permute.xlu1 %577  ;;  %v510_v22 = vcombine.low %v506_v16, %v506_v16 }
  0x9e   : > { %v579_v12 = vrot.slane %v578_v11, 4  ;;  %513 = vrot.lane.b32.xlu0 %v505_v6, %s4484_s19  ;;  %v416_v21 = vsel %vm415_vm7, %v414_v13, %v413_v2  ;;  %v509_v34 = vcombine.low %v505_v6, %v505_v6  ;;  %v420_v40 = vmul.f32 %v414_v13, %v4744_v54 }
  0x9f   : > { %v419_v24 = vmul.f32 %v416_v21, %v4706_v32 }
  0xa0   : > { %v581_v14 = vsel %vm580_vm10, %v579_v12, %v578_v11  ;;  %v622_v15 = vpop.permute.xlu0 %621  ;;  %v585_v25 = vmul.f32 %v579_v12, %v4744_v54  ;;  %v424_v44 = vcombine.low %v420_v40, %v420_v40  ;;  %vm763_vm10 = vcmask 293888  }
  0xa1   : > { %v584_v17 = vmul.f32 %v581_v14, %v4706_v32  ;;  %v623_v18 = vrot.slane %v622_v15, 4  ;;  %v423_v48 = vcombine.low %v419_v24, %v419_v24 }
  0xa2   : > { %v589_v29 = vcombine.low %v585_v25, %v585_v25 }
  0xa3   : > { %v629_v20 = vmul.f32 %v623_v18, %v4744_v54  ;;  %592 = vrot.lane.b32.xlu1 %v584_v17, %s4485_s20  ;;  %v625_v38 = vsel %vm624_vm14, %v623_v18, %v622_v15  ;;  %v588_v42 = vcombine.low %v584_v17, %v584_v17 }
  0xa4   : > { %v661_v26 = vpop.permute.xlu0 %660  ;;  %v701_v37 = vpop.permute.xlu1 %700  ;;  %v628_v41 = vmul.f32 %v625_v38, %v4706_v32 }
  0xa5   : > { %637 = vrot.lane.b32.xlu0 %v629_v20, %s4486_s21  ;;  %v662_v28 = vrot.slane %v661_v26, 4  ;;  %v702_v39 = vrot.slane %v701_v37, 4 }
  0xa6   : > { %v632_v47 = vcombine.high %v628_v41, %v628_v41 }
  0xa7   : > { %515 = vrot.lane.b32.xlu1 %v510_v22, %s4484_s19  ;;  %v668_v30 = vmul.f32 %v662_v28, %v4744_v54  ;;  %v664_v33 = vsel %vm663_vm13, %v662_v28, %v661_v26  ;;  %v704_v43 = vsel %vm703_vm11, %v702_v39, %v701_v37  ;;  %v708_v51 = vmul.f32 %v702_v39, %v4744_v54  ;;  %v739_v54 = vld [vmem:[%s6424_s4] sm:$0xff] }
  0xa8   : > { %v667_v35 = vmul.f32 %v664_v33, %v4706_v32  ;;  %v707_v45 = vmul.f32 %v704_v43, %v4706_v32  ;;  %v741_v32 = vld [vmem:[%s6424_s4 + $0x10] sm:$0xff] }
  0xa9   : > { %427 = vrot.lane.b32.xlu0 %v419_v24, %s4487_s22  ;;  %v672_v36 = vcombine.low %v668_v30, %v668_v30 }
  0xaa   : > { %v711_v49 = vcombine.high %v707_v45, %v707_v45  ;;  %v671_v50 = vcombine.low %v667_v35, %v667_v35 }
  0xab   : > { %467 = vrot.lane.b32.xlu1 %v462_v27, %s4483_s16 }
  0xad   : > { %594 = vrot.lane.b32.xlu0 %v589_v29, %s4485_s20 }
  0xaf   : > { %552 = vrot.lane.b32.xlu1 %v549_v31, %s4482_s14  ;;  %s4242_s14 = sshll.u32 %s4463_s30, 7  ;;  %s4492_s30 = smov [#allocation3]  }
  0xb1   : > { %511 = vrot.lane.b32.xlu0 %v509_v34, %s4484_s19 }
  0xb3   : > { %675 = vrot.lane.b32.xlu1 %v667_v35, %s4488_s23 }
  0xb5   : > { %677 = vrot.lane.b32.xlu0 %v672_v36, %s4488_s23 }
  0xb7   : > { %633 = vrot.lane.b32.xlu1 %v628_v41, %s4486_s21 }
  0xb9   : > { %590 = vrot.lane.b32.xlu0 %v588_v42, %s4485_s20 }
  0xbb   : > { %429 = vrot.lane.b32.xlu1 %v424_v44, %s4487_s22 }
  0xbd   : > { %469 = vrot.lane.b32.xlu0 %v466_v46, %s4483_s16  ;;  %s343_s16 = scalar_lea.vmem [#allocation3], %s4169_s12 }
  0xbe   : > { %s4066_s19 = sshll.u32 %s343_s16, 4  ;;  %s6375_s19 = int_to_ptr.vmem [resolvable:$true] %s4066_s19 }
  0xbf   : > { %635 = vrot.lane.b32.xlu1 %v632_v47, %s4486_s21 }
  0xc1   : > { %425 = vrot.lane.b32.xlu0 %v423_v48, %s4487_s22  ;;  %s6373_s22 = scalar_lea.hbm %s6428_s8, %s4242_s14 }
  0xc3   : > { %714 = vrot.lane.b32.xlu1 %v711_v49, %s4489_s24 }
  0xc5   : > { %673 = vrot.lane.b32.xlu0 %v671_v50, %s4488_s23  ;;  %s4393_s23 = scalar_lea.vmem %s6375_s19, 128 }
  0xc6   : > { %p4394_p12 = scmp.ne.s32.totalorder %s6375_s19, %s4393_s23 }
  0xc7   : > { %712 = vrot.lane.b32.xlu1 %v707_v45, %s4489_s24 }
  0xc8   : > { %p4395_p13 = pnand %p4394_p12, %p4578_p4 }
  0xc9   : > { %716 = vrot.lane.b32.xlu0 %v708_v51, %s4489_s24  ;;  %s4397_s24 = sshll.u32 %s4492_s30, 4  ;;  %s4398_s24 = int_to_ptr.vmem [resolvable:$false] %s4397_s24 }
  0xca   : > { %p4396_p0 = pneg %p4395_p13  ;;  %s4399_s25 = scalar_lea.vmem %s4398_s24, 256 }
  0xcb   : > { %755 = vperm.xlu1 %4371, %v741_v32   ;;  %p4400_p1 = scmp.lt.s32.totalorder %s6375_s19, %s4398_s24  ;;  %p4401_p2 = scmp.lt.s32.totalorder %s4399_s25, %s4393_s23 }
  0xcd   : > { %750 = vperm.xlu0 %4370, %v740_v52   ;;  %p4402_p3 = por %p4401_p2, %p4400_p1 }
  0xcf   : > { %745 = vperm.xlu1 %4371, %v739_v54   ;;  %p4403_p5 = pnand %p4402_p3, %p4396_p0 }
  0xd1   : > { %760 = vperm.xlu0 %4370, %v742_v55  }
  0xd3   : > { %4029 = vperm.xlu1 %4371, %v4026_v57   ;;  %v725_v57 = vld [vmem:[%s6423_s3] sm:$0xff] }
  0xd5   : > { %4037 = vperm.xlu0 %4370, %v4034_v56  }
 0x109   : > { %v555_v59 = vpop.permute.xlu0 %554 }
 0x10a   : > { %v551_v58 = vpop.permute.xlu1 %550 }
 0x10e   : > { %v472_v60 = vpop.permute.xlu1 %471 }
 0x110   : > { %v514_v61 = vpop.permute.xlu0 %513 }
 0x115   : > { %v593_v62 = vpop.permute.xlu1 %592 }
 0x117   : > { %v638_v63 = vpop.permute.xlu0 %637 }
 0x119   : > { %v516_v0 = vpop.permute.xlu1 %515 }
 0x11a   : > { %v519_v2 = vsel %vm517_vm1, %v514_v61, %v516_v0 }
 0x11b   : > { %523 = vst [vmem:[#allocation2 + $0x18] sm:$0xf0] %v519_v2  ;;  %v428_v6 = vpop.permute.xlu0 %427 }
 0x11d   : > { %v468_v11 = vpop.permute.xlu1 %467 }
 0x11f   : > { %v595_v12 = vpop.permute.xlu0 %594 }
 0x120   : > { %v598_v13 = vsel %vm596_vm3, %v593_v62, %v595_v12 }
 0x121   : > { %602 = vst [vmem:[#allocation2 + $0x28] sm:$0xf0] %v598_v13  ;;  %v553_v14 = vpop.permute.xlu1 %552 }
 0x122   : > { %v557_v15 = vsel %vm556_vm4, %v551_v58, %v553_v14  ;;  %v558_v16 = vsel %vm556_vm4, %v553_v14, %v555_v59  ;;  %v726_v59 = vld [vmem:[%s6423_s3 + $0x8] sm:$0xff] }
 0x123   : > { %561 = vst [vmem:[#allocation2 + $0x20] sm:$0xf] %v557_v15  ;;  %562 = vst [vmem:[#allocation2 + $0x28] sm:$0xf] %v558_v16  ;;  %v512_v17 = vpop.permute.xlu0 %511 }
 0x124   : > { %v518_v18 = vsel %vm517_vm1, %v512_v17, %v514_v61  ;;  %v728_v61 = vld [vmem:[%s6423_s3 + $0x18] sm:$0x7] }
 0x125   : > { %522 = vst [vmem:[#allocation2 + $0x10] sm:$0xf0] %v518_v18  ;;  %v676_v20 = vpop.permute.xlu1 %675 }
 0x127   : > { %v678_v21 = vpop.permute.xlu0 %677 }
 0x128   : > { %v681_v22 = vsel %vm679_vm5, %v676_v20, %v678_v21 }
 0x129   : > { %685 = vst [vmem:[#allocation2 + $0x38] sm:$0xf0] %v681_v22  ;;  %v634_v23 = vpop.permute.xlu1 %633 }
 0x12a   : > { %v734_v51 = vld [vmem:[#allocation2 + $0x28] sm:$0xff] }
 0x12b   : > { %v591_v24 = vpop.permute.xlu0 %590 }
 0x12c   : > { %v597_v25 = vsel %vm596_vm3, %v591_v24, %v593_v62 }
 0x12d   : > { %601 = vst [vmem:[#allocation2 + $0x20] sm:$0xf0] %v597_v25  ;;  %v430_v26 = vpop.permute.xlu1 %429 }
 0x12e   : > { %v433_v27 = vsel %vm431_vm6, %v428_v6, %v430_v26 }
 0x12f   : > { %437 = vst [vmem:[#allocation2 + $0x8] sm:$0xf0] %v433_v27  ;;  %v470_v28 = vpop.permute.xlu0 %469 }
 0x130   : > { %v474_v29 = vsel %vm473_vm12, %v468_v11, %v470_v28  ;;  %v475_v30 = vsel %vm473_vm12, %v470_v28, %v472_v60  ;;  %v727_v60 = vld [vmem:[%s6423_s3 + $0x10] sm:$0xff] }
 0x131   : > { %478 = vst [vmem:[#allocation2 + $0x10] sm:$0xf] %v474_v29  ;;  %479 = vst [vmem:[#allocation2 + $0x18] sm:$0xf] %v475_v30  ;;  %v636_v31 = vpop.permute.xlu1 %635 }
 0x132   : > { %v640_v33 = vsel %vm639_vm15, %v634_v23, %v636_v31  ;;  %v641_v34 = vsel %vm639_vm15, %v636_v31, %v638_v63  ;;  %v4491_v63 = vmov 1966171168  }
 0x133   : > { %644 = vst [vmem:[#allocation2 + $0x30] sm:$0xf] %v640_v33  ;;  %645 = vst [vmem:[#allocation2 + $0x38] sm:$0xf] %v641_v34  ;;  %v426_v35 = vpop.permute.xlu0 %425  ;;  %v911_v0 = vunpack.c.l.s4 %v4491_v63 }
 0x134   : > { %v432_v36 = vsel %vm431_vm6, %v426_v35, %v428_v6  ;;  %v733_v52 = vld [vmem:[#allocation2 + $0x20] sm:$0xff] }
 0x135   : > { %436 = vst [vmem:[#allocation2] sm:$0xf0] %v432_v36  ;;  %v715_v37 = vpop.permute.xlu1 %714  ;;  %v912_v6 = vunpack.c.0.s8 %v911_v0 }
 0x136   : > { %v730_v38 = vld [vmem:[#allocation2 + $0x8] sm:$0xff] }
 0x137   : > { %v674_v39 = vpop.permute.xlu0 %673  ;;  %v4833_v15 = vsub.s32 %v912_v6, %v4602_v3 }
 0x138   : > { %v680_v40 = vsel %vm679_vm5, %v674_v39, %v676_v20  ;;  %v732_v41 = vld [vmem:[#allocation2 + $0x18] sm:$0xff]  ;;  %v731_v49 = vld [vmem:[#allocation2 + $0x10] sm:$0xff] }
 0x139   : > { %684 = vst [vmem:[#allocation2 + $0x30] sm:$0xf0] %v680_v40  ;;  %v713_v42 = vpop.permute.xlu1 %712  ;;  %v4243_v43 = vpack.c.bf16 %v732_v41, %v730_v38 }
 0x13a   : > { %v719_v44 = vsel %vm718_vm0, %v713_v42, %v715_v37  ;;  %v736_v46 = vld [vmem:[#allocation2 + $0x38] sm:$0xff] }
 0x13b   : > { %723 = vst [vmem:[#allocation2 + $0x40] sm:$0xf] %v719_v44  ;;  %v717_v45 = vpop.permute.xlu0 %716  ;;  %4244 = vmatprep.subr.bf16.mxu0 %v4243_v43  ;;  %v4247_v32 = vpack.c.bf16 %v736_v46, %v734_v51 }
 0x13c   : > { %v720_v47 = vsel %vm718_vm0, %v715_v37, %v717_v45  ;;  %v729_v48 = vld [vmem:[#allocation2] sm:$0xff] }
 0x13d   : > { %724 = vst [vmem:[#allocation2 + $0x48] sm:$0xf] %v720_v47  ;;  %v4245_v50 = vpack.c.bf16 %v731_v49, %v729_v48 }
 0x13f   : > { %4246 = vmatpush1.bf16.msra.mxu0 %v4245_v50 }
 0x140   : > { %4248 = vmatprep.subr.bf16.mxu0 %v4247_v32  ;;  %v735_v54 = vld [vmem:[#allocation2 + $0x30] sm:$0xff] }
 0x141   : > { %v4249_v55 = vpack.c.bf16 %v735_v54, %v733_v52 }
 0x142   : > { %v737_v58 = vld [vmem:[#allocation2 + $0x40] sm:$0xf] }
 0x143   : > { %4250 = vmatpush1.bf16.msra.mxu0 %v4249_v55 }
 0x144   : > { %v738_v56 = vld [vmem:[#allocation2 + $0x48] sm:$0xf] }
 0x145   : > { %4183 = vmatprep.subr.msk.mxu0 %vm776_vm2, %v738_v56 }
 0x147   : > { %4184 = vmatpush1.msk.msra.mxu0 %vm776_vm2, %v737_v58 }
 0x148   : > { %4185 = vmatmul.mubr.msk.f32.vlgmr.msra.gmra.mrb[0].mxu0 %vm763_vm10, %v725_v57 }
 0x149   : > { %853 = vmatprep.mubr.f32.mxu0 %v4473_v5 }
 0x14a   : > { %v756_v62 = vpop.permute.xlu1 %755 }
 0x14c   : > { %4186 = vmatmul.mubr.msk.f32.gmra.mrb[2].mxu0 %vm763_vm10, %v726_v59  ;;  %v751_v16 = vpop.permute.xlu0 %750 }
 0x14d   : > { %859 = vmatprep.mubr.f32.mxu0 %v4473_v5 }
 0x14e   : > { %v746_v2 = vpop.permute.xlu1 %745 }
 0x150   : > { %4187 = vmatmul.mubr.msk.f32.gmra.mrb[4].mxu0 %vm763_vm10, %v727_v60 }
 0x151   : > { %865 = vmatprep.mubr.f32.mxu0 %v4473_v5 }
 0x154   : > { %4188 = vmatmul.mubr.msk.f32.gmra.mrb[6].mxu0 %vm763_vm10, %v728_v61 }
 0x155   : > { %1474 = vmatprep.mubr.bf16.mxu0 %v4490_v53 }
 0x21b   : > { %v849_v11 = vpop.f32.mrb[0].mxu0 }
 0x21c   : > { %v850_v12 = vadd.f32 %v849_v11, %v746_v2  ;;  %v851_v13 = vpop.f32.mrb[1].mxu0 }
 0x21d   : > { %v852_v14 = vadd.f32 %v851_v13, %v746_v2 }
 0x21f   : > { %v909_v17 = vcombine.low %v850_v12, %v852_v14  ;;  %v2286_v18 = vcombine.high %v850_v12, %v852_v14  ;;  %v855_v20 = vpop.f32.mrb[2].mxu0 }
 0x220   : > { %v856_v21 = vadd.f32 %v855_v20, %v751_v16  ;;  %v857_v22 = vpop.f32.mrb[3].mxu0 }
 0x221   : > { %v916_v23 = vrot.slane %v909_v17, %v4833_v15  ;;  %v2293_v24 = vrot.slane %v2286_v18, %v4833_v15  ;;  %v858_v25 = vadd.f32 %v857_v22, %v751_v16 }
 0x223   : > { %v4838_v26 = vrot.slane %v916_v23, %v4833_v15  ;;  %v1294_v27 = vcombine.high %v916_v23, %v916_v23  ;;  %v4841_v28 = vrot.slane %v2293_v24, %v4833_v15  ;;  %v2626_v29 = vcombine.high %v2293_v24, %v2293_v24  ;;  %v861_v30 = vpop.f32.mrb[4].mxu0 }
 0x224   : > { %v928_v31 = vcombine.low %v856_v21, %v858_v25  ;;  %v1954_v33 = vcombine.high %v856_v21, %v858_v25  ;;  %v863_v34 = vpop.f32.mrb[5].mxu0  ;;  %v4863_v48 = vadd.f32 %v861_v30, %v756_v62  ;;  %v4887_v24 = vadd.s32 8, %v4602_v3 }
 0x225   : > { %v4844_v35 = vrot.slane %v1294_v27, %v4833_v15  ;;  %v4847_v36 = vrot.slane %v2626_v29, %v4833_v15  ;;  %v4867_v32 = vadd.f32 %v863_v34, %v756_v62 }
 0x226   : > { %v935_v39 = vrot.slane %v928_v31, %v4833_v15  ;;  %v1961_v40 = vrot.slane %v1954_v33, %v4833_v15 }
 0x227   : > { %v4849_v37 = vpop.f32.mrb[6].mxu0  ;;  %v3278_v59 = vcombine.low %v4863_v48, %v4867_v32 }
 0x228   : > { %v4851_v38 = vpop.f32.mrb[7].mxu0  ;;  %v936_v41 = vcombine.high %v935_v39, %v935_v39  ;;  %v4856_v42 = vrot.slane %v935_v39, %v4833_v15  ;;  %v1968_v44 = vrot.slane %v1961_v40, %v4833_v15  ;;  %v2303_v45 = vcombine.high %v1961_v40, %v1961_v40 }
 0x229   : > { %v3285_v62 = vrot.slane %v3278_v59, %v4833_v15 }
 0x22a   : > { %v1311_v43 = vcombine.high %v4856_v42, %v4856_v42  ;;  %v943_v46 = vrot.slane %v936_v41, %v4833_v15  ;;  %v1970_v50 = vadd.f32 %v1968_v44, %v4614_v7  ;;  %v2310_v51 = vrot.slane %v2303_v45, %v4833_v15 }
 0x22b   : > { %v2636_v54 = vcombine.high %v1968_v44, %v1968_v44  ;;  %v3612_v14 = vcombine.high %v3285_v62, %v3285_v62 }
 0x22c   : > { %v1313_v47 = vadd.f32 %v4599_v1, %v1311_v43  ;;  %v945_v52 = vadd.f32 %v943_v46, %v4614_v7  ;;  %v1635_v55 = vcombine.high %v943_v46, %v943_v46  ;;  %v1972_v57 = vfloor.f32 %v1970_v50 }
 0x22d   : > { %v2312_v58 = vadd.f32 %v4599_v1, %v2310_v51  ;;  %v2638_v60 = vadd.f32 %v2636_v54, %v4617_v8  ;;  %v2957_v2 = vcombine.high %v2310_v51, %v2310_v51  ;;  %v4884_v23 = vrot.slane %v3612_v14, %v4833_v15 }
 0x22e   : > { %v1315_v49 = vfloor.f32 %v1313_v47  ;;  %v947_v61 = vfloor.f32 %v945_v52  ;;  %v4875_v63 = vadd.f32 %v1635_v55, %v4617_v8  ;;  %v4274_v12 = vtrunc.f32 %v1972_v57 }
 0x22f   : > { %v2314_v13 = vfloor.f32 %v2312_v58  ;;  %v2640_v17 = vfloor.f32 %v2638_v60  ;;  %v4881_v22 = vsub.f32 %v1970_v50, %v1972_v57  ;;  %v4890_v25 = vadd.f32 %v2957_v2, %v4614_v7 }
 0x230   : > { %v4266_v56 = vtrunc.f32 %v1315_v49  ;;  %v4878_v0 = vsub.f32 %v1313_v47, %v1315_v49  ;;  %v949_v6 = vsub.f32 %v945_v52, %v947_v61  ;;  %v4262_v11 = vtrunc.f32 %v947_v61 }
 0x231   : > { %v1639_v21 = vfloor.f32 %v4875_v63  ;;  %v4894_v31 = vcvt.f32.s32 %v4274_v12  ;;  %v4896_v33 = vsub.f32 %v2312_v58, %v2314_v13  ;;  %v4900_v40 = vtrunc.f32 %v2314_v13 }
 0x232   : > { %v4267_v16 = vcvt.f32.s32 %v4266_v56  ;;  %v951_v18 = vsub.f32 1.0, %v949_v6  ;;  %v4263_v20 = vcvt.f32.s32 %v4262_v11  ;;  %v1319_v30 = vsub.f32 1.0, %v4878_v0 }
 0x233   : > { %v4902_v41 = vsub.f32 %v2638_v60, %v2640_v17  ;;  %v3292_v43 = vrot.slane %v3285_v62, %v4833_v15  ;;  %v1061_v44 = vrot.slane %v949_v6, %v4623_v10  ;;  %v4909_v46 = vtrunc.f32 %v2640_v17 }
 0x234   : > { %v1020_v27 = vrot.slane %v4263_v20, %v4623_v10  ;;  %v1040_v29 = vadd.s32 1, %v4263_v20  ;;  %v1033_v34 = vrot.slane %v951_v18, %v4623_v10  ;;  %v1388_v39 = vrot.slane %v4267_v16, %v4623_v10 }
 0x235   : > { %v1408_v45 = vadd.s32 1, %v4267_v16  ;;  %v1401_v47 = vrot.slane %v1319_v30, %v4623_v10  ;;  %v1429_v54 = vrot.slane %v4878_v0, %v4623_v10  ;;  %v4919_v55 = vadd.f32 %v4599_v1, %v3292_v43 }
 0x236   : > { %vm1022_vm7 = vcmp.eq.s32.totalorder %v4602_v3, %v1020_v27  ;;  %v1048_v7 = vrot.slane %v1040_v29, %v4623_v10  ;;  %vm1024_vm8 = vcmp.eq.s32.totalorder %v4887_v24, %v1020_v27  ;;  %vm1390_vm11 = vcmp.eq.s32.totalorder %v4602_v3, %v1388_v39 }
 0x237   : > { %v1037_v49 = vsel %vm1022_vm7, %v1033_v34, 0.0  ;;  %vm1392_vm1 = vcmp.eq.s32.totalorder %v4887_v24, %v1388_v39  ;;  %v1039_v15 = vsel %vm1024_vm8, %v1033_v34, 0.0  ;;  %v1416_v57 = vrot.slane %v1408_v45, %v4623_v10 }
 0x238   : > { %vm1050_vm13 = vcmp.eq.s32.totalorder %v4602_v3, %v1048_v7  ;;  %vm1052_vm14 = vcmp.eq.s32.totalorder %v4887_v24, %v1048_v7  ;;  %v1016_v58 = vrot.slane %v4263_v20, %v4620_v9  ;;  %v1405_v59 = vsel %vm1390_vm11, %v1401_v47, 0.0 }
 0x239   : > { %v1065_v50 = vsel %vm1050_vm13, %v1061_v44, 0.0  ;;  %v1067_v51 = vsel %vm1052_vm14, %v1061_v44, 0.0  ;;  %v1407_v60 = vsel %vm1392_vm1, %v1401_v47, 0.0  ;;  %v1029_v61 = vrot.slane %v951_v18, %v4620_v9 }
 0x23a   : > { %v1069_v52 = vadd.f32 %v1065_v50, %v1037_v49  ;;  %v1071_v56 = vadd.f32 %v1067_v51, %v1039_v15  ;;  %v1044_v62 = vrot.slane %v1040_v29, %v4620_v9  ;;  %vm1418_vm3 = vcmp.eq.s32.totalorder %v4602_v3, %v1416_v57 }
 0x23b   : > { %vm1420_vm4 = vcmp.eq.s32.totalorder %v4887_v24, %v1416_v57  ;;  %v1384_v11 = vrot.slane %v4267_v16, %v4620_v9  ;;  %v1433_v1 = vsel %vm1418_vm3, %v1429_v54, 0.0  ;;  %vm1021_vm5 = vcmp.eq.s32.totalorder %v4602_v3, %v1016_v58 }
 0x23c   : > { %v1073_v2 = vpack.c.bf16 %v1071_v56, %v1069_v52  ;;  %v1435_v12 = vsel %vm1420_vm4, %v1429_v54, 0.0  ;;  %vm1023_vm6 = vcmp.eq.s32.totalorder %v4887_v24, %v1016_v58  ;;  %v2961_v13 = vfloor.f32 %v4890_v25 }
 0x23d   : > { %v1437_v14 = vadd.f32 %v1433_v1, %v1405_v59  ;;  %v1439_v17 = vadd.f32 %v1435_v12, %v1407_v60  ;;  %v1057_v18 = vrot.slane %v949_v6, %v4620_v9  ;;  %v3296_v20 = vfloor.f32 %v4919_v55 }
 0x23e   : > { %1106 = vmatprep.subr.bf16.mxu1 %v1073_v2  ;;  %v1036_v27 = vsel %vm1021_vm5, %v1029_v61, 0.0  ;;  %vm1049_vm12 = vcmp.eq.s32.totalorder %v4602_v3, %v1044_v62  ;;  %vm1051_vm15 = vcmp.eq.s32.totalorder %v4887_v24, %v1044_v62  ;;  %v1038_v29 = vsel %vm1023_vm6, %v1029_v61, 0.0 }
 0x23f   : > { %v1441_v16 = vpack.c.bf16 %v1439_v17, %v1437_v14  ;;  %v1064_v34 = vsel %vm1049_vm12, %v1057_v18, 0.0  ;;  %v1066_v39 = vsel %vm1051_vm15, %v1057_v18, 0.0  ;;  %vm1389_vm0 = vcmp.eq.s32.totalorder %v4602_v3, %v1384_v11 }
 0x240   : > { %v1068_v7 = vadd.f32 %v1064_v34, %v1036_v27  ;;  %v1070_v43 = vadd.f32 %v1066_v39, %v1038_v29  ;;  %vm1391_vm7 = vcmp.eq.s32.totalorder %v4887_v24, %v1384_v11  ;;  %v1397_v6 = vrot.slane %v1319_v30, %v4620_v9 }
 0x241   : > { %1442 = vmatprep.subr.bf16.mxu0 %v1441_v16  ;;  %v1412_v44 = vrot.slane %v1408_v45, %v4620_v9  ;;  %v1425_v47 = vrot.slane %v4878_v0, %v4620_v9  ;;  %v1641_v49 = vsub.f32 %v4875_v63, %v1639_v21  ;;  %v4270_v15 = vtrunc.f32 %v1639_v21  ;;  %v4952_v0 = vld [vmem:[%s4654_s11] sm:$0xff]  }
 0x242   : > { %v1072_v50 = vpack.c.bf16 %v1070_v43, %v1068_v7  ;;  %v1976_v51 = vsub.f32 1.0, %v4881_v22  ;;  %v2045_v52 = vrot.slane %v4894_v31, %v4623_v10  ;;  %v1404_v54 = vsel %vm1389_vm0, %v1397_v6, 0.0 }
 0x243   : > { %v1406_v30 = vsel %vm1391_vm7, %v1397_v6, 0.0  ;;  %vm1417_vm8 = vcmp.eq.s32.totalorder %v4602_v3, %v1412_v44  ;;  %vm1419_vm13 = vcmp.eq.s32.totalorder %v4887_v24, %v1412_v44  ;;  %v1643_v57 = vsub.f32 1.0, %v1641_v49  ;;  %v4982_v44 = vld [vmem:[%s4654_s11 + $0x8] sm:$0xff]  }
 0x244   : > { %1107 = vmatpush1.bf16.msra.mxu1 %v1072_v50  ;;  %v1432_v45 = vsel %vm1417_vm8, %v1425_v47, 0.0  ;;  %v1434_v56 = vsel %vm1419_vm13, %v1425_v47, 0.0  ;;  %v4271_v58 = vcvt.f32.s32 %v4270_v15  ;;  %v4956_v63 = vtrunc.f32 %v3296_v20 }
 0x245   : > { %v1436_v21 = vadd.f32 %v1432_v45, %v1404_v54  ;;  %v1438_v59 = vadd.f32 %v1434_v56, %v1406_v30  ;;  %v1753_v60 = vrot.slane %v1641_v49, %v4623_v10  ;;  %v1725_v62 = vrot.slane %v1643_v57, %v4623_v10 }
 0x246   : > { %v1712_v61 = vrot.slane %v4271_v58, %v4623_v10  ;;  %v1732_v2 = vadd.s32 1, %v4271_v58  ;;  %vm2047_vm14 = vcmp.eq.s32.totalorder %v4602_v3, %v2045_v52  ;;  %vm2049_vm11 = vcmp.eq.s32.totalorder %v4887_v24, %v2045_v52 }
 0x247   : > { %v1440_v11 = vpack.c.bf16 %v1438_v59, %v1436_v21  ;;  %v2058_v1 = vrot.slane %v1976_v51, %v4623_v10  ;;  %v2065_v12 = vadd.s32 1, %v4894_v31  ;;  %4197 = vmatmul.mubr.msk.bf16.vlgmr.msra.gmra.mrb[0].mxu1 %vm501_vm9, %v4952_v0  ;;  %v1708_v17 = vrot.slane %v4271_v58, %v4620_v9 }
 0x248   : > { %vm1714_vm1 = vcmp.eq.s32.totalorder %v4602_v3, %v1712_v61  ;;  %vm1716_vm3 = vcmp.eq.s32.totalorder %v4887_v24, %v1712_v61  ;;  %v1740_v14 = vrot.slane %v1732_v2, %v4623_v10  ;;  %1148 = vmatprep.mubr.bf16.mxu1 %v4490_v53  ;;  %v2086_v29 = vrot.slane %v4881_v22, %v4623_v10 }
 0x249   : > { %1443 = vmatpush1.bf16.msra.mxu0 %v1440_v11  ;;  %v1729_v18 = vsel %vm1714_vm1, %v1725_v62, 0.0  ;;  %v1731_v27 = vsel %vm1716_vm3, %v1725_v62, 0.0  ;;  %v2062_v16 = vsel %vm2047_vm14, %v2058_v1, 0.0  ;;  %v2073_v34 = vrot.slane %v2065_v12, %v4623_v10 }
 0x24a   : > { %vm1742_vm4 = vcmp.eq.s32.totalorder %v4602_v3, %v1740_v14  ;;  %vm1744_vm5 = vcmp.eq.s32.totalorder %v4887_v24, %v1740_v14  ;;  %vm1713_vm6 = vcmp.eq.s32.totalorder %v4602_v3, %v1708_v17  ;;  %v2064_v43 = vsel %vm2049_vm11, %v2058_v1, 0.0 }
 0x24b   : > { %v1757_v39 = vsel %vm1742_vm4, %v1753_v60, 0.0  ;;  %v1759_v7 = vsel %vm1744_vm5, %v1753_v60, 0.0  ;;  %v1721_v6 = vrot.slane %v1643_v57, %v4620_v9  ;;  %vm2075_vm12 = vcmp.eq.s32.totalorder %v4602_v3, %v2073_v34 }
 0x24c   : > { %v1761_v47 = vadd.f32 %v1757_v39, %v1729_v18  ;;  %v1763_v50 = vadd.f32 %v1759_v7, %v1731_v27  ;;  %vm2077_vm15 = vcmp.eq.s32.totalorder %v4887_v24, %v2073_v34  ;;  %4201 = vmatmul.mubr.msk.bf16.vlgmr.msra.gmra.mrb[8].mxu0 %vm501_vm9, %v4952_v0  ;;  %v2090_v15 = vsel %vm2075_vm12, %v2086_v29, 0.0 }
 0x24d   : > { %v2092_v54 = vsel %vm2077_vm15, %v2086_v29, 0.0  ;;  %vm1715_vm0 = vcmp.eq.s32.totalorder %v4887_v24, %v1708_v17  ;;  %v1728_v30 = vsel %vm1713_vm6, %v1721_v6, 0.0  ;;  %1484 = vmatprep.mubr.bf16.mxu0 %v4490_v53  ;;  %v2094_v45 = vadd.f32 %v2090_v15, %v2062_v16  ;;  %v5010_v17 = vld [vmem:[%s4654_s11 + $0x10] sm:$0xff]  }
 0x24e   : > { %v1765_v52 = vpack.c.bf16 %v1763_v50, %v1761_v47  ;;  %v2096_v56 = vadd.f32 %v2092_v54, %v2064_v43  ;;  %v1736_v57 = vrot.slane %v1732_v2, %v4620_v9  ;;  %v1749_v58 = vrot.slane %v1641_v49, %v4620_v9 }
 0x24f   : > { %v2041_v21 = vrot.slane %v4894_v31, %v4620_v9  ;;  %v2054_v59 = vrot.slane %v1976_v51, %v4620_v9  ;;  %v2069_v60 = vrot.slane %v2065_v12, %v4620_v9  ;;  %4198 = vmatmul.mubr.msk.bf16.gmra.mrb[4].mxu1 %vm501_vm9, %v4982_v44  ;;  %v1730_v62 = vsel %vm1715_vm0, %v1721_v6, 0.0 }
 0x250   : > { %1766 = vmatprep.subr.bf16.mxu1 %v1765_v52  ;;  %v2098_v61 = vpack.c.bf16 %v2096_v56, %v2094_v45  ;;  %vm1741_vm7 = vcmp.eq.s32.totalorder %v4602_v3, %v1736_v57  ;;  %vm1743_vm8 = vcmp.eq.s32.totalorder %v4887_v24, %v1736_v57  ;;  %1158 = vmatprep.mubr.bf16.mxu1 %v4490_v53  ;;  %v2318_v12 = vsub.f32 1.0, %v4896_v33 }
 0x251   : > { %v1756_v2 = vsel %vm1741_vm7, %v1749_v58, 0.0  ;;  %v1758_v49 = vsel %vm1743_vm8, %v1749_v58, 0.0  ;;  %vm2046_vm13 = vcmp.eq.s32.totalorder %v4602_v3, %v2041_v21  ;;  %vm2048_vm14 = vcmp.eq.s32.totalorder %v4887_v24, %v2041_v21 }
 0x252   : > { %2099 = vmatprep.subr.bf16.mxu0 %v2098_v61  ;;  %v1760_v31 = vadd.f32 %v1756_v2, %v1728_v30  ;;  %v1762_v51 = vadd.f32 %v1758_v49, %v1730_v62  ;;  %v2061_v11 = vsel %vm2046_vm13, %v2054_v59, 0.0  ;;  %v2082_v1 = vrot.slane %v4881_v22, %v4620_v9 }
 0x253   : > { %vm2074_vm11 = vcmp.eq.s32.totalorder %v4602_v3, %v2069_v60  ;;  %vm2076_vm1 = vcmp.eq.s32.totalorder %v4887_v24, %v2069_v60  ;;  %v4279_v14 = vcvt.f32.s32 %v4900_v40  ;;  %v2063_v27 = vsel %vm2048_vm14, %v2054_v59, 0.0  ;;  %v5038_v60 = vld [vmem:[%s4654_s11 + $0x18] sm:$0xff]   ;;  %s4050_s11 = scalar_lea.sflag [#allocation4], %s341_s26 }
 0x254   : > { %v1764_v18 = vpack.c.bf16 %v1762_v51, %v1760_v31  ;;  %v2089_v16 = vsel %vm2074_vm11, %v2082_v1, 0.0  ;;  %v2091_v29 = vsel %vm2076_vm1, %v2082_v1, 0.0  ;;  %4202 = vmatmul.mubr.msk.bf16.gmra.mrb[12].mxu0 %vm501_vm9, %v4982_v44  ;;  %v2400_v7 = vrot.slane %v2318_v12, %v4623_v10 }
 0x255   : > { %v2093_v34 = vadd.f32 %v2089_v16, %v2061_v11  ;;  %v2095_v39 = vadd.f32 %v2091_v29, %v2063_v27  ;;  %v2387_v22 = vrot.slane %v4279_v14, %v4623_v10  ;;  %1494 = vmatprep.mubr.bf16.mxu0 %v4490_v53  ;;  %v2407_v43 = vadd.s32 1, %v4279_v14 }
 0x256   : > { %1767 = vmatpush1.bf16.msra.mxu1 %v1764_v18  ;;  %v2428_v40 = vrot.slane %v4896_v33, %v4623_v10  ;;  %v2644_v6 = vsub.f32 1.0, %v4902_v41  ;;  %v4283_v47 = vcvt.f32.s32 %v4909_v46  ;;  %v2383_v15 = vrot.slane %v4279_v14, %v4620_v9 }
 0x257   : > { %v2097_v50 = vpack.c.bf16 %v2095_v39, %v2093_v34  ;;  %vm2389_vm3 = vcmp.eq.s32.totalorder %v4602_v3, %v2387_v22  ;;  %vm2391_vm4 = vcmp.eq.s32.totalorder %v4887_v24, %v2387_v22  ;;  %4199 = vmatmul.mubr.msk.bf16.gmra.mrb[8].mxu1 %vm501_vm9, %v5010_v17  ;;  %v2415_v30 = vrot.slane %v2407_v43, %v4623_v10 }
 0x258   : > { %v2404_v54 = vsel %vm2389_vm3, %v2400_v7, 0.0  ;;  %v2713_v52 = vrot.slane %v4283_v47, %v4623_v10  ;;  %v2754_v45 = vrot.slane %v4902_v41, %v4623_v10  ;;  %1168 = vmatprep.mubr.bf16.mxu1 %v4490_v53  ;;  %v2406_v46 = vsel %vm2391_vm4, %v2400_v7, 0.0 }
 0x259   : > { %2100 = vmatpush1.bf16.msra.mxu0 %v2097_v50  ;;  %v2726_v56 = vrot.slane %v2644_v6, %v4623_v10  ;;  %v2733_v57 = vadd.s32 1, %v4283_v47  ;;  %vm2388_vm5 = vcmp.eq.s32.totalorder %v4602_v3, %v2383_v15  ;;  %vm2417_vm6 = vcmp.eq.s32.totalorder %v4602_v3, %v2415_v30 }
 0x25a   : > { %vm2419_vm12 = vcmp.eq.s32.totalorder %v4887_v24, %v2415_v30  ;;  %vm2715_vm15 = vcmp.eq.s32.totalorder %v4602_v3, %v2713_v52  ;;  %vm2717_vm0 = vcmp.eq.s32.totalorder %v4887_v24, %v2713_v52  ;;  %v2432_v58 = vsel %vm2417_vm6, %v2428_v40, 0.0 }
 0x25b   : > { %v2434_v21 = vsel %vm2419_vm12, %v2428_v40, 0.0  ;;  %v2730_v59 = vsel %vm2715_vm15, %v2726_v56, 0.0  ;;  %vm2390_vm7 = vcmp.eq.s32.totalorder %v4887_v24, %v2383_v15  ;;  %v2436_v61 = vadd.f32 %v2432_v58, %v2404_v54 }
 0x25c   : > { %v2438_v62 = vadd.f32 %v2434_v21, %v2406_v46  ;;  %v2741_v2 = vrot.slane %v2733_v57, %v4623_v10  ;;  %4203 = vmatmul.mubr.msk.bf16.gmra.mrb[16].mxu0 %vm501_vm9, %v5010_v17  ;;  %v2396_v49 = vrot.slane %v2318_v12, %v4620_v9  ;;  %v2732_v31 = vsel %vm2717_vm0, %v2726_v56, 0.0 }
 0x25d   : > { %1504 = vmatprep.mubr.bf16.mxu0 %v4490_v53  ;;  %v2411_v51 = vrot.slane %v2407_v43, %v4620_v9  ;;  %v2424_v11 = vrot.slane %v4896_v33, %v4620_v9  ;;  %v2709_v1 = vrot.slane %v4283_v47, %v4620_v9  ;;  %v2722_v18 = vrot.slane %v2644_v6, %v4620_v9 }
 0x25e   : > { %v2440_v14 = vpack.c.bf16 %v2438_v62, %v2436_v61  ;;  %vm2743_vm8 = vcmp.eq.s32.totalorder %v4602_v3, %v2741_v2  ;;  %vm2745_vm13 = vcmp.eq.s32.totalorder %v4887_v24, %v2741_v2  ;;  %v2403_v12 = vsel %vm2388_vm5, %v2396_v49, 0.0 }
 0x25f   : > { %v2758_v27 = vsel %vm2743_vm8, %v2754_v45, 0.0  ;;  %v2760_v16 = vsel %vm2745_vm13, %v2754_v45, 0.0  ;;  %4200 = vmatmul.mubr.msk.bf16.gmra.mrb[12].mxu1 %vm501_vm9, %v5038_v60  ;;  %vm2416_vm14 = vcmp.eq.s32.totalorder %v4602_v3, %v2411_v51  ;;  %vm2418_vm11 = vcmp.eq.s32.totalorder %v4887_v24, %v2411_v51 }
 0x260   : > { %2441 = vmatprep.subr.bf16.mxu1 %v2440_v14  ;;  %v2762_v33 = vadd.f32 %v2758_v27, %v2730_v59  ;;  %v2764_v29 = vadd.f32 %v2760_v16, %v2732_v31  ;;  %1798 = vmatprep.mubr.bf16.mxu1 %v4490_v53  ;;  %v2431_v34 = vsel %vm2416_vm14, %v2424_v11, 0.0  ;;  %v2405_v39 = vsel %vm2390_vm7, %v2396_v49, 0.0 }
 0x261   : > { %v2433_v22 = vsel %vm2418_vm11, %v2424_v11, 0.0  ;;  %vm2714_vm1 = vcmp.eq.s32.totalorder %v4602_v3, %v2709_v1  ;;  %vm2716_vm3 = vcmp.eq.s32.totalorder %v4887_v24, %v2709_v1  ;;  %v5067_v7 = vsub.f32 %v4919_v55, %v3296_v20 }
 0x262   : > { %v2766_v43 = vpack.c.bf16 %v2764_v29, %v2762_v33  ;;  %v2435_v40 = vadd.f32 %v2431_v34, %v2403_v12  ;;  %v2437_v6 = vadd.f32 %v2433_v22, %v2405_v39  ;;  %v3621_v47 = vadd.f32 %v4884_v23, %v4617_v8 }
 0x263   : > { %v2737_v50 = vrot.slane %v2733_v57, %v4620_v9  ;;  %v5075_v15 = vsub.f32 %v4890_v25, %v2961_v13  ;;  %v4286_v54 = vtrunc.f32 %v2961_v13  ;;  %v5080_v30 = vcvt.f32.s32 %v4956_v63 }
 0x264   : > { %2767 = vmatprep.subr.bf16.mxu0 %v2766_v43  ;;  %4204 = vmatmul.mubr.msk.bf16.gmra.mrb[20].mxu0 %vm501_vm9, %v5038_v60  ;;  %v2729_v55 = vsel %vm2714_vm1, %v2722_v18, 0.0  ;;  %v2731_v20 = vsel %vm2716_vm3, %v2722_v18, 0.0  ;;  %v2750_v8 = vrot.slane %v4902_v41, %v4620_v9  ;;  %v2439_v13 = vpack.c.bf16 %v2437_v6, %v2435_v40 }
 0x265   : > { %2131 = vmatprep.mubr.bf16.mxu0 %v4490_v53  ;;  %vm2742_vm4 = vcmp.eq.s32.totalorder %v4602_v3, %v2737_v50  ;;  %vm2744_vm5 = vcmp.eq.s32.totalorder %v4887_v24, %v2737_v50  ;;  %v2965_v23 = vsub.f32 1.0, %v5075_v15  ;;  %v4287_v25 = vcvt.f32.s32 %v4286_v54 }
 0x266   : > { %v2757_v63 = vsel %vm2742_vm4, %v2750_v8, 0.0  ;;  %v2759_v52 = vsel %vm2744_vm5, %v2750_v8, 0.0  ;;  %v3300_v45 = vsub.f32 1.0, %v5067_v7  ;;  %v3369_v57 = vrot.slane %v5080_v30, %v4623_v10 }
 0x267   : > { %4205 = vmatmul.mubr.msk.bf16.vlgmr.msra.gmra.mrb[16].mxu1 %vm501_vm9, %v4952_v0  ;;  %v2761_v46 = vadd.f32 %v2757_v63, %v2729_v55  ;;  %v2763_v56 = vadd.f32 %v2759_v52, %v2731_v20  ;;  %v3034_v41 = vrot.slane %v4287_v25, %v4623_v10  ;;  %v3054_v58 = vadd.s32 1, %v4287_v25 }
 0x268   : > { %2442 = vmatpush1.bf16.msra.mxu1 %v2439_v13  ;;  %1808 = vmatprep.mubr.bf16.mxu1 %v4490_v53  ;;  %v3389_v21 = vadd.s32 1, %v5080_v30  ;;  %v3047_v59 = vrot.slane %v2965_v23, %v4623_v10  ;;  %v3623_v61 = vfloor.f32 %v3621_v47  ;;  %v3075_v49 = vrot.slane %v5075_v15, %v4623_v10 }
 0x269   : > { %vm3036_vm6 = vcmp.eq.s32.totalorder %v4602_v3, %v3034_v41  ;;  %vm3038_vm12 = vcmp.eq.s32.totalorder %v4887_v24, %v3034_v41  ;;  %v3062_v62 = vrot.slane %v3054_v58, %v4623_v10  ;;  %v2765_v2 = vpack.c.bf16 %v2763_v56, %v2761_v46 }
 0x26a   : > { %vm3371_vm15 = vcmp.eq.s32.totalorder %v4602_v3, %v3369_v57  ;;  %v3382_v31 = vrot.slane %v3300_v45, %v4623_v10  ;;  %vm3373_vm8 = vcmp.eq.s32.totalorder %v4887_v24, %v3369_v57  ;;  %v3397_v51 = vrot.slane %v3389_v21, %v4623_v10 }
 0x26b   : > { %vm3064_vm0 = vcmp.eq.s32.totalorder %v4602_v3, %v3062_v62  ;;  %vm3066_vm7 = vcmp.eq.s32.totalorder %v4887_v24, %v3062_v62  ;;  %v3051_v11 = vsel %vm3036_vm6, %v3047_v59, 0.0  ;;  %v3053_v1 = vsel %vm3038_vm12, %v3047_v59, 0.0 }
 0x26c   : > { %4209 = vmatmul.mubr.msk.bf16.vlgmr.msra.gmra.mrb[24].mxu0 %vm501_vm9, %v4952_v0  ;;  %v3079_v14 = vsel %vm3064_vm0, %v3075_v49, 0.0  ;;  %v3081_v18 = vsel %vm3066_vm7, %v3075_v49, 0.0  ;;  %v3386_v12 = vsel %vm3371_vm15, %v3382_v31, 0.0  ;;  %v3388_v33 = vsel %vm3373_vm8, %v3382_v31, 0.0 }
 0x26d   : > { %2768 = vmatpush1.bf16.msra.mxu0 %v2765_v2  ;;  %2141 = vmatprep.mubr.bf16.mxu0 %v4490_v53  ;;  %v3083_v27 = vadd.f32 %v3079_v14, %v3051_v11  ;;  %v3085_v16 = vadd.f32 %v3081_v18, %v3053_v1  ;;  %vm3399_vm13 = vcmp.eq.s32.totalorder %v4602_v3, %v3397_v51  ;;  %v4294_v39 = vtrunc.f32 %v3623_v61 }
 0x26e   : > { %vm3401_vm14 = vcmp.eq.s32.totalorder %v4887_v24, %v3397_v51  ;;  %v3410_v34 = vrot.slane %v5067_v7, %v4623_v10  ;;  %v5126_v22 = vsub.f32 %v3621_v47, %v3623_v61  ;;  %v3058_v54 = vrot.slane %v3054_v58, %v4620_v9 }
 0x26f   : > { %4206 = vmatmul.mubr.msk.bf16.gmra.mrb[20].mxu1 %vm501_vm9, %v4982_v44  ;;  %v3087_v29 = vpack.c.bf16 %v3085_v16, %v3083_v27  ;;  %v5132_v20 = vcvt.f32.s32 %v4294_v39  ;;  %v3030_v63 = vrot.slane %v4287_v25, %v4620_v9  ;;  %v3071_v52 = vrot.slane %v5075_v15, %v4620_v9 }
 0x270   : > { %1818 = vmatprep.mubr.bf16.mxu1 %v4490_v53  ;;  %v3414_v43 = vsel %vm3399_vm13, %v3410_v34, 0.0  ;;  %v3416_v40 = vsel %vm3401_vm14, %v3410_v34, 0.0  ;;  %v3627_v8 = vsub.f32 1.0, %v5126_v22  ;;  %vm3063_vm11 = vcmp.eq.s32.totalorder %v4602_v3, %v3058_v54 }
 0x271   : > { %3088 = vmatprep.subr.bf16.mxu1 %v3087_v29  ;;  %v3418_v6 = vadd.f32 %v3414_v43, %v3386_v12  ;;  %v3420_v50 = vadd.f32 %v3416_v40, %v3388_v33  ;;  %v3696_v47 = vrot.slane %v5132_v20, %v4623_v10  ;;  %v5140_v13 = vadd.s32 1, %v5132_v20 }
 0x272   : > { %vm3065_vm1 = vcmp.eq.s32.totalorder %v4887_v24, %v3058_v54  ;;  %v3365_v56 = vrot.slane %v5080_v30, %v4620_v9  ;;  %v3393_v41 = vrot.slane %v3389_v21, %v4620_v9  ;;  %v3709_v57 = vrot.slane %v3627_v8, %v4623_v10 }
 0x273   : > { %v3422_v55 = vpack.c.bf16 %v3420_v50, %v3418_v6  ;;  %v3724_v46 = vrot.slane %v5140_v13, %v4623_v10  ;;  %v3737_v25 = vrot.slane %v5126_v22, %v4623_v10  ;;  %vm3698_vm3 = vcmp.eq.s32.totalorder %v4602_v3, %v3696_v47  ;;  %v761_v50 = vpop.permute.xlu0 %760 }
 0x274   : > { %4210 = vmatmul.mubr.msk.bf16.gmra.mrb[28].mxu0 %vm501_vm9, %v4982_v44  ;;  %vm3700_vm4 = vcmp.eq.s32.totalorder %v4887_v24, %v3696_v47  ;;  %vm3035_vm12 = vcmp.eq.s32.totalorder %v4602_v3, %v3030_v63  ;;  %vm3037_vm15 = vcmp.eq.s32.totalorder %v4887_v24, %v3030_v63  ;;  %v3043_v30 = vrot.slane %v2965_v23, %v4620_v9 }
 0x275   : > { %2151 = vmatprep.mubr.bf16.mxu0 %v4490_v53  ;;  %3423 = vmatprep.subr.bf16.mxu0 %v3422_v55  ;;  %vm3726_vm5 = vcmp.eq.s32.totalorder %v4602_v3, %v3724_v46  ;;  %vm3728_vm6 = vcmp.eq.s32.totalorder %v4887_v24, %v3724_v46  ;;  %v3078_v58 = vsel %vm3063_vm11, %v3071_v52, 0.0  ;;  %v3080_v21 = vsel %vm3065_vm1, %v3071_v52, 0.0 }
 0x276   : > { %v3378_v59 = vrot.slane %v3300_v45, %v4620_v9  ;;  %v3406_v61 = vrot.slane %v5067_v7, %v4620_v9  ;;  %v3713_v62 = vsel %vm3698_vm3, %v3709_v57, 0.0  ;;  %v3715_v2 = vsel %vm3700_vm4, %v3709_v57, 0.0 }
 0x277   : > { %4207 = vmatmul.mubr.msk.bf16.gmra.mrb[24].mxu1 %vm501_vm9, %v5010_v17  ;;  %v3741_v49 = vsel %vm3726_vm5, %v3737_v25, 0.0  ;;  %v3743_v15 = vsel %vm3728_vm6, %v3737_v25, 0.0  ;;  %vm3370_vm0 = vcmp.eq.s32.totalorder %v4602_v3, %v3365_v56  ;;  %vm3372_vm7 = vcmp.eq.s32.totalorder %v4887_v24, %v3365_v56 }
 0x278   : > { %1828 = vmatprep.mubr.bf16.mxu1 %v4490_v53  ;;  %vm3398_vm8 = vcmp.eq.s32.totalorder %v4602_v3, %v3393_v41  ;;  %vm3400_vm13 = vcmp.eq.s32.totalorder %v4887_v24, %v3393_v41  ;;  %v3050_v7 = vsel %vm3035_vm12, %v3043_v30, 0.0  ;;  %v3052_v23 = vsel %vm3037_vm15, %v3043_v30, 0.0 }
 0x279   : > { %v3082_v45 = vadd.f32 %v3078_v58, %v3050_v7  ;;  %v3084_v31 = vadd.f32 %v3080_v21, %v3052_v23  ;;  %v3745_v51 = vadd.f32 %v3741_v49, %v3713_v62  ;;  %v3747_v11 = vadd.f32 %v3743_v15, %v3715_v2 }
 0x27a   : > { %v3385_v1 = vsel %vm3370_vm0, %v3378_v59, 0.0  ;;  %v3387_v14 = vsel %vm3372_vm7, %v3378_v59, 0.0  ;;  %v3413_v18 = vsel %vm3398_vm8, %v3406_v61, 0.0  ;;  %v3415_v27 = vsel %vm3400_vm13, %v3406_v61, 0.0 }
 0x27b   : > { %v3417_v16 = vadd.f32 %v3413_v18, %v3385_v1  ;;  %v3419_v12 = vadd.f32 %v3415_v27, %v3387_v14  ;;  %v3749_v33 = vpack.c.bf16 %v3747_v11, %v3745_v51  ;;  %v3086_v29 = vpack.c.bf16 %v3084_v31, %v3082_v45 }
 0x27c   : > { %4211 = vmatmul.mubr.msk.bf16.gmra.mrb[32].mxu0 %vm501_vm9, %v5010_v17  ;;  %v3692_v39 = vrot.slane %v5132_v20, %v4620_v9  ;;  %v3720_v43 = vrot.slane %v5140_v13, %v4620_v9  ;;  %v3705_v40 = vrot.slane %v3627_v8, %v4620_v9  ;;  %v3733_v6 = vrot.slane %v5126_v22, %v4620_v9 }
 0x27d   : > { %2161 = vmatprep.mubr.bf16.mxu0 %v4490_v53  ;;  %v3421_v34 = vpack.c.bf16 %v3419_v12, %v3417_v16  ;;  %v868_v22 = vadd.f32 %v4849_v37, %v761_v50  ;;  %v870_v52 = vadd.f32 %v4851_v38, %v761_v50  ;;  %v5254_v25 = vsub.s32 2, %v4602_v3 }
 0x27e   : > { %vm3697_vm14 = vcmp.eq.s32.totalorder %v4602_v3, %v3692_v39  ;;  %vm3699_vm11 = vcmp.eq.s32.totalorder %v4887_v24, %v3692_v39  ;;  %vm3725_vm1 = vcmp.eq.s32.totalorder %v4602_v3, %v3720_v43  ;;  %vm3727_vm3 = vcmp.eq.s32.totalorder %v4887_v24, %v3720_v43 }
 0x27f   : > { %4208 = vmatmul.mubr.msk.bf16.gmra.mrb[28].mxu1 %vm501_vm9, %v5038_v60  ;;  %v3712_v54 = vsel %vm3697_vm14, %v3705_v40, 0.0  ;;  %v3714_v55 = vsel %vm3699_vm11, %v3705_v40, 0.0  ;;  %v3740_v20 = vsel %vm3725_vm1, %v3733_v6, 0.0  ;;  %v3742_v8 = vsel %vm3727_vm3, %v3733_v6, 0.0 }
 0x280   : > { %2473 = vmatprep.mubr.bf16.mxu1 %v4490_v53  ;;  %v3744_v47 = vadd.f32 %v3740_v20, %v3712_v54  ;;  %v3746_v13 = vadd.f32 %v3742_v8, %v3714_v55  ;;  %v4191_v63 = vmul.f32 -1.442695, %v868_v22  ;;  %v4192_v56 = vmul.f32 -1.442695, %v870_v52 }
 0x281   : > { %v925_v58 = vadd.f32 %v4838_v26, %v4605_v4  ;;  %v1303_v21 = vadd.f32 %v4844_v35, %v4605_v4  ;;  %v4189_v59 = vmul.f32 -1.442695, %v4863_v48  ;;  %v1632_v2 = vcombine.high %v4838_v26, %v4838_v26  ;;  %v4392_v48 = vld [vmem:[%s6420_s0] ss:$2 sm:$0x3] }
 0x282   : > { %v3748_v46 = vpack.c.bf16 %v3746_v13, %v3744_v47  ;;  %4376 = vpow2.f32 %v4191_v63  ;;  %v2954_v7 = vcombine.high %v4841_v28, %v4841_v28  ;;  %v2302_v23 = vadd.f32 %v4392_v48, %v4841_v28 }
 0x283   : > { %4378 = vpow2.f32 %v4192_v56  ;;  %v946_v49 = vfloor.f32 %v925_v58  ;;  %v1314_v15 = vfloor.f32 %v1303_v21  ;;  %v1634_v26 = vadd.f32 %v1632_v2, %v4605_v4 }
 0x284   : > { %4212 = vmatmul.mubr.msk.bf16.gmra.mrb[36].mxu0 %vm501_vm9, %v5038_v60  ;;  %v1951_v45 = vcombine.high %v4844_v35, %v4844_v35  ;;  %v2635_v51 = vadd.f32 %v4392_v48, %v4847_v36  ;;  %v2956_v28 = vadd.f32 %v2954_v7, %v4671_v19  ;;  %v3273_v1 = vcombine.high %v4847_v36, %v4847_v36 }
 0x285   : > { %2799 = vmatprep.mubr.bf16.mxu0 %v4490_v53  ;;  %v4260_v31 = vtrunc.f32 %v946_v49  ;;  %v4264_v11 = vtrunc.f32 %v1314_v15  ;;  %v2313_v14 = vfloor.f32 %v2302_v23  ;;  %v1638_v18 = vfloor.f32 %v1634_v26 }
 0x286   : > { %v1953_v27 = vadd.f32 %v4392_v48, %v1951_v45  ;;  %v2639_v4 = vfloor.f32 %v2635_v51  ;;  %v3275_v35 = vadd.f32 %v3273_v1, %v4671_v19  ;;  %v948_v43 = vsub.f32 %v925_v58, %v946_v49 }
 0x287   : > { %4213 = vmatmul.mubr.msk.bf16.vlgmr.msra.gmra.mrb[32].mxu1 %vm501_vm9, %v4952_v0  ;;  %v4261_v16 = vcvt.f32.s32 %v4260_v31  ;;  %v4265_v12 = vcvt.f32.s32 %v4264_v11  ;;  %v4268_v36 = vtrunc.f32 %v1638_v18  ;;  %v5301_v40 = vsub.f32 %v2302_v23, %v2313_v14 }
 0x288   : > { %3089 = vmatpush1.bf16.msra.mxu1 %v3086_v29  ;;  %2483 = vmatprep.mubr.bf16.mxu1 %v4490_v53  ;;  %v3611_v29 = vadd.f32 %v4856_v42, %v4671_v19  ;;  %v4280_v6 = vtrunc.f32 %v2639_v4  ;;  %v1316_v54 = vsub.f32 %v1303_v21, %v1314_v15  ;;  %v3295_v20 = vfloor.f32 %v3275_v35 }
 0x289   : > { %3750 = vmatprep.subr.bf16.mxu1 %v3749_v33  ;;  %v2960_v33 = vfloor.f32 %v2956_v28  ;;  %v981_v50 = vadd.s32 1, %v4261_v16  ;;  %v1349_v8 = vadd.s32 1, %v4265_v12  ;;  %v5303_v22 = vsub.f32 %v1634_v26, %v1638_v18 }
 0x28a   : > { %v5307_v47 = vsub.f32 %v2635_v51, %v2639_v4  ;;  %v3622_v19 = vfloor.f32 %v3611_v29  ;;  %v5309_v42 = vcvt.f32.s32 %v4268_v36  ;;  %v950_v56 = vsub.f32 1.0, %v948_v43 }
 0x28b   : > { %v4284_v55 = vtrunc.f32 %v2960_v33  ;;  %v5321_v21 = vsub.f32 %v3275_v35, %v3295_v20  ;;  %v5326_v2 = vtrunc.f32 %v3295_v20  ;;  %v1318_v15 = vsub.f32 1.0, %v1316_v54 }
 0x28c   : > { %4217 = vmatmul.mubr.msk.bf16.vlgmr.msra.gmra.mrb[40].mxu0 %vm501_vm9, %v4952_v0  ;;  %v4377_v37 = vpop.eup %4376  ;;  %v5328_v49 = vsub.f32 %v3611_v29, %v3622_v19  ;;  %v989_v7 = vrot.slane %v981_v50, %v4623_v10  ;;  %v4292_v48 = vtrunc.f32 %v3622_v19  ;;  %v1325_v23 = vrot.slane %v4265_v12, %v4620_v9 }
 0x28d   : > { %2809 = vmatprep.mubr.bf16.mxu0 %v4490_v53  ;;  %3424 = vmatpush1.bf16.msra.mxu0 %v3421_v34  ;;  %v886_v38 = vadd.f32 1.0, %v4377_v37  ;;  %v4379_v41 = vpop.eup %4378  ;;  %v1971_v34 = vfloor.f32 %v1953_v27  ;;  %v957_v37 = vrot.slane %v4261_v16, %v4620_v9  ;;  %v5319_v58 = vcvt.f32.s32 %v4284_v55 }
 0x28e   : > { %v887_v57 = vadd.f32 1.0, %v4379_v41  ;;  %v961_v26 = vrot.slane %v4261_v16, %v4623_v10  ;;  %v1329_v31 = vrot.slane %v4265_v12, %v4623_v10  ;;  %v1338_v51 = vrot.slane %v1318_v15, %v4620_v9 }
 0x28f   : > { %4214 = vmatmul.mubr.msk.bf16.gmra.mrb[36].mxu1 %vm501_vm9, %v4982_v44  ;;  %4380 = vrcp.f32 %v886_v38  ;;  %v5311_v13 = vsub.f32 %v1953_v27, %v1971_v34  ;;  %v4272_v63 = vtrunc.f32 %v1971_v34  ;;  %v985_v38 = vrot.slane %v981_v50, %v4620_v9 }
 0x290   : > { %2493 = vmatprep.mubr.bf16.mxu1 %v4490_v53  ;;  %4382 = vrcp.f32 %v887_v57  ;;  %v5317_v57 = vsub.f32 %v2956_v28, %v2960_v33  ;;  %vm962_vm4 = vcmp.eq.s32.totalorder %v4602_v3, %v957_v37  ;;  %v974_v11 = vrot.slane %v950_v56, %v4623_v10 }
 0x291   : > { %4384 = vpow2.f32 %v4189_v59  ;;  %v1353_v59 = vrot.slane %v1349_v8, %v4620_v9  ;;  %vm990_vm5 = vcmp.eq.s32.totalorder %v4602_v3, %v985_v38  ;;  %vm991_vm12 = vcmp.eq.s32.totalorder %v4602_v3, %v989_v7 }
 0x292   : > { %v1357_v28 = vrot.slane %v1349_v8, %v4623_v10  ;;  %vm1330_vm15 = vcmp.eq.s32.totalorder %v4602_v3, %v1325_v23  ;;  %vm963_vm0 = vcmp.eq.s32.totalorder %v4602_v3, %v961_v26  ;;  %v5348_v18 = vcvt.f32.s32 %v4292_v48 }
 0x293   : > { %vm1358_vm6 = vcmp.eq.s32.totalorder %v4602_v3, %v1353_v59  ;;  %v1342_v16 = vrot.slane %v1318_v15, %v4623_v10  ;;  %vm1331_vm7 = vcmp.eq.s32.totalorder %v4602_v3, %v1329_v31  ;;  %vm992_vm8 = vcmp.eq.s32.totalorder %v4887_v24, %v985_v38 }
 0x294   : > { %4218 = vmatmul.mubr.msk.bf16.gmra.mrb[44].mxu0 %vm501_vm9, %v4982_v44  ;;  %v1345_v35 = vsel %vm1330_vm15, %v1338_v51, 0.0  ;;  %vm1359_vm13 = vcmp.eq.s32.totalorder %v4602_v3, %v1357_v28  ;;  %v1370_v36 = vrot.slane %v1316_v54, %v4623_v10  ;;  %vm1360_vm14 = vcmp.eq.s32.totalorder %v4887_v24, %v1353_v59 }
 0x295   : > { %2819 = vmatprep.mubr.bf16.mxu0 %v4490_v53  ;;  %vm1332_vm11 = vcmp.eq.s32.totalorder %v4887_v24, %v1325_v23  ;;  %vm993_vm1 = vcmp.eq.s32.totalorder %v4887_v24, %v989_v7  ;;  %v1673_v55 = vadd.s32 1, %v5309_v42  ;;  %vm965_vm3 = vcmp.eq.s32.totalorder %v4887_v24, %v961_v26 }
 0x296   : > { %v1374_v50 = vsel %vm1359_vm13, %v1370_v36, 0.0  ;;  %v1649_v19 = vrot.slane %v5309_v42, %v4620_v9  ;;  %v1975_v7 = vsub.f32 1.0, %v5311_v13  ;;  %v1589_v26 = vsub.s32 3, %v4602_v3 }
 0x297   : > { %4215 = vmatmul.mubr.msk.bf16.gmra.mrb[40].mxu1 %vm501_vm9, %v5010_v17  ;;  %v1677_v15 = vrot.slane %v1673_v55, %v4620_v9 }
 0x298   : > { %2503 = vmatprep.mubr.bf16.mxu1 %v4490_v53 }
 0x299   : > { %v5256_v30 = vpop.eup %4380 }
 0x29a   : > { %v5267_v61 = vrot.slane %v5256_v30, %v5254_v25  ;;  %v5269_v62 = vpop.eup %4382 }
 0x29b   : > { %v4385_v39 = vpop.eup %4384 }
 0x29c   : > { %4219 = vmatmul.mubr.msk.bf16.gmra.mrb[48].mxu0 %vm501_vm9, %v5010_v17  ;;  %6465 = vst [vmem:[#allocation6_spill] sm:$0xff] %v5267_v61  ;;  %v884_v52 = vadd.f32 1.0, %v4385_v39  ;;  %v1346_v39 = vsel %vm1331_vm7, %v1342_v16, 0.0 }
 0x29d   : > { %2829 = vmatprep.mubr.bf16.mxu0 %v4490_v53 }
 0x29f   : > { %4216 = vmatmul.mubr.msk.bf16.gmra.mrb[44].mxu1 %vm501_vm9, %v5038_v60 }
 0x2a0   : > { %3120 = vmatprep.mubr.bf16.mxu1 %v4490_v53 }
 0x2a4   : > { %4220 = vmatmul.mubr.msk.bf16.gmra.mrb[52].mxu0 %vm501_vm9, %v5038_v60 }
 0x2a5   : > { %3455 = vmatprep.mubr.bf16.mxu0 %v4490_v53 }
 0x2a7   : > { %4221 = vmatmul.mubr.msk.bf16.vlgmr.msra.gmra.mrb[48].mxu1 %vm501_vm9, %v4952_v0 }
 0x2a8   : > { %3751 = vmatpush1.bf16.msra.mxu1 %v3748_v46  ;;  %3130 = vmatprep.mubr.bf16.mxu1 %v4490_v53  ;;  %v5313_v46 = vcvt.f32.s32 %v4280_v6 }
 0x2ac   : > { %4225 = vmatmul.mubr.msk.bf16.vlgmr.msra.gmra.mrb[56].mxu0 %vm501_vm9, %v4952_v0 }
 0x2ad   : > { %3465 = vmatprep.mubr.bf16.mxu0 %v4490_v53 }
 0x2af   : > { %4222 = vmatmul.mubr.msk.bf16.gmra.mrb[52].mxu1 %vm501_vm9, %v4982_v44 }
 0x2b0   : > { %3140 = vmatprep.mubr.bf16.mxu1 %v4490_v53 }
 0x2b4   : > { %4226 = vmatmul.mubr.msk.bf16.gmra.mrb[60].mxu0 %vm501_vm9, %v4982_v44 }
 0x2b5   : > { %3475 = vmatprep.mubr.bf16.mxu0 %v4490_v53 }
 0x2b7   : > { %4223 = vmatmul.mubr.msk.bf16.gmra.mrb[56].mxu1 %vm501_vm9, %v5010_v17 }
 0x2b8   : > { %3150 = vmatprep.mubr.bf16.mxu1 %v4490_v53 }
 0x2bc   : > { %4227 = vmatmul.mubr.msk.bf16.gmra.mrb[64].mxu0 %vm501_vm9, %v5010_v17 }
 0x2bd   : > { %3485 = vmatprep.mubr.bf16.mxu0 %v4490_v53 }
 0x2bf   : > { %4224 = vmatmul.mubr.msk.bf16.gmra.mrb[60].mxu1 %vm501_vm9, %v5038_v60 }
 0x2c0   : > { %3782 = vmatprep.mubr.bf16.mxu1 %v4490_v53 }
 0x2c4   : > { %4228 = vmatmul.mubr.msk.bf16.gmra.mrb[68].mxu0 %vm501_vm9, %v5038_v60 }
 0x2c5   : > { %4019 = vmatprep.mubr.f32.mxu0 %v4473_v5  ;;  %v5285_v5 = vrot.slane %v5269_v62, %v5254_v25 }
 0x2c7   : > { %4229 = vmatmul.mubr.msk.bf16.vlgmr.msra.gmra.mrb[64].mxu1 %vm501_vm9, %v4952_v0  ;;  %6466 = vst [vmem:[#allocation7_spill] sm:$0xff] %v5285_v5  ;;  %v4190_v0 = vmul.f32 -1.442695, %v4867_v32  ;;  %v4276_v32 = vtrunc.f32 %v2313_v14  ;;  %v1002_v14 = vrot.slane %v948_v43, %v4623_v10 }
 0x2c8   : > { %3792 = vmatprep.mubr.bf16.mxu1 %v4490_v53 }
 0x2c9   : > { %4386 = vpow2.f32 %v4190_v0  ;;  %v998_v0 = vrot.slane %v948_v43, %v4620_v9  ;;  %v1006_v12 = vsel %vm991_vm12, %v1002_v14, 0.0  ;;  %v1008_v38 = vsel %vm993_vm1, %v1002_v14, 0.0 }
 0x2ca   : > { %4388 = vrcp.f32 %v884_v52  ;;  %v5378_v52 = vadd.f32 %v1374_v50, %v1346_v39  ;;  %vm1682_vm12 = vcmp.eq.s32.totalorder %v4602_v3, %v1677_v15  ;;  %v1690_v14 = vrot.slane %v5303_v22, %v4620_v9 }
 0x2cb   : > { %v1005_v1 = vsel %vm990_vm5, %v998_v0, 0.0  ;;  %v1007_v43 = vsel %vm992_vm8, %v998_v0, 0.0  ;;  %vm1333_vm5 = vcmp.eq.s32.totalorder %v4887_v24, %v1329_v31  ;;  %v1653_v31 = vrot.slane %v5309_v42, %v4623_v10 }
 0x2cc   : > { %v1697_v39 = vsel %vm1682_vm12, %v1690_v14, 0.0 }
 0x2cf   : > { %4230 = vmatmul.mubr.msk.bf16.gmra.mrb[68].mxu1 %vm501_vm9, %v4982_v44  ;;  %v5305_v44 = vcvt.f32.s32 %v4276_v32  ;;  %v978_v32 = vsel %vm963_vm0, %v974_v11, 0.0  ;;  %vm1655_vm0 = vcmp.eq.s32.totalorder %v4602_v3, %v1653_v31 }
 0x2d0   : > { %3802 = vmatprep.mubr.bf16.mxu1 %v4490_v53  ;;  %v5364_v34 = vadd.f32 %v1006_v12, %v978_v32 }
 0x2d3   : > { %v4387_v41 = vpop.eup %4386 }
 0x2d4   : > { %v885_v45 = vadd.f32 1.0, %v4387_v41  ;;  %v5367_v6 = vpop.eup %4388  ;;  %v980_v41 = vsel %vm965_vm3, %v974_v11, 0.0 }
 0x2d5   : > { %v5390_v0 = vadd.f32 %v1008_v38, %v980_v41  ;;  %v5409_v42 = vrot.slane %v5367_v6, %v5254_v25 }
 0x2d6   : > { %4390 = vrcp.f32 %v885_v45  ;;  %v1348_v45 = vsel %vm1333_vm5, %v1342_v16, 0.0  ;;  %v2023_v16 = vrot.slane %v5311_v13, %v4620_v9 }
 0x2d7   : > { %4231 = vmatmul.mubr.msk.bf16.gmra.mrb[72].mxu1 %vm501_vm9, %v5010_v17  ;;  %v970_v17 = vrot.slane %v950_v56, %v4620_v9 }
 0x2d8   : > { %3812 = vmatprep.mubr.bf16.mxu1 %v4490_v53  ;;  %v1366_v53 = vrot.slane %v1316_v54, %v4620_v9  ;;  %v1642_v54 = vsub.f32 1.0, %v5303_v22 }
 0x2d9   : > { %v977_v4 = vsel %vm962_vm4, %v970_v17, 0.0  ;;  %vm1361_vm4 = vcmp.eq.s32.totalorder %v4887_v24, %v1357_v28  ;;  %v1681_v28 = vrot.slane %v1673_v55, %v4623_v10 }
 0x2da   : > { %v1373_v27 = vsel %vm1358_vm6, %v1366_v53, 0.0  ;;  %v5357_v33 = vadd.f32 %v1005_v1, %v977_v4  ;;  %v1375_v8 = vsel %vm1360_vm14, %v1366_v53, 0.0  ;;  %v1376_v59 = vsel %vm1361_vm4, %v1370_v36, 0.0 }
 0x2db   : > { %v5360_v29 = vadd.f32 %v1373_v27, %v1345_v35  ;;  %vm1654_vm6 = vcmp.eq.s32.totalorder %v4602_v3, %v1649_v19  ;;  %v1995_v27 = vrot.slane %v1975_v7, %v4620_v9  ;;  %v5412_v4 = vrot.slane %v5367_v6, %v1589_v26 }
 0x2dc   : > { %v1666_v36 = vrot.slane %v1642_v54, %v4623_v10  ;;  %vm1683_vm8 = vcmp.eq.s32.totalorder %v4602_v3, %v1681_v28  ;;  %vm1685_vm4 = vcmp.eq.s32.totalorder %v4887_v24, %v1681_v28  ;;  %v1913_v28 = vsub.s32 4, %v4602_v3 }
 0x2de   : > { %v1670_v38 = vsel %vm1655_vm0, %v1666_v36, 0.0 }
 0x2df   : > { %4232 = vmatmul.mubr.msk.bf16.gmra.mrb[76].mxu1 %vm501_vm9, %v5038_v60  ;;  %vm964_vm9 = vcmp.eq.s32.totalorder %v4887_v24, %v957_v37  ;;  %v4273_v60 = vcvt.f32.s32 %v4272_v63  ;;  %v1347_v37 = vsel %vm1332_vm11, %v1338_v51, 0.0  ;;  %v5396_v51 = vadd.f32 %v1376_v59, %v1348_v45 }
 0x2e0   : > { %v979_v20 = vsel %vm964_vm9, %v970_v17, 0.0  ;;  %v5384_v48 = vpop.eup %4390  ;;  %v5386_v23 = vadd.f32 %v1375_v8, %v1347_v37  ;;  %v1662_v17 = vrot.slane %v1642_v54, %v4620_v9  ;;  %vm1684_vm9 = vcmp.eq.s32.totalorder %v4887_v24, %v1677_v15 }
 0x2e1   : > { %v2006_v63 = vadd.s32 1, %v4273_v60  ;;  %v5380_v56 = vadd.f32 %v1007_v43, %v979_v20  ;;  %v1982_v11 = vrot.slane %v4273_v60, %v4620_v9  ;;  %v1986_v35 = vrot.slane %v4273_v60, %v4623_v10 }
 0x2e2   : > { %v1669_v12 = vsel %vm1654_vm6, %v1662_v17, 0.0  ;;  %v5417_v32 = vrot.slane %v5384_v48, %v5254_v25  ;;  %v1694_v60 = vrot.slane %v5303_v22, %v4623_v10  ;;  %v1999_v43 = vrot.slane %v1975_v7, %v4623_v10 }
 0x2e3   : > { %v2010_v53 = vrot.slane %v2006_v63, %v4620_v9  ;;  %v2014_v1 = vrot.slane %v2006_v63, %v4623_v10  ;;  %vm1987_vm7 = vcmp.eq.s32.totalorder %v4602_v3, %v1982_v11  ;;  %v2027_v25 = vrot.slane %v5311_v13, %v4623_v10 }
 0x2e4   : > { %v5432_v50 = vrot.slane %v5384_v48, %v1589_v26  ;;  %vm1988_vm14 = vcmp.eq.s32.totalorder %v4602_v3, %v1986_v35  ;;  %vm1656_vm11 = vcmp.eq.s32.totalorder %v4887_v24, %v1649_v19  ;;  %v5436_v20 = vadd.f32 %v1697_v39, %v1669_v12 }
 0x2e5   : > { %vm2015_vm15 = vcmp.eq.s32.totalorder %v4602_v3, %v2010_v53  ;;  %vm2016_vm13 = vcmp.eq.s32.totalorder %v4602_v3, %v2014_v1  ;;  %v2002_v54 = vsel %vm1987_vm7, %v1995_v27, 0.0  ;;  %v1698_v8 = vsel %vm1683_vm8, %v1694_v60, 0.0 }
 0x2e6   : > { %v2030_v55 = vsel %vm2015_vm15, %v2023_v16, 0.0  ;;  %v2031_v22 = vsel %vm2016_vm13, %v2027_v25, 0.0  ;;  %v1699_v63 = vsel %vm1684_vm9, %v1690_v14, 0.0  ;;  %vm1989_vm1 = vcmp.eq.s32.totalorder %v4887_v24, %v1982_v11 }
 0x2e7   : > { %vm2017_vm3 = vcmp.eq.s32.totalorder %v4887_v24, %v2010_v53  ;;  %v2348_v13 = vadd.s32 1, %v5305_v44  ;;  %v5441_v37 = vadd.f32 %v2030_v55, %v2002_v54  ;;  %v2003_v41 = vsel %vm1988_vm14, %v1999_v43, 0.0 }
 0x2e8   : > { %v1671_v59 = vsel %vm1656_vm11, %v1662_v17, 0.0  ;;  %v5445_v19 = vadd.f32 %v1698_v8, %v1670_v38  ;;  %vm2018_vm5 = vcmp.eq.s32.totalorder %v4887_v24, %v2014_v1  ;;  %v2674_v15 = vadd.s32 1, %v5313_v46 }
 0x2e9   : > { %v5450_v7 = vadd.f32 %v2031_v22, %v2003_v41  ;;  %v5452_v26 = vadd.f32 %v1699_v63, %v1671_v59  ;;  %v2004_v45 = vsel %vm1989_vm1, %v1995_v27, 0.0  ;;  %v2032_v53 = vsel %vm2017_vm3, %v2023_v16, 0.0 }
 0x2ea   : > { %vm1657_vm6 = vcmp.eq.s32.totalorder %v4887_v24, %v1653_v31  ;;  %vm1990_vm12 = vcmp.eq.s32.totalorder %v4887_v24, %v1986_v35  ;;  %v2317_v17 = vsub.f32 1.0, %v5301_v40  ;;  %v2352_v11 = vrot.slane %v2348_v13, %v4620_v9 }
 0x2eb   : > { %v1700_v14 = vsel %vm1685_vm4, %v1694_v60, 0.0  ;;  %v2033_v1 = vsel %vm2018_vm5, %v2027_v25, 0.0  ;;  %v2324_v12 = vrot.slane %v5305_v44, %v4620_v9  ;;  %v5461_v39 = vadd.f32 %v2032_v53, %v2004_v45 }
 0x2ec   : > { %v2246_v27 = vsub.s32 5, %v4602_v3  ;;  %v2643_v16 = vsub.f32 1.0, %v5307_v47  ;;  %v2678_v31 = vrot.slane %v2674_v15, %v4620_v9  ;;  %v1672_v35 = vsel %vm1657_vm6, %v1666_v36, 0.0 }
 0x2ed   : > { %v2005_v55 = vsel %vm1990_vm12, %v1999_v43, 0.0  ;;  %v2650_v54 = vrot.slane %v5313_v46, %v4620_v9  ;;  %v2356_v8 = vrot.slane %v2348_v13, %v4623_v10  ;;  %v5469_v60 = vadd.f32 %v1700_v14, %v1672_v35 }
 0x2ee   : > { %v5471_v25 = vadd.f32 %v2033_v1, %v2005_v55  ;;  %v2337_v22 = vrot.slane %v2317_v17, %v4620_v9  ;;  %vm2357_vm15 = vcmp.eq.s32.totalorder %v4602_v3, %v2352_v11  ;;  %v5476_v63 = vrot.slane %v5367_v6, %v1913_v28 }
 0x2ef   : > { %vm2329_vm0 = vcmp.eq.s32.totalorder %v4602_v3, %v2324_v12  ;;  %v2365_v36 = vrot.slane %v5301_v40, %v4620_v9  ;;  %v2328_v43 = vrot.slane %v5305_v44, %v4623_v10  ;;  %v5484_v13 = vrot.slane %v5367_v6, %v2246_v27 }
 0x2f0   : > { %v2663_v38 = vrot.slane %v2643_v16, %v4620_v9  ;;  %vm2683_vm7 = vcmp.eq.s32.totalorder %v4602_v3, %v2678_v31  ;;  %v2691_v41 = vrot.slane %v5307_v47, %v4620_v9  ;;  %vm2655_vm8 = vcmp.eq.s32.totalorder %v4602_v3, %v2650_v54 }
 0x2f1   : > { %6467 = vst [vmem:[#allocation8_spill] sm:$0xff] %v5484_v13  ;;  %v2372_v59 = vsel %vm2357_vm15, %v2365_v36, 0.0  ;;  %vm2358_vm13 = vcmp.eq.s32.totalorder %v4602_v3, %v2356_v8  ;;  %v2682_v45 = vrot.slane %v2674_v15, %v4623_v10  ;;  %v2344_v53 = vsel %vm2329_vm0, %v2337_v22, 0.0 }
 0x2f2   : > { %v2341_v44 = vrot.slane %v2317_v17, %v4623_v10  ;;  %v2369_v14 = vrot.slane %v5301_v40, %v4623_v10  ;;  %v2654_v1 = vrot.slane %v5313_v46, %v4623_v10  ;;  %v5499_v35 = vrot.slane %v5384_v48, %v1913_v28 }
 0x2f3   : > { %v5502_v55 = vrot.slane %v5384_v48, %v2246_v27  ;;  %v2698_v5 = vsel %vm2683_vm7, %v2691_v41, 0.0  ;;  %vm2330_vm9 = vcmp.eq.s32.totalorder %v4602_v3, %v2328_v43  ;;  %v5505_v61 = vadd.f32 %v2372_v59, %v2344_v53 }
 0x2f4   : > { %v2670_v15 = vsel %vm2655_vm8, %v2663_v38, 0.0  ;;  %v2373_v13 = vsel %vm2358_vm13, %v2369_v14, 0.0  ;;  %v2667_v17 = vrot.slane %v2643_v16, %v4623_v10  ;;  %vm2684_vm14 = vcmp.eq.s32.totalorder %v4602_v3, %v2682_v45 }
 0x2f5   : > { %vm2359_vm11 = vcmp.eq.s32.totalorder %v4887_v24, %v2352_v11  ;;  %vm2685_vm1 = vcmp.eq.s32.totalorder %v4887_v24, %v2678_v31  ;;  %v4289_v40 = vcvt.f32.s32 %v5326_v2  ;;  %v5512_v46 = vadd.f32 %v2698_v5, %v2670_v15 }
 0x2f6   : > { %v2345_v28 = vsel %vm2330_vm9, %v2341_v44, 0.0  ;;  %vm2656_vm3 = vcmp.eq.s32.totalorder %v4602_v3, %v2654_v1  ;;  %v2695_v27 = vrot.slane %v5307_v47, %v4623_v10  ;;  %vm2331_vm4 = vcmp.eq.s32.totalorder %v4887_v24, %v2324_v12 }
 0x2f7   : > { %v5517_v59 = vadd.f32 %v2373_v13, %v2345_v28  ;;  %vm2657_vm5 = vcmp.eq.s32.totalorder %v4887_v24, %v2650_v54  ;;  %v2964_v11 = vsub.f32 1.0, %v5317_v57  ;;  %v2374_v31 = vsel %vm2359_vm11, %v2365_v36, 0.0 }
 0x2f8   : > { %v2699_v16 = vsel %vm2684_vm14, %v2695_v27, 0.0  ;;  %v2700_v53 = vsel %vm2685_vm1, %v2691_v41, 0.0  ;;  %v2995_v5 = vadd.s32 1, %v5319_v58  ;;  %v2671_v2 = vsel %vm2656_vm3, %v2667_v17, 0.0 }
 0x2f9   : > { %6468 = vst [vmem:[#allocation9_spill] sm:$0xff] %v5517_v59  ;;  %vm2332_vm6 = vcmp.eq.s32.totalorder %v4887_v24, %v2328_v43  ;;  %vm2360_vm12 = vcmp.eq.s32.totalorder %v4887_v24, %v2356_v8  ;;  %v3330_v15 = vadd.s32 1, %v4289_v40  ;;  %v2346_v47 = vsel %vm2331_vm4, %v2337_v22, 0.0 }
 0x2fa   : > { %v2672_v13 = vsel %vm2657_vm5, %v2663_v38, 0.0  ;;  %vm2686_vm15 = vcmp.eq.s32.totalorder %v4887_v24, %v2682_v45  ;;  %v2971_v12 = vrot.slane %v5319_v58, %v4620_v9  ;;  %v5528_v54 = vadd.f32 %v2699_v16, %v2671_v2 }
 0x2fb   : > { %v5530_v28 = vadd.f32 %v2374_v31, %v2346_v47  ;;  %v5532_v36 = vadd.f32 %v2700_v53, %v2672_v13  ;;  %vm2658_vm0 = vcmp.eq.s32.totalorder %v4887_v24, %v2654_v1  ;;  %v2347_v41 = vsel %vm2332_vm6, %v2341_v44, 0.0 }
 0x2fc   : > { %v2375_v43 = vsel %vm2360_vm12, %v2369_v14, 0.0  ;;  %v2984_v8 = vrot.slane %v2964_v11, %v4620_v9  ;;  %v2999_v22 = vrot.slane %v2995_v5, %v4620_v9  ;;  %v2588_v38 = vsub.s32 6, %v4602_v3 }
 0x2fd   : > { %6469 = vst [vmem:[#allocation10_spill] sm:$0xff] %v5530_v28  ;;  %6470 = vst [vmem:[#allocation11_spill] sm:$0xff] %v5532_v36  ;;  %v2701_v45 = vsel %vm2686_vm15, %v2695_v27, 0.0  ;;  %v3299_v59 = vsub.f32 1.0, %v5321_v21  ;;  %v3334_v16 = vrot.slane %v3330_v15, %v4620_v9  ;;  %v2914_v31 = vsub.s32 7, %v4602_v3 }
 0x2fe   : > { %v2673_v2 = vsel %vm2658_vm0, %v2667_v17, 0.0  ;;  %vm2976_vm7 = vcmp.eq.s32.totalorder %v4602_v3, %v2971_v12  ;;  %v3003_v1 = vrot.slane %v2995_v5, %v4623_v10  ;;  %v5543_v44 = vadd.f32 %v2375_v43, %v2347_v41 }
 0x2ff   : > { %v3012_v14 = vrot.slane %v5317_v57, %v4620_v9  ;;  %v3306_v53 = vrot.slane %v4289_v40, %v4620_v9  ;;  %v2975_v27 = vrot.slane %v5319_v58, %v4623_v10  ;;  %v5550_v47 = vadd.f32 %v2701_v45, %v2673_v2 }
 0x300   : > { %6471 = vst [vmem:[#allocation12_spill] sm:$0xff] %v5543_v44  ;;  %vm3004_vm8 = vcmp.eq.s32.totalorder %v4602_v3, %v2999_v22  ;;  %v3347_v17 = vrot.slane %v5321_v21, %v4620_v9  ;;  %v3338_v13 = vrot.slane %v3330_v15, %v4623_v10  ;;  %v5557_v5 = vrot.slane %v5367_v6, %v2588_v38 }
 0x301   : > { %6472 = vst [vmem:[#allocation13_spill] sm:$0xff] %v5550_v47  ;;  %v2991_v41 = vsel %vm2976_vm7, %v2984_v8, 0.0  ;;  %v3319_v43 = vrot.slane %v3299_v59, %v4620_v9  ;;  %vm3339_vm13 = vcmp.eq.s32.totalorder %v4602_v3, %v3334_v16  ;;  %v5562_v44 = vrot.slane %v5367_v6, %v2914_v31 }
 0x302   : > { %6473 = vst [vmem:[#allocation14_spill] sm:$0xff] %v5557_v5  ;;  %v2988_v58 = vrot.slane %v2964_v11, %v4623_v10  ;;  %vm3005_vm9 = vcmp.eq.s32.totalorder %v4602_v3, %v3003_v1  ;;  %v3310_v45 = vrot.slane %v4289_v40, %v4623_v10  ;;  %v3019_v2 = vsel %vm3004_vm8, %v3012_v14, 0.0 }
 0x303   : > { %6474 = vst [vmem:[#allocation15_spill] sm:$0xff] %v5562_v44  ;;  %vm3311_vm14 = vcmp.eq.s32.totalorder %v4602_v3, %v3306_v53  ;;  %vm2977_vm11 = vcmp.eq.s32.totalorder %v4602_v3, %v2975_v27  ;;  %v3016_v15 = vrot.slane %v5317_v57, %v4623_v10  ;;  %v5572_v5 = vrot.slane %v5384_v48, %v2588_v38 }
 0x304   : > { %v3354_v47 = vsel %vm3339_vm13, %v3347_v17, 0.0  ;;  %vm3340_vm1 = vcmp.eq.s32.totalorder %v4602_v3, %v3338_v13  ;;  %vm3006_vm3 = vcmp.eq.s32.totalorder %v4887_v24, %v2999_v22  ;;  %v5577_v6 = vrot.slane %v5384_v48, %v2914_v31 }
 0x305   : > { %6475 = vst [vmem:[#allocation16_spill] sm:$0xff] %v5572_v5  ;;  %v3020_v40 = vsel %vm3005_vm9, %v3016_v15, 0.0  ;;  %v3323_v11 = vrot.slane %v3299_v59, %v4623_v10  ;;  %v3351_v44 = vrot.slane %v5321_v21, %v4623_v10  ;;  %v5582_v36 = vadd.f32 %v3019_v2, %v2991_v41 }
 0x306   : > { %6476 = vst [vmem:[#allocation17_spill] sm:$0xff] %v5577_v6  ;;  %v3326_v57 = vsel %vm3311_vm14, %v3319_v43, 0.0  ;;  %vm3312_vm4 = vcmp.eq.s32.totalorder %v4602_v3, %v3310_v45  ;;  %vm2978_vm5 = vcmp.eq.s32.totalorder %v4887_v24, %v2971_v12  ;;  %v2992_v5 = vsel %vm2977_vm11, %v2988_v58, 0.0 }
 0x307   : > { %6477 = vst [vmem:[#allocation18_spill] sm:$0xff] %v5582_v36  ;;  %v5586_v38 = vadd.f32 %v3354_v47, %v3326_v57  ;;  %v3355_v22 = vsel %vm3340_vm1, %v3351_v44, 0.0  ;;  %v3021_v28 = vsel %vm3006_vm3, %v3012_v14, 0.0  ;;  %v5588_v48 = vadd.f32 %v3020_v40, %v2992_v5 }
 0x308   : > { %vm3341_vm6 = vcmp.eq.s32.totalorder %v4887_v24, %v3334_v16  ;;  %vm3007_vm12 = vcmp.eq.s32.totalorder %v4887_v24, %v3003_v1  ;;  %v3657_v21 = vadd.s32 1, %v5348_v18  ;;  %v3327_v59 = vsel %vm3312_vm4, %v3323_v11, 0.0 }
 0x309   : > { %6478 = vst [vmem:[#allocation19_spill] sm:$0xff] %v5586_v38  ;;  %6479 = vst [vmem:[#allocation20_spill] sm:$0xff] %v5588_v48  ;;  %v2993_v31 = vsel %vm2978_vm5, %v2984_v8, 0.0  ;;  %v5595_v41 = vrot.slane %v5256_v30, %v4620_v9  ;;  %vm3313_vm15 = vcmp.eq.s32.totalorder %v4887_v24, %v3306_v53  ;;  %v5598_v12 = vadd.f32 %v3355_v22, %v3327_v59 }
 0x30a   : > { %v5600_v47 = vadd.f32 %v3021_v28, %v2993_v31  ;;  %vm2979_vm0 = vcmp.eq.s32.totalorder %v4887_v24, %v2975_v27  ;;  %v3626_v16 = vsub.f32 1.0, %v5328_v49  ;;  %v3356_v14 = vsel %vm3341_vm6, %v3347_v17, 0.0 }
 0x30b   : > { %6480 = vst [vmem:[#allocation21_spill] sm:$0xff] %v5595_v41  ;;  %6481 = vst [vmem:[#allocation22_spill] sm:$0xff] %v5598_v12  ;;  %v3022_v1 = vsel %vm3007_vm12, %v3016_v15, 0.0  ;;  %vm3314_vm7 = vcmp.eq.s32.totalorder %v4887_v24, %v3310_v45  ;;  %v3633_v8 = vrot.slane %v5348_v18, %v4620_v9  ;;  %v3328_v5 = vsel %vm3313_vm15, %v3319_v43, 0.0 }
 0x30c   : > { %6482 = vst [vmem:[#allocation23_spill] sm:$0xff] %v5600_v47  ;;  %v5609_v2 = vrot.slane %v5256_v30, %v4623_v10  ;;  %vm3342_vm8 = vcmp.eq.s32.totalorder %v4887_v24, %v3338_v13  ;;  %v3661_v28 = vrot.slane %v3657_v21, %v4620_v9  ;;  %v2994_v53 = vsel %vm2979_vm0, %v2988_v58, 0.0 }
 0x30d   : > { %v5615_v27 = vrot.slane %v5269_v62, %v4620_v9  ;;  %v5619_v17 = vrot.slane %v5348_v18, %v4623_v10  ;;  %v3665_v45 = vrot.slane %v3657_v21, %v4623_v10  ;;  %v5622_v15 = vadd.f32 %v3356_v14, %v3328_v5 }
 0x30e   : > { %6483 = vst [vmem:[#allocation24_spill] sm:$0xff] %v5609_v2  ;;  %v5624_v30 = vadd.f32 %v3022_v1, %v2994_v53  ;;  %v3329_v40 = vsel %vm3314_vm7, %v3323_v11, 0.0  ;;  %v3646_v13 = vrot.slane %v3626_v16, %v4620_v9  ;;  %v3357_v22 = vsel %vm3342_vm8, %v3351_v44, 0.0 }
 0x30f   : > { %6484 = vst [vmem:[#allocation25_spill] sm:$0xff] %v5615_v27  ;;  %6485 = vst [vmem:[#allocation26_spill] sm:$0xff] %v5622_v15  ;;  %v5630_v59 = vrot.slane %v5269_v62, %v4623_v10  ;;  %vm3638_vm13 = vcmp.eq.s32.totalorder %v4602_v3, %v3633_v8  ;;  %vm3666_vm9 = vcmp.eq.s32.totalorder %v4602_v3, %v3661_v28  ;;  %vm1276_vm6 = vcmask 1041409  }
 0x310   : > { %6486 = vst [vmem:[#allocation27_spill] sm:$0xff] %v5624_v30  ;;  %v3650_v31 = vrot.slane %v3626_v16, %v4623_v10  ;;  %vm3640_vm14 = vcmp.eq.s32.totalorder %v4887_v24, %v3633_v8  ;;  %v3674_v44 = vrot.slane %v5328_v49, %v4620_v9  ;;  %vm3639_vm11 = vcmp.eq.s32.totalorder %v4602_v3, %v5619_v17 }
 0x311   : > { %6487 = vst [vmem:[#allocation28_spill] sm:$0xff] %v5630_v59  ;;  %vm3667_vm1 = vcmp.eq.s32.totalorder %v4602_v3, %v3665_v45  ;;  %v5644_v1 = vadd.f32 %v3357_v22, %v3329_v40  ;;  %v3653_v5 = vsel %vm3638_vm13, %v3646_v13, 0.0  ;;  %v3678_v16 = vrot.slane %v5328_v49, %v4623_v10 }
 0x312   : > { %vm3668_vm3 = vcmp.eq.s32.totalorder %v4887_v24, %v3661_v28  ;;  %v3654_v27 = vsel %vm3639_vm11, %v3650_v31, 0.0  ;;  %vm3641_vm4 = vcmp.eq.s32.totalorder %v4887_v24, %v5619_v17  ;;  %vm3669_vm5 = vcmp.eq.s32.totalorder %v4887_v24, %v3665_v45 }
 0x313   : > { %6488 = vst [vmem:[#allocation29_spill] sm:$0xff] %v5644_v1  ;;  %v3682_v3 = vsel %vm3667_vm1, %v3678_v16, 0.0  ;;  %vm1613_vm12 = vcmask 1045509   ;;  %vm1279_vm15 = vcmask 1042434   ;;  %vm1616_vm0 = vcmask 1046534  }
 0x314   : > { %v5661_v41 = vadd.f32 %v3682_v3, %v3654_v27  ;;  %vm1282_vm7 = vcmask 1043459   ;;  %vm1619_vm8 = vcmask 1047559  }
 0x316   : > { %6490 = vst [vmem:[#allocation31_spill] sm:$0xff] %v5661_v41 }
 0x31a   : > { %v1140_v43 = vpop.f32.mrb[0].mxu1 }
 0x31b   : > { %v1179_v58 = vmul.f32 %v1140_v43, %v5357_v33  ;;  %v1142_v57 = vpop.f32.mrb[1].mxu1  ;;  %v3681_v43 = vsel %vm3666_vm9, %v3674_v44, 0.0 }
 0x31c   : > { %v1180_v18 = vmul.f32 %v1142_v57, %v5364_v34  ;;  %v1144_v21 = vpop.f32.mrb[2].mxu1  ;;  %v3655_v57 = vsel %vm3640_vm14, %v3646_v13, 0.0 }
 0x31d   : > { %v1181_v11 = vmul.f32 %v1144_v21, %v5380_v56  ;;  %v1146_v14 = vpop.f32.mrb[3].mxu1 }
 0x31e   : > { %v1182_v62 = vmul.f32 %v1146_v14, %v5390_v0 }
 0x31f   : > { %v1476_v8 = vpop.f32.mrb[8].mxu0  ;;  %v1195_v53 = vadd.f32 %v1181_v11, %v1179_v58  ;;  %v5655_v11 = vadd.f32 %v3681_v43, %v3653_v5  ;;  %v3684_v5 = vsel %vm3669_vm5, %v3678_v16, 0.0 }
 0x320   : > { %v1515_v9 = vmul.f32 %v1476_v8, %v5360_v29  ;;  %v1478_v21 = vpop.f32.mrb[9].mxu0  ;;  %v1202_v59 = vadd.f32 %v1182_v62, %v1180_v18  ;;  %v3683_v18 = vsel %vm3668_vm3, %v3674_v44, 0.0 }
 0x321   : > { %v1516_v14 = vmul.f32 %v1478_v21, %v5378_v52  ;;  %v1196_v40 = vrot.slane %v1195_v53, 4  ;;  %v1480_v22 = vpop.f32.mrb[10].mxu0  ;;  %6489 = vst [vmem:[#allocation30_spill] sm:$0xff] %v5655_v11 }
 0x322   : > { %v1517_v10 = vmul.f32 %v1480_v22, %v5386_v23  ;;  %v1203_v49 = vrot.slane %v1202_v59, 4  ;;  %v1482_v13 = vpop.f32.mrb[11].mxu0  ;;  %v1150_v58 = vpop.f32.mrb[4].mxu1 }
 0x323   : > { %v1197_v62 = vadd.f32 %v1196_v40, %v1195_v53  ;;  %v1518_v8 = vmul.f32 %v1482_v13, %v5396_v51  ;;  %v1183_v21 = vmul.f32 %v1150_v58, %v5357_v33  ;;  %v1152_v2 = vpop.f32.mrb[5].mxu1  ;;  %v5667_v53 = vadd.f32 %v3683_v18, %v3655_v57 }
 0x324   : > { %v1531_v1 = vadd.f32 %v1517_v10, %v1515_v9  ;;  %v1204_v30 = vadd.f32 %v1203_v49, %v1202_v59  ;;  %v1184_v22 = vmul.f32 %v1152_v2, %v5364_v34  ;;  %v1154_v15 = vpop.f32.mrb[6].mxu1  ;;  %v3656_v59 = vsel %vm3641_vm4, %v3650_v31, 0.0 }
 0x325   : > { %v1198_v43 = vrot.slane %v1197_v62, 2  ;;  %v1538_v11 = vadd.f32 %v1518_v8, %v1516_v14  ;;  %v1185_v28 = vmul.f32 %v1154_v15, %v5380_v56  ;;  %v1156_v44 = vpop.f32.mrb[7].mxu1  ;;  %6491 = vst [vmem:[#allocation32_spill] sm:$0xff] %v5667_v53  ;;  %v5673_v16 = vadd.f32 %v3684_v5, %v3656_v59 }
 0x326   : > { %v1532_v40 = vrot.slane %v1531_v1, 4  ;;  %v1205_v13 = vrot.slane %v1204_v30, 2  ;;  %v1186_v27 = vmul.f32 %v1156_v44, %v5390_v0 }
 0x327   : > { %v1199_v2 = vadd.f32 %v1198_v43, %v1197_v62  ;;  %v1539_v9 = vrot.slane %v1538_v11, 4  ;;  %v1486_v3 = vpop.f32.mrb[12].mxu0  ;;  %v1209_v45 = vadd.f32 %v1185_v28, %v1183_v21  ;;  %6492 = vst [vmem:[#allocation33_spill] sm:$0xff] %v5673_v16 }
 0x328   : > { %v1533_v14 = vadd.f32 %v1532_v40, %v1531_v1  ;;  %v1206_v10 = vadd.f32 %v1205_v13, %v1204_v30  ;;  %v1519_v15 = vmul.f32 %v1486_v3, %v5360_v29  ;;  %v1488_v57 = vpop.f32.mrb[13].mxu0  ;;  %v1216_v49 = vadd.f32 %v1186_v27, %v1184_v22 }
 0x329   : > { %v1200_v58 = vrot.slane %v1199_v2, 1  ;;  %v1540_v18 = vadd.f32 %v1539_v9, %v1538_v11  ;;  %v1520_v8 = vmul.f32 %v1488_v57, %v5378_v52  ;;  %v1210_v44 = vrot.slane %v1209_v45, 4  ;;  %v1490_v53 = vpop.f32.mrb[14].mxu0 }
 0x32a   : > { %v1534_v24 = vrot.slane %v1533_v14, 2  ;;  %v1207_v17 = vrot.slane %v1206_v10, 1  ;;  %v1521_v31 = vmul.f32 %v1490_v53, %v5386_v23  ;;  %v1217_v62 = vrot.slane %v1216_v49, 4  ;;  %v1492_v21 = vpop.f32.mrb[15].mxu0  ;;  %v1160_v5 = vpop.f32.mrb[8].mxu1 }
 0x32b   : > { %v1201_v43 = vadd.f32 %v1200_v58, %v1199_v2  ;;  %v1541_v1 = vrot.slane %v1540_v18, 2  ;;  %v1211_v30 = vadd.f32 %v1210_v44, %v1209_v45  ;;  %v1522_v28 = vmul.f32 %v1492_v21, %v5396_v51  ;;  %v1162_v40 = vpop.f32.mrb[9].mxu1 }
 0x32c   : > { %v1535_v22 = vadd.f32 %v1534_v24, %v1533_v14  ;;  %v1208_v13 = vadd.f32 %v1207_v17, %v1206_v10  ;;  %v1545_v11 = vadd.f32 %v1521_v31, %v1519_v15  ;;  %v1218_v27 = vadd.f32 %v1217_v62, %v1216_v49  ;;  %v1164_v59 = vpop.f32.mrb[10].mxu1 }
 0x32d   : > { %v1259_v9 = vmul.f32 %v5409_v42, %v1201_v43  ;;  %v1542_v3 = vadd.f32 %v1541_v1, %v1540_v18  ;;  %v1212_v57 = vrot.slane %v1211_v30, 2  ;;  %v1552_v16 = vadd.f32 %v1522_v28, %v1520_v8  ;;  %v1166_v53 = vpop.f32.mrb[11].mxu1 }
 0x32e   : > { %v1536_v41 = vrot.slane %v1535_v22, 1  ;;  %v1260_v47 = vmul.f32 %v5417_v32, %v1208_v13  ;;  %v1546_v2 = vrot.slane %v1545_v11, 4  ;;  %v1219_v45 = vrot.slane %v1218_v27, 2 }
 0x32f   : > { %v1543_v58 = vrot.slane %v1542_v3, 1  ;;  %v1213_v44 = vadd.f32 %v1212_v57, %v1211_v30  ;;  %v1553_v21 = vrot.slane %v1552_v16, 4  ;;  %v1187_v14 = vmul.f32 %v1160_v5, %v5357_v33  ;;  %v1496_v10 = vpop.f32.mrb[16].mxu0 }
 0x330   : > { %v1537_v15 = vadd.f32 %v1536_v41, %v1535_v22  ;;  %v1547_v49 = vadd.f32 %v1546_v2, %v1545_v11  ;;  %v1220_v24 = vadd.f32 %v1219_v45, %v1218_v27  ;;  %v1523_v18 = vmul.f32 %v1496_v10, %v5360_v29  ;;  %v1498_v17 = vpop.f32.mrb[17].mxu0 }
 0x331   : > { %v1544_v8 = vadd.f32 %v1543_v58, %v1542_v3  ;;  %v1214_v31 = vrot.slane %v1213_v44, 1  ;;  %v1554_v62 = vadd.f32 %v1553_v21, %v1552_v16  ;;  %v1188_v43 = vmul.f32 %v1162_v40, %v5364_v34  ;;  %v1500_v1 = vpop.f32.mrb[18].mxu0 }
 0x332   : > { %v5685_v28 = vmul.f32 %v5412_v4, %v1537_v15  ;;  %v1548_v30 = vrot.slane %v1547_v49, 2  ;;  %v1221_v13 = vrot.slane %v1220_v24, 1  ;;  %v1524_v5 = vmul.f32 %v1498_v17, %v5378_v52  ;;  %v1502_v57 = vpop.f32.mrb[19].mxu0  ;;  %v1170_v41 = vpop.f32.mrb[12].mxu1 }
 0x333   : > { %v5689_v22 = vmul.f32 %v5432_v50, %v1544_v8  ;;  %v1215_v11 = vadd.f32 %v1214_v31, %v1213_v44  ;;  %v1555_v27 = vrot.slane %v1554_v62, 2  ;;  %v1189_v16 = vmul.f32 %v1164_v59, %v5380_v56  ;;  %v1172_v3 = vpop.f32.mrb[13].mxu1 }
 0x334   : > { %v1611_v40 = vrot.slane %v5685_v28, 4  ;;  %v1549_v2 = vadd.f32 %v1548_v30, %v1547_v49  ;;  %v1222_v45 = vadd.f32 %v1221_v13, %v1220_v24  ;;  %v1525_v58 = vmul.f32 %v1500_v1, %v5386_v23  ;;  %v1174_v21 = vpop.f32.mrb[14].mxu1 }
 0x335   : > { %v1621_v10 = vrot.slane %v5689_v22, 4  ;;  %v1261_v15 = vmul.f32 %v5409_v42, %v1215_v11  ;;  %v1556_v17 = vadd.f32 %v1555_v27, %v1554_v62  ;;  %v1223_v8 = vadd.f32 %v1189_v16, %v1187_v14  ;;  %v1176_v12 = vpop.f32.mrb[15].mxu1 }
 0x336   : > { %v1550_v44 = vrot.slane %v1549_v2, 1  ;;  %v1262_v31 = vmul.f32 %v5417_v32, %v1222_v45  ;;  %v1559_v48 = vadd.f32 %v1525_v58, %v1523_v18  ;;  %v1190_v59 = vmul.f32 %v1166_v53, %v5390_v0 }
 0x337   : > { %v1275_v38 = vrot.slane %v1261_v15, 7  ;;  %v1557_v28 = vrot.slane %v1556_v17, 1  ;;  %v1224_v49 = vrot.slane %v1223_v8, 4  ;;  %v1526_v24 = vmul.f32 %v1502_v57, %v5396_v51  ;;  %v1506_v1 = vpop.f32.mrb[20].mxu0 }
 0x338   : > { %v1551_v30 = vadd.f32 %v1550_v44, %v1549_v2  ;;  %v1284_v13 = vrot.slane %v1262_v31, 7  ;;  %v1560_v22 = vrot.slane %v1559_v48, 4  ;;  %v1230_v36 = vadd.f32 %v1190_v59, %v1188_v43  ;;  %v1508_v11 = vpop.f32.mrb[21].mxu0 }
 0x339   : > { %v5700_v14 = vsel %vm1276_vm6, %v1275_v38, %v1259_v9  ;;  %v1558_v62 = vadd.f32 %v1557_v28, %v1556_v17  ;;  %v1225_v27 = vadd.f32 %v1224_v49, %v1223_v8  ;;  %v1566_v16 = vadd.f32 %v1526_v24, %v1524_v5  ;;  %v1510_v18 = vpop.f32.mrb[22].mxu0 }
 0x33a   : > { %v1597_v53 = vmul.f32 %v5412_v4, %v1551_v30  ;;  %v5704_v45 = vsel %vm1276_vm6, %v1284_v13, %v1260_v47  ;;  %v1561_v58 = vadd.f32 %v1560_v22, %v1559_v48  ;;  %v1231_v57 = vrot.slane %v1230_v36, 4  ;;  %v1512_v15 = vpop.f32.mrb[23].mxu0  ;;  %v5706_v2 = vpop.f32.mrb[16].mxu1 }
 0x33b   : > { %v1598_v43 = vmul.f32 %v5432_v50, %v1558_v62  ;;  %v1226_v44 = vrot.slane %v1225_v27, 2  ;;  %v1567_v31 = vrot.slane %v1566_v16, 4  ;;  %v1191_v38 = vmul.f32 %v1170_v41, %v5357_v33  ;;  %v5710_v9 = vpop.f32.mrb[17].mxu1 }
 0x33c   : > { %v1612_v5 = vrot.slane %v1597_v53, 3  ;;  %v1562_v17 = vrot.slane %v1561_v58, 2  ;;  %v1232_v8 = vadd.f32 %v1231_v57, %v1230_v36  ;;  %v1527_v47 = vmul.f32 %v1506_v1, %v5360_v29  ;;  %v5713_v59 = vpop.f32.mrb[18].mxu1 }
 0x33d   : > { %v1622_v48 = vrot.slane %v1598_v43, 3  ;;  %v1227_v28 = vadd.f32 %v1226_v44, %v1225_v27  ;;  %v1568_v49 = vadd.f32 %v1567_v31, %v1566_v16  ;;  %v1192_v24 = vmul.f32 %v1172_v3, %v5364_v34  ;;  %v5716_v30 = vpop.f32.mrb[19].mxu1 }
 0x33e   : > { %v1614_v33 = vsel %vm1613_vm12, %v1612_v5, %v1611_v40  ;;  %v1563_v41 = vadd.f32 %v1562_v17, %v1561_v58  ;;  %v1233_v13 = vrot.slane %v1232_v8, 2  ;;  %v1528_v22 = vmul.f32 %v1508_v11, %v5378_v52 }
 0x33f   : > { %v5721_v36 = vsel %vm1613_vm12, %v1622_v48, %v1621_v10  ;;  %v1228_v29 = vrot.slane %v1227_v28, 1  ;;  %v1569_v1 = vrot.slane %v1568_v49, 2  ;;  %v1193_v62 = vmul.f32 %v1174_v21, %v5380_v56  ;;  %v2133_v27 = vpop.f32.mrb[24].mxu0 }
 0x340   : > { %v1564_v53 = vrot.slane %v1563_v41, 1  ;;  %v1234_v16 = vadd.f32 %v1233_v13, %v1232_v8  ;;  %v1529_v34 = vmul.f32 %v1510_v18, %v5386_v23  ;;  %v1194_v3 = vmul.f32 %v1176_v12, %v5390_v0  ;;  %v2135_v57 = vpop.f32.mrb[25].mxu0 }
 0x341   : > { %v1229_v40 = vadd.f32 %v1228_v29, %v1227_v28  ;;  %v1570_v58 = vadd.f32 %v1569_v1, %v1568_v49  ;;  %v1237_v43 = vadd.f32 %v1193_v62, %v1191_v38  ;;  %v1530_v52 = vmul.f32 %v1512_v15, %v5396_v51  ;;  %v2137_v11 = vpop.f32.mrb[26].mxu0 }
 0x342   : > { %v1565_v10 = vadd.f32 %v1564_v53, %v1563_v41  ;;  %v1235_v44 = vrot.slane %v1234_v16, 1  ;;  %v1573_v31 = vadd.f32 %v1529_v34, %v1527_v47  ;;  %v1244_v5 = vadd.f32 %v1194_v3, %v1192_v24  ;;  %v2139_v17 = vpop.f32.mrb[27].mxu0  ;;  %v5727_v56 = vpop.f32.mrb[20].mxu1 }
 0x343   : > { %v1263_v21 = vmul.f32 %v5409_v42, %v1229_v40  ;;  %v1571_v8 = vrot.slane %v1570_v58, 1  ;;  %v1238_v23 = vrot.slane %v1237_v43, 4  ;;  %v1580_v18 = vadd.f32 %v1530_v52, %v1528_v22  ;;  %v5730_v0 = vpop.f32.mrb[21].mxu1 }
 0x344   : > { %v1599_v12 = vmul.f32 %v5412_v4, %v1565_v10  ;;  %v1236_v38 = vadd.f32 %v1235_v44, %v1234_v16  ;;  %v1574_v48 = vrot.slane %v1573_v31, 4  ;;  %v1245_v51 = vrot.slane %v1244_v5, 4  ;;  %v5733_v15 = vpop.f32.mrb[22].mxu1 }
 0x345   : > { %v1278_v28 = vrot.slane %v1263_v21, 6  ;;  %v1572_v47 = vadd.f32 %v1571_v8, %v1570_v58  ;;  %v1239_v49 = vadd.f32 %v1238_v23, %v1237_v43  ;;  %v1581_v24 = vrot.slane %v1580_v18, 4  ;;  %v5735_v41 = vpop.f32.mrb[23].mxu1 }
 0x346   : > { %v1615_v13 = vrot.slane %v1599_v12, 2  ;;  %v1264_v29 = vmul.f32 %v5417_v32, %v1236_v38  ;;  %v1575_v1 = vadd.f32 %v1574_v48, %v1573_v31  ;;  %v1246_v22 = vadd.f32 %v1245_v51, %v1244_v5 }
 0x347   : > { %v5740_v62 = vsel %vm1279_vm15, %v1278_v28, %v5700_v14  ;;  %v1600_v53 = vmul.f32 %v5432_v50, %v1572_v47  ;;  %v1240_v16 = vrot.slane %v1239_v49, 2  ;;  %v1582_v34 = vadd.f32 %v1581_v24, %v1580_v18  ;;  %v5743_v3 = vpop.f32.mrb[28].mxu0 }
 0x348   : > { %v5746_v40 = vsel %vm1616_vm0, %v1615_v13, %v1614_v33  ;;  %v1286_v58 = vrot.slane %v1264_v29, 6  ;;  %v1576_v43 = vrot.slane %v1575_v1, 2  ;;  %v1247_v52 = vrot.slane %v1246_v22, 2  ;;  %v5748_v10 = vpop.f32.mrb[29].mxu0 }
 0x349   : > { %v1624_v44 = vrot.slane %v1600_v53, 2  ;;  %v1241_v31 = vadd.f32 %v1240_v16, %v1239_v49  ;;  %v1583_v14 = vrot.slane %v1582_v34, 2  ;;  %v1839_v5 = vmul.f32 %v5706_v2, %v5436_v20  ;;  %v5752_v21 = vpop.f32.mrb[30].mxu0 }
 0x34a   : > { %v1287_v8 = vsel %vm1279_vm15, %v1286_v58, %v5704_v45  ;;  %v1577_v33 = vadd.f32 %v1576_v43, %v1575_v1  ;;  %v1248_v23 = vadd.f32 %v1247_v52, %v1246_v22  ;;  %v2172_v18 = vmul.f32 %v2133_v27, %v5441_v37  ;;  %v5757_v12 = vpop.f32.mrb[31].mxu0  ;;  %v5759_v38 = vpop.f32.mrb[24].mxu1 }
 0x34b   : > { %v1625_v48 = vsel %vm1616_vm0, %v1624_v44, %v5721_v36  ;;  %v1242_v51 = vrot.slane %v1241_v31, 1  ;;  %v1584_v28 = vadd.f32 %v1583_v14, %v1582_v34  ;;  %v1840_v2 = vmul.f32 %v5710_v9, %v5445_v19  ;;  %v5765_v47 = vpop.f32.mrb[25].mxu1 }
 0x34c   : > { %v1578_v49 = vrot.slane %v1577_v33, 1  ;;  %v1249_v45 = vrot.slane %v1248_v23, 1  ;;  %v2173_v24 = vmul.f32 %v2135_v57, %v5450_v7  ;;  %v1841_v27 = vmul.f32 %v5713_v59, %v5452_v26  ;;  %v5770_v13 = vpop.f32.mrb[26].mxu1 }
 0x34d   : > { %v1243_v29 = vadd.f32 %v1242_v51, %v1241_v31  ;;  %v1585_v1 = vrot.slane %v1584_v28, 1  ;;  %v2174_v36 = vmul.f32 %v2137_v11, %v5461_v39  ;;  %v1842_v22 = vmul.f32 %v5716_v30, %v5469_v60  ;;  %v5775_v53 = vpop.f32.mrb[27].mxu1 }
 0x34e   : > { %v1579_v9 = vadd.f32 %v1578_v49, %v1577_v33  ;;  %v1250_v16 = vadd.f32 %v1249_v45, %v1248_v23  ;;  %v1855_v34 = vadd.f32 %v1841_v27, %v1839_v5  ;;  %v2175_v58 = vmul.f32 %v2139_v17, %v5471_v25 }
 0x34f   : > { %v1265_v57 = vmul.f32 %v5409_v42, %v1243_v29  ;;  %v1586_v43 = vadd.f32 %v1585_v1, %v1584_v28  ;;  %v2188_v59 = vadd.f32 %v2174_v36, %v2172_v18  ;;  %v1862_v52 = vadd.f32 %v1842_v22, %v1840_v2  ;;  %v5779_v44 = vpop.f32.mrb[32].mxu0 }
 0x350   : > { %v1601_v31 = vmul.f32 %v5412_v4, %v1579_v9  ;;  %v1266_v11 = vmul.f32 %v5417_v32, %v1250_v16  ;;  %v1856_v14 = vrot.slane %v1855_v34, 4  ;;  %v2195_v30 = vadd.f32 %v2175_v58, %v2173_v24  ;;  %v5783_v51 = vpop.f32.mrb[33].mxu0 }
 0x351   : > { %v1281_v33 = vrot.slane %v1265_v57, 5  ;;  %v1602_v5 = vmul.f32 %v5432_v50, %v1586_v43  ;;  %v2189_v23 = vrot.slane %v2188_v59, 4  ;;  %v1863_v17 = vrot.slane %v1862_v52, 4  ;;  %v5786_v49 = vpop.f32.mrb[34].mxu0 }
 0x352   : > { %v1618_v42 = vrot.slane %v1601_v31, 1  ;;  %v1288_v18 = vrot.slane %v1266_v11, 5  ;;  %v1857_v28 = vadd.f32 %v1856_v14, %v1855_v34  ;;  %v2196_v2 = vrot.slane %v2195_v30, 4  ;;  %v5788_v45 = vpop.f32.mrb[35].mxu0  ;;  %v5790_v4 = vpop.f32.mrb[28].mxu1 }
 0x353   : > { %v1283_v32 = vsel %vm1282_vm7, %v1281_v33, %v5740_v62  ;;  %v1626_v24 = vrot.slane %v1602_v5, 1  ;;  %v2190_v27 = vadd.f32 %v2189_v23, %v2188_v59  ;;  %v1864_v29 = vadd.f32 %v1863_v17, %v1862_v52  ;;  %v5794_v1 = vpop.f32.mrb[29].mxu1 }
 0x354   : > { %1292 = vst [vmem:[#allocation2] sm:$0xf] %v1283_v32  ;;  %v1620_v50 = vsel %vm1619_vm8, %v1618_v42, %v5746_v40  ;;  %v1289_v36 = vsel %vm1282_vm7, %v1288_v18, %v1287_v8  ;;  %v1858_v22 = vrot.slane %v1857_v28, 2  ;;  %v2197_v9 = vadd.f32 %v2196_v2, %v2195_v30  ;;  %v5799_v16 = vpop.f32.mrb[30].mxu1 }
 0x355   : > { %1630 = vst [vmem:[#allocation2] sm:$0xf0] %v1620_v50  ;;  %1293 = vst [vmem:[#allocation2 + $0x8] sm:$0xf] %v1289_v36  ;;  %v1627_v34 = vsel %vm1619_vm8, %v1626_v24, %v1625_v48  ;;  %v2191_v62 = vrot.slane %v2190_v27, 2  ;;  %v1865_v58 = vrot.slane %v1864_v29, 2  ;;  %v1843_v57 = vmul.f32 %v5727_v56, %v5436_v20 }
 0x356   : > { %v5804_v43 = vpop.f32.mrb[31].mxu1  ;;  %1631 = vst [vmem:[#allocation2 + $0x8] sm:$0xf0] %v1627_v34  ;;  %v1859_v59 = vadd.f32 %v1858_v22, %v1857_v28  ;;  %v2198_v40 = vrot.slane %v2197_v9, 2  ;;  %v2176_v8 = vmul.f32 %v5743_v3, %v5441_v37  ;;  %v1844_v52 = vmul.f32 %v5730_v0, %v5445_v19 }
 0x357   : > { %v2192_v31 = vadd.f32 %v2191_v62, %v2190_v27  ;;  %v1866_v11 = vadd.f32 %v1865_v58, %v1864_v29  ;;  %v2177_v48 = vmul.f32 %v5748_v10, %v5450_v7  ;;  %v1845_v14 = vmul.f32 %v5733_v15, %v5452_v26  ;;  %v5814_v56 = vpop.f32.mrb[36].mxu0  ;;  %v6493_v58 = vld [vmem:[#allocation8_spill] sm:$0xff] }
 0x358   : > { %v1860_v30 = vrot.slane %v1859_v59, 1  ;;  %v2199_v33 = vadd.f32 %v2198_v40, %v2197_v9  ;;  %v2178_v5 = vmul.f32 %v5752_v21, %v5461_v39  ;;  %v1846_v3 = vmul.f32 %v5735_v41, %v5469_v60  ;;  %v5820_v23 = vpop.f32.mrb[37].mxu0 }
 0x359   : > { %v2193_v0 = vrot.slane %v2192_v31, 1  ;;  %v1867_v17 = vrot.slane %v1866_v11, 1  ;;  %v1869_v42 = vadd.f32 %v1845_v14, %v1843_v57  ;;  %v2179_v10 = vmul.f32 %v5757_v12, %v5471_v25  ;;  %v5824_v18 = vpop.f32.mrb[38].mxu0 }
 0x35a   : > { %v1861_v15 = vadd.f32 %v1860_v30, %v1859_v59  ;;  %v2200_v28 = vrot.slane %v2199_v33, 1  ;;  %v2202_v2 = vadd.f32 %v2178_v5, %v2176_v8  ;;  %v1876_v32 = vadd.f32 %v1846_v3, %v1844_v52  ;;  %v5826_v24 = vpop.f32.mrb[39].mxu0  ;;  %v5828_v21 = vpop.f32.mrb[32].mxu1 }
 0x35b   : > { %v2194_v27 = vadd.f32 %v2193_v0, %v2192_v31  ;;  %v1868_v41 = vadd.f32 %v1867_v17, %v1866_v11  ;;  %v1870_v29 = vrot.slane %v1869_v42, 4  ;;  %v2209_v50 = vadd.f32 %v2179_v10, %v2177_v48  ;;  %v5830_v36 = vpop.f32.mrb[33].mxu1 }
 0x35c   : > { %v5833_v22 = vmul.f32 %v5476_v63, %v1861_v15  ;;  %v2201_v12 = vadd.f32 %v2200_v28, %v2199_v33  ;;  %v2203_v9 = vrot.slane %v2202_v2, 4  ;;  %v1877_v34 = vrot.slane %v1876_v32, 4  ;;  %v5835_v62 = vpop.f32.mrb[34].mxu1 }
 0x35d   : > { %v5838_v57 = vmul.f32 %v6493_v58, %v2194_v27  ;;  %v5841_v59 = vmul.f32 %v5499_v35, %v1868_v41  ;;  %v1871_v40 = vadd.f32 %v1870_v29, %v1869_v42  ;;  %v2210_v8 = vrot.slane %v2209_v50, 4  ;;  %v5843_v52 = vpop.f32.mrb[35].mxu1 }
 0x35e   : > { %6494 = vst [vmem:[#allocation8_spill] sm:$0xff] %v5843_v52  ;;  %v5846_v31 = vmul.f32 %v5502_v55, %v2201_v12  ;;  %v2204_v11 = vadd.f32 %v2203_v9, %v2202_v2  ;;  %v1878_v48 = vadd.f32 %v1877_v34, %v1876_v32  ;;  %v1847_v14 = vmul.f32 %v5759_v38, %v5436_v20 }
 0x35f   : > { %v1872_v33 = vrot.slane %v1871_v40, 2  ;;  %v2211_v5 = vadd.f32 %v2210_v8, %v2209_v50  ;;  %v2180_v3 = vmul.f32 %v5779_v44, %v5441_v37  ;;  %v5853_v0 = vpop.f32.mrb[40].mxu0  ;;  %v1848_v15 = vmul.f32 %v5765_v47, %v5445_v19 }
 0x360   : > { %v2205_v42 = vrot.slane %v2204_v11, 2  ;;  %v1879_v10 = vrot.slane %v1878_v48, 2  ;;  %v5858_v28 = vpop.f32.mrb[41].mxu0  ;;  %v2181_v32 = vmul.f32 %v5783_v51, %v5450_v7  ;;  %v1849_v27 = vmul.f32 %v5770_v13, %v5452_v26 }
 0x361   : > { %v1873_v2 = vadd.f32 %v1872_v33, %v1871_v40  ;;  %v2212_v38 = vrot.slane %v2211_v5, 2  ;;  %v5864_v44 = vpop.f32.mrb[42].mxu0  ;;  %v2182_v50 = vmul.f32 %v5786_v49, %v5461_v39  ;;  %v1850_v47 = vmul.f32 %v5775_v53, %v5469_v60 }
 0x362   : > { %v2206_v41 = vadd.f32 %v2205_v42, %v2204_v11  ;;  %v1880_v29 = vadd.f32 %v1879_v10, %v1878_v48  ;;  %v5870_v12 = vpop.f32.mrb[43].mxu0  ;;  %v5872_v9 = vpop.f32.mrb[36].mxu1  ;;  %v1883_v51 = vadd.f32 %v1849_v27, %v1847_v14  ;;  %v2183_v13 = vmul.f32 %v5788_v45, %v5471_v25 }
 0x363   : > { %6495 = vst [vmem:[#allocation34_spill] sm:$0xff] %v5870_v12  ;;  %6496 = vst [vmem:[#allocation35_spill] sm:$0xff] %v5872_v9  ;;  %v1874_v34 = vrot.slane %v1873_v2, 1  ;;  %v2213_v40 = vadd.f32 %v2212_v38, %v2211_v5  ;;  %v5876_v8 = vpop.f32.mrb[37].mxu1  ;;  %v2216_v33 = vadd.f32 %v2182_v50, %v2180_v3  ;;  %v1890_v42 = vadd.f32 %v1850_v47, %v1848_v15 }
 0x364   : > { %6497 = vst [vmem:[#allocation36_spill] sm:$0xff] %v5876_v8  ;;  %v2207_v11 = vrot.slane %v2206_v41, 1  ;;  %v1881_v48 = vrot.slane %v1880_v29, 1  ;;  %v5878_v49 = vpop.f32.mrb[38].mxu1  ;;  %v1884_v17 = vrot.slane %v1883_v51, 4  ;;  %v2223_v30 = vadd.f32 %v2183_v13, %v2181_v32 }
 0x365   : > { %v1875_v10 = vadd.f32 %v1874_v34, %v1873_v2  ;;  %v2214_v53 = vrot.slane %v2213_v40, 1  ;;  %v5880_v6 = vpop.f32.mrb[39].mxu1  ;;  %v2217_v14 = vrot.slane %v2216_v33, 4  ;;  %v1891_v38 = vrot.slane %v1890_v42, 4 }
 0x366   : > { %v2208_v9 = vadd.f32 %v2207_v11, %v2206_v41  ;;  %v1882_v5 = vadd.f32 %v1881_v48, %v1880_v29  ;;  %v1885_v8 = vadd.f32 %v1884_v17, %v1883_v51  ;;  %v2224_v12 = vrot.slane %v2223_v30, 4 }
 0x367   : > { %v1921_v45 = vmul.f32 %v5476_v63, %v1875_v10  ;;  %v2215_v27 = vadd.f32 %v2214_v53, %v2213_v40  ;;  %v5883_v52 = vpop.f32.mrb[44].mxu0  ;;  %v2218_v2 = vadd.f32 %v2217_v14, %v2216_v33  ;;  %v1892_v50 = vadd.f32 %v1891_v38, %v1890_v42 }
 0x368   : > { %v2254_v3 = vmul.f32 %v6493_v58, %v2208_v9  ;;  %v1922_v15 = vmul.f32 %v5499_v35, %v1882_v5  ;;  %v5887_v32 = vpop.f32.mrb[45].mxu0  ;;  %v1886_v29 = vrot.slane %v1885_v8, 2  ;;  %v2225_v34 = vadd.f32 %v2224_v12, %v2223_v30 }
 0x369   : > { %v1935_v47 = vrot.slane %v1921_v45, 7  ;;  %v2255_v41 = vmul.f32 %v5502_v55, %v2215_v27  ;;  %v5890_v13 = vpop.f32.mrb[46].mxu0  ;;  %v2219_v51 = vrot.slane %v2218_v2, 2  ;;  %v1893_v11 = vrot.slane %v1892_v50, 2 }
 0x36a   : > { %v2269_v40 = vrot.slane %v2254_v3, 3  ;;  %v1941_v17 = vrot.slane %v1922_v15, 7  ;;  %v5892_v48 = vpop.f32.mrb[47].mxu0  ;;  %v5894_v9 = vpop.f32.mrb[40].mxu1  ;;  %v1887_v10 = vadd.f32 %v1886_v29, %v1885_v8  ;;  %v2226_v53 = vrot.slane %v2225_v34, 2 }
 0x36b   : > { %v1936_v33 = vsel %vm1276_vm6, %v1935_v47, %v5833_v22  ;;  %v2276_v42 = vrot.slane %v2255_v41, 3  ;;  %v5898_v5 = vpop.f32.mrb[41].mxu1  ;;  %v6498_v30 = vrot.slane %v5838_v57, 4  ;;  %v2220_v38 = vadd.f32 %v2219_v51, %v2218_v2 }
 0x36c   : > { %v1942_v14 = vsel %vm1276_vm6, %v1941_v17, %v5841_v59  ;;  %v1894_v45 = vadd.f32 %v1893_v11, %v1892_v50  ;;  %v5905_v27 = vpop.f32.mrb[42].mxu1  ;;  %v6499_v3 = vrot.slane %v5846_v31, 4  ;;  %v1888_v15 = vrot.slane %v1887_v10, 1 }
 0x36d   : > { %v2270_v12 = vsel %vm1613_vm12, %v2269_v40, %v6498_v30  ;;  %v2227_v8 = vadd.f32 %v2226_v53, %v2225_v34  ;;  %v1851_v47 = vmul.f32 %v5790_v4, %v5436_v20  ;;  %v5912_v41 = vpop.f32.mrb[43].mxu1  ;;  %v2221_v57 = vrot.slane %v2220_v38, 1 }
 0x36e   : > { %v2277_v22 = vsel %vm1613_vm12, %v2276_v42, %v6499_v3  ;;  %v1895_v29 = vrot.slane %v1894_v45, 1  ;;  %v2184_v59 = vmul.f32 %v5814_v56, %v5441_v37  ;;  %v1852_v2 = vmul.f32 %v5794_v1, %v5445_v19 }
 0x36f   : > { %v1889_v50 = vadd.f32 %v1888_v15, %v1887_v10  ;;  %v2228_v40 = vrot.slane %v2227_v8, 1  ;;  %v2185_v31 = vmul.f32 %v5820_v23, %v5450_v7  ;;  %v1853_v34 = vmul.f32 %v5799_v16, %v5452_v26  ;;  %v5922_v17 = vpop.f32.mrb[48].mxu0 }
 0x370   : > { %v2222_v20 = vadd.f32 %v2221_v57, %v2220_v38  ;;  %v1896_v4 = vadd.f32 %v1895_v29, %v1894_v45  ;;  %v2186_v51 = vmul.f32 %v5824_v18, %v5461_v39  ;;  %v1854_v37 = vmul.f32 %v5804_v43, %v5469_v60  ;;  %v5928_v56 = vpop.f32.mrb[49].mxu0 }
 0x371   : > { %v1923_v19 = vmul.f32 %v5476_v63, %v1889_v50  ;;  %v2229_v1 = vadd.f32 %v2228_v40, %v2227_v8  ;;  %v1897_v11 = vadd.f32 %v1853_v34, %v1851_v47  ;;  %v2187_v7 = vmul.f32 %v5826_v24, %v5471_v25  ;;  %v5933_v26 = vpop.f32.mrb[50].mxu0 }
 0x372   : > { %v2256_v16 = vmul.f32 %v6493_v58, %v2222_v20  ;;  %v1924_v23 = vmul.f32 %v5499_v35, %v1896_v4  ;;  %v2230_v42 = vadd.f32 %v2186_v51, %v2184_v59  ;;  %v1904_v39 = vadd.f32 %v1854_v37, %v1852_v2  ;;  %v5937_v18 = vpop.f32.mrb[51].mxu0  ;;  %v5939_v60 = vpop.f32.mrb[44].mxu1 }
 0x373   : > { %v1937_v43 = vrot.slane %v1923_v19, 6  ;;  %v2257_v10 = vmul.f32 %v5502_v55, %v2229_v1  ;;  %v1898_v53 = vrot.slane %v1897_v11, 4  ;;  %v2237_v30 = vadd.f32 %v2187_v7, %v2185_v31  ;;  %v5942_v38 = vpop.f32.mrb[45].mxu1  ;;  %v6502_v1 = vld [vmem:[#allocation9_spill] sm:$0xff] }
 0x374   : > { %v2271_v25 = vrot.slane %v2256_v16, 2  ;;  %v1943_v24 = vrot.slane %v1924_v23, 6  ;;  %v2231_v45 = vrot.slane %v2230_v42, 4  ;;  %v1905_v3 = vrot.slane %v1904_v39, 4  ;;  %v5944_v15 = vpop.f32.mrb[46].mxu1  ;;  %v6504_v23 = vld [vmem:[#allocation10_spill] sm:$0xff] }
 0x375   : > { %6500 = vst [vmem:[#allocation37_spill] sm:$0xff] %v5944_v15  ;;  %v5947_v8 = vsel %vm1279_vm15, %v1937_v43, %v1936_v33  ;;  %v2278_v47 = vrot.slane %v2257_v10, 2  ;;  %v1899_v57 = vadd.f32 %v1898_v53, %v1897_v11  ;;  %v2238_v29 = vrot.slane %v2237_v30, 4  ;;  %v5949_v59 = vpop.f32.mrb[47].mxu1  ;;  %v6506_v10 = vld [vmem:[#allocation11_spill] sm:$0xff]  ;;  %v6507_v53 = vld [vmem:[#allocation12_spill] sm:$0xff] }
 0x376   : > { %6501 = vst [vmem:[#allocation38_spill] sm:$0xff] %v5949_v59  ;;  %v5952_v2 = vsel %vm1616_vm0, %v2271_v25, %v2270_v12  ;;  %v5955_v50 = vsel %vm1279_vm15, %v1943_v24, %v1942_v14  ;;  %v2232_v40 = vadd.f32 %v2231_v45, %v2230_v42  ;;  %v1906_v31 = vadd.f32 %v1905_v3, %v1904_v39 }
 0x377   : > { %v5958_v34 = vsel %vm1616_vm0, %v2278_v47, %v2277_v22  ;;  %v1900_v20 = vrot.slane %v1899_v57, 2  ;;  %v2239_v4 = vadd.f32 %v2238_v29, %v2237_v30  ;;  %v2514_v33 = vmul.f32 %v5828_v21, %v5505_v61  ;;  %v5962_v51 = vpop.f32.mrb[52].mxu0  ;;  %v6508_v30 = vld [vmem:[#allocation8_spill] sm:$0xff]  ;;  %v6511_v47 = vld [vmem:[#allocation13_spill] sm:$0xff] }
 0x378   : > { %v2233_v37 = vrot.slane %v2232_v40, 2  ;;  %v1907_v19 = vrot.slane %v1906_v31, 2  ;;  %v2840_v12 = vmul.f32 %v5853_v0, %v5512_v46  ;;  %v2515_v14 = vmul.f32 %v5830_v36, %v6502_v1  ;;  %v5968_v11 = vpop.f32.mrb[53].mxu0 }
 0x379   : > { %6503 = vst [vmem:[#allocation9_spill] sm:$0xff] %v5968_v11  ;;  %v1901_v7 = vadd.f32 %v1900_v20, %v1899_v57  ;;  %v2240_v22 = vrot.slane %v2239_v4, 2  ;;  %v2841_v16 = vmul.f32 %v5858_v28, %v5528_v54  ;;  %v2516_v21 = vmul.f32 %v5835_v62, %v6504_v23  ;;  %v5974_v42 = vpop.f32.mrb[54].mxu0  ;;  %v6512_v57 = vld [vmem:[#allocation34_spill] sm:$0xff] }
 0x37a   : > { %6505 = vst [vmem:[#allocation10_spill] sm:$0xff] %v5974_v42  ;;  %v2234_v39 = vadd.f32 %v2233_v37, %v2232_v40  ;;  %v1908_v43 = vadd.f32 %v1907_v19, %v1906_v31  ;;  %v2842_v0 = vmul.f32 %v5864_v44, %v6506_v10  ;;  %v2517_v36 = vmul.f32 %v6508_v30, %v6507_v53  ;;  %v5980_v25 = vpop.f32.mrb[55].mxu0  ;;  %v5982_v24 = vpop.f32.mrb[48].mxu1 }
 0x37b   : > { %6509 = vst [vmem:[#allocation11_spill] sm:$0xff] %v5980_v25  ;;  %6510 = vst [vmem:[#allocation12_spill] sm:$0xff] %v5982_v24  ;;  %v1902_v45 = vrot.slane %v1901_v7, 1  ;;  %v2241_v3 = vadd.f32 %v2240_v22, %v2239_v4  ;;  %v2530_v28 = vadd.f32 %v2516_v21, %v2514_v33  ;;  %v2843_v62 = vmul.f32 %v6512_v57, %v6511_v47  ;;  %v5986_v29 = vpop.f32.mrb[49].mxu1 }
 0x37c   : > { %6513 = vst [vmem:[#allocation8_spill] sm:$0xff] %v5986_v29  ;;  %v2235_v40 = vrot.slane %v2234_v39, 1  ;;  %v1909_v31 = vrot.slane %v1908_v43, 1  ;;  %v2856_v20 = vadd.f32 %v2842_v0, %v2840_v12  ;;  %v2537_v37 = vadd.f32 %v2517_v36, %v2515_v14  ;;  %v5988_v44 = vpop.f32.mrb[50].mxu1 }
 0x37d   : > { %v1903_v19 = vadd.f32 %v1902_v45, %v1901_v7  ;;  %v2242_v30 = vrot.slane %v2241_v3, 1  ;;  %v2531_v59 = vrot.slane %v2530_v28, 4  ;;  %v2863_v25 = vadd.f32 %v2843_v62, %v2841_v16  ;;  %v5990_v42 = vpop.f32.mrb[51].mxu1 }
 0x37e   : > { %v2236_v24 = vadd.f32 %v2235_v40, %v2234_v39  ;;  %v1910_v4 = vadd.f32 %v1909_v31, %v1908_v43  ;;  %v2857_v33 = vrot.slane %v2856_v20, 4  ;;  %v2538_v22 = vrot.slane %v2537_v37, 4 }
 0x37f   : > { %v1925_v21 = vmul.f32 %v5476_v63, %v1903_v19  ;;  %v2243_v57 = vadd.f32 %v2242_v30, %v2241_v3  ;;  %v2532_v29 = vadd.f32 %v2531_v59, %v2530_v28  ;;  %v2864_v15 = vrot.slane %v2863_v25, 4  ;;  %v5993_v11 = vpop.f32.mrb[56].mxu0 }
 0x380   : > { %v2258_v12 = vmul.f32 %v6493_v58, %v2236_v24  ;;  %v1926_v14 = vmul.f32 %v5499_v35, %v1910_v4  ;;  %v2858_v7 = vadd.f32 %v2857_v33, %v2856_v20  ;;  %v2539_v0 = vadd.f32 %v2538_v22, %v2537_v37  ;;  %v5997_v16 = vpop.f32.mrb[57].mxu0  ;;  %v6514_v33 = vld [vmem:[#allocation35_spill] sm:$0xff] }
 0x381   : > { %v1939_v36 = vrot.slane %v1925_v21, 5  ;;  %v2259_v39 = vmul.f32 %v5502_v55, %v2243_v57  ;;  %v2533_v43 = vrot.slane %v2532_v29, 2  ;;  %v2865_v45 = vadd.f32 %v2864_v15, %v2863_v25  ;;  %v6000_v62 = vpop.f32.mrb[58].mxu0 }
 0x382   : > { %v2273_v63 = vrot.slane %v2258_v12, 1  ;;  %v1945_v59 = vrot.slane %v1926_v14, 5  ;;  %v2859_v3 = vrot.slane %v2858_v7, 2  ;;  %v2540_v28 = vrot.slane %v2539_v0, 2  ;;  %v6002_v40 = vpop.f32.mrb[59].mxu0  ;;  %v6004_v58 = vpop.f32.mrb[52].mxu1 }
 0x383   : > { %v1940_v35 = vsel %vm1282_vm7, %v1939_v36, %v5947_v8  ;;  %v2280_v24 = vrot.slane %v2259_v39, 1  ;;  %v2534_v31 = vadd.f32 %v2533_v43, %v2532_v29  ;;  %v2866_v20 = vrot.slane %v2865_v45, 2  ;;  %v6008_v37 = vpop.f32.mrb[53].mxu1  ;;  %v6515_v12 = vld [vmem:[#allocation36_spill] sm:$0xff] }
 0x384   : > { %1949 = vst [vmem:[#allocation2 + $0x10] sm:$0xf] %v1940_v35  ;;  %v2274_v55 = vsel %vm1619_vm8, %v2273_v63, %v5952_v2  ;;  %v1946_v15 = vsel %vm1282_vm7, %v1945_v59, %v5955_v50  ;;  %v2860_v25 = vadd.f32 %v2859_v3, %v2858_v7  ;;  %v2541_v19 = vadd.f32 %v2540_v28, %v2539_v0  ;;  %v6014_v30 = vpop.f32.mrb[54].mxu1  ;;  %v6516_v3 = vld [vmem:[#allocation14_spill] sm:$0xff] }
 0x385   : > { %2284 = vst [vmem:[#allocation2 + $0x10] sm:$0xf0] %v2274_v55  ;;  %1950 = vst [vmem:[#allocation2 + $0x18] sm:$0xf] %v1946_v15  ;;  %v2281_v8 = vsel %vm1619_vm8, %v2280_v24, %v5958_v34  ;;  %v2535_v29 = vrot.slane %v2534_v31, 1  ;;  %v2867_v4 = vadd.f32 %v2866_v20, %v2865_v45  ;;  %v2518_v22 = vmul.f32 %v6514_v33, %v5505_v61  ;;  %v6020_v21 = vpop.f32.mrb[55].mxu1 }
 0x386   : > { %2285 = vst [vmem:[#allocation2 + $0x18] sm:$0xf0] %v2281_v8  ;;  %v2861_v2 = vrot.slane %v2860_v25, 1  ;;  %v2542_v57 = vrot.slane %v2541_v19, 1  ;;  %v2844_v50 = vmul.f32 %v5883_v52, %v5512_v46  ;;  %v2519_v14 = vmul.f32 %v6515_v12, %v6502_v1  ;;  %v6518_v55 = vld [vmem:[#allocation16_spill] sm:$0xff]  ;;  %v6520_v8 = vld [vmem:[#allocation17_spill] sm:$0xff] }
 0x387   : > { %v2536_v7 = vadd.f32 %v2535_v29, %v2534_v31  ;;  %v2868_v0 = vrot.slane %v2867_v4, 1  ;;  %v2845_v34 = vmul.f32 %v5887_v32, %v5528_v54  ;;  %v2520_v36 = vmul.f32 %v5878_v49, %v6504_v23  ;;  %v6030_v39 = vpop.f32.mrb[60].mxu0  ;;  %v6517_v31 = vld [vmem:[#allocation15_spill] sm:$0xff] }
 0x388   : > { %v2862_v43 = vadd.f32 %v2861_v2, %v2860_v25  ;;  %v2543_v45 = vadd.f32 %v2542_v57, %v2541_v19  ;;  %v2846_v63 = vmul.f32 %v5890_v13, %v6506_v10  ;;  %v2521_v52 = vmul.f32 %v5880_v6, %v6507_v53  ;;  %v6036_v59 = vpop.f32.mrb[61].mxu0 }
 0x389   : > { %v6039_v28 = vmul.f32 %v6516_v3, %v2536_v7  ;;  %v2869_v35 = vadd.f32 %v2868_v0, %v2867_v4  ;;  %v2544_v32 = vadd.f32 %v2520_v36, %v2518_v22  ;;  %v2847_v49 = vmul.f32 %v5892_v48, %v6511_v47  ;;  %v6043_v24 = vpop.f32.mrb[62].mxu0 }
 0x38a   : > { %v6046_v20 = vmul.f32 %v6517_v31, %v2862_v43  ;;  %v6049_v13 = vmul.f32 %v6518_v55, %v2543_v45  ;;  %v2870_v15 = vadd.f32 %v2846_v63, %v2844_v50  ;;  %v2551_v6 = vadd.f32 %v2521_v52, %v2519_v14  ;;  %v6051_v25 = vpop.f32.mrb[63].mxu0  ;;  %v6053_v19 = vpop.f32.mrb[56].mxu1 }
 0x38b   : > { %6519 = vst [vmem:[#allocation13_spill] sm:$0xff] %v6053_v19  ;;  %v6056_v29 = vmul.f32 %v6520_v8, %v2869_v35  ;;  %v2545_v4 = vrot.slane %v2544_v32, 4  ;;  %v2877_v33 = vadd.f32 %v2847_v49, %v2845_v34  ;;  %v2522_v48 = vmul.f32 %v5894_v9, %v5505_v61  ;;  %v6060_v22 = vpop.f32.mrb[57].mxu1 }
 0x38c   : > { %6521 = vst [vmem:[#allocation34_spill] sm:$0xff] %v6060_v22  ;;  %v2871_v57 = vrot.slane %v2870_v15, 4  ;;  %v2552_v12 = vrot.slane %v2551_v6, 4  ;;  %v2848_v50 = vmul.f32 %v5922_v17, %v5512_v46  ;;  %v6065_v14 = vpop.f32.mrb[58].mxu1  ;;  %v2523_v34 = vmul.f32 %v5898_v5, %v6502_v1 }
 0x38d   : > { %6522 = vst [vmem:[#allocation35_spill] sm:$0xff] %v6065_v14  ;;  %v2546_v0 = vadd.f32 %v2545_v4, %v2544_v32  ;;  %v2878_v36 = vrot.slane %v2877_v33, 4  ;;  %v6070_v43 = vpop.f32.mrb[59].mxu1  ;;  %v2849_v63 = vmul.f32 %v5928_v56, %v5528_v54  ;;  %v2524_v52 = vmul.f32 %v5905_v27, %v6504_v23 }
 0x38e   : > { %6523 = vst [vmem:[#allocation36_spill] sm:$0xff] %v6070_v43  ;;  %v2872_v9 = vadd.f32 %v2871_v57, %v2870_v15  ;;  %v2553_v45 = vadd.f32 %v2552_v12, %v2551_v6  ;;  %v2850_v49 = vmul.f32 %v5933_v26, %v6506_v10  ;;  %v2525_v32 = vmul.f32 %v5912_v41, %v6507_v53 }
 0x38f   : > { %v2547_v17 = vrot.slane %v2546_v0, 2  ;;  %v2879_v35 = vadd.f32 %v2878_v36, %v2877_v33  ;;  %v6080_v4 = vpop.f32.mrb[64].mxu0  ;;  %v2558_v15 = vadd.f32 %v2524_v52, %v2522_v48  ;;  %v2851_v6 = vmul.f32 %v5937_v18, %v6511_v47 }
 0x390   : > { %6524 = vst [vmem:[#allocation14_spill] sm:$0xff] %v6080_v4  ;;  %v2873_v5 = vrot.slane %v2872_v9, 2  ;;  %v2554_v7 = vrot.slane %v2553_v45, 2  ;;  %v6084_v56 = vpop.f32.mrb[65].mxu0  ;;  %v2884_v12 = vadd.f32 %v2850_v49, %v2848_v50  ;;  %v2565_v33 = vadd.f32 %v2525_v32, %v2523_v34 }
 0x391   : > { %6525 = vst [vmem:[#allocation15_spill] sm:$0xff] %v6084_v56  ;;  %v2548_v57 = vadd.f32 %v2547_v17, %v2546_v0  ;;  %v2880_v27 = vrot.slane %v2879_v35, 2  ;;  %v6086_v36 = vpop.f32.mrb[66].mxu0  ;;  %v2559_v43 = vrot.slane %v2558_v15, 4  ;;  %v2891_v41 = vadd.f32 %v2851_v6, %v2849_v63 }
 0x392   : > { %6526 = vst [vmem:[#allocation16_spill] sm:$0xff] %v6086_v36  ;;  %v2874_v26 = vadd.f32 %v2873_v5, %v2872_v9  ;;  %v2555_v2 = vadd.f32 %v2554_v7, %v2553_v45  ;;  %v6088_v14 = vpop.f32.mrb[67].mxu0  ;;  %v6090_v22 = vpop.f32.mrb[60].mxu1  ;;  %v2885_v4 = vrot.slane %v2884_v12, 4  ;;  %v2566_v18 = vrot.slane %v2565_v33, 4 }
 0x393   : > { %6527 = vst [vmem:[#allocation17_spill] sm:$0xff] %v6088_v14  ;;  %6528 = vst [vmem:[#allocation39_spill] sm:$0xff] %v6090_v22  ;;  %v2549_v48 = vrot.slane %v2548_v57, 1  ;;  %v2881_v52 = vadd.f32 %v2880_v27, %v2879_v35  ;;  %v6092_v19 = vpop.f32.mrb[61].mxu1  ;;  %v2560_v50 = vadd.f32 %v2559_v43, %v2558_v15  ;;  %v2892_v34 = vrot.slane %v2891_v41, 4 }
 0x394   : > { %6529 = vst [vmem:[#allocation40_spill] sm:$0xff] %v6092_v19  ;;  %v2875_v0 = vrot.slane %v2874_v26, 1  ;;  %v2556_v17 = vrot.slane %v2555_v2, 1  ;;  %v6094_v49 = vpop.f32.mrb[62].mxu1  ;;  %v2886_v45 = vadd.f32 %v2885_v4, %v2884_v12  ;;  %v2567_v63 = vadd.f32 %v2566_v18, %v2565_v33 }
 0x395   : > { %v2550_v9 = vadd.f32 %v2549_v48, %v2548_v57  ;;  %v2882_v7 = vrot.slane %v2881_v52, 1  ;;  %v6096_v32 = vpop.f32.mrb[63].mxu1  ;;  %v2561_v22 = vrot.slane %v2560_v50, 2  ;;  %v2893_v35 = vadd.f32 %v2892_v34, %v2891_v41 }
 0x396   : > { %v2876_v5 = vadd.f32 %v2875_v0, %v2874_v26  ;;  %v2557_v6 = vadd.f32 %v2556_v17, %v2555_v2  ;;  %v2887_v19 = vrot.slane %v2886_v45, 2  ;;  %v2568_v36 = vrot.slane %v2567_v63, 2 }
 0x397   : > { %v2596_v27 = vmul.f32 %v6516_v3, %v2550_v9  ;;  %v2883_v14 = vadd.f32 %v2882_v7, %v2881_v52  ;;  %v6099_v56 = vpop.f32.mrb[68].mxu0  ;;  %v2562_v57 = vadd.f32 %v2561_v22, %v2560_v50  ;;  %v2894_v4 = vrot.slane %v2893_v35, 2 }
 0x398   : > { %v2922_v43 = vmul.f32 %v6517_v31, %v2876_v5  ;;  %v2597_v15 = vmul.f32 %v6518_v55, %v2557_v6  ;;  %v6103_v12 = vpop.f32.mrb[69].mxu0  ;;  %v2888_v26 = vadd.f32 %v2887_v19, %v2886_v45  ;;  %v2569_v41 = vadd.f32 %v2568_v36, %v2567_v63 }
 0x399   : > { %v2610_v33 = vrot.slane %v2596_v27, 7  ;;  %v2923_v2 = vmul.f32 %v6520_v8, %v2883_v14  ;;  %v6106_v48 = vpop.f32.mrb[70].mxu0  ;;  %v2563_v0 = vrot.slane %v2562_v57, 1  ;;  %v2895_v17 = vadd.f32 %v2894_v4, %v2893_v35 }
 0x39a   : > { %v2937_v52 = vrot.slane %v2922_v43, 3  ;;  %v2616_v18 = vrot.slane %v2597_v15, 7  ;;  %v6108_v34 = vpop.f32.mrb[71].mxu0  ;;  %v6110_v9 = vpop.f32.mrb[64].mxu1  ;;  %v2889_v7 = vrot.slane %v2888_v26, 1  ;;  %v2570_v5 = vrot.slane %v2569_v41, 1 }
 0x39b   : > { %v2611_v22 = vsel %vm1276_vm6, %v2610_v33, %v6039_v28  ;;  %v2944_v50 = vrot.slane %v2923_v2, 3  ;;  %v6114_v6 = vpop.f32.mrb[65].mxu1  ;;  %v6530_v19 = vrot.slane %v6046_v20, 4  ;;  %v2564_v45 = vadd.f32 %v2563_v0, %v2562_v57 }
 0x39c   : > { %v2617_v36 = vsel %vm1276_vm6, %v2616_v18, %v6049_v13  ;;  %v2896_v63 = vrot.slane %v2895_v17, 1  ;;  %v6121_v35 = vpop.f32.mrb[66].mxu1  ;;  %v6531_v27 = vrot.slane %v6056_v29, 4  ;;  %v2890_v43 = vadd.f32 %v2889_v7, %v2888_v26  ;;  %v6533_v26 = vld [vmem:[#allocation9_spill] sm:$0xff] }
 0x39d   : > { %v2938_v14 = vsel %vm1613_vm12, %v2937_v52, %v6530_v19  ;;  %v2571_v15 = vadd.f32 %v2570_v5, %v2569_v41  ;;  %v2526_v4 = vmul.f32 %v5939_v60, %v5505_v61  ;;  %v6128_v33 = vpop.f32.mrb[67].mxu1  ;;  %v2598_v20 = vmul.f32 %v6516_v3, %v2564_v45  ;;  %v6534_v61 = vld [vmem:[#allocation37_spill] sm:$0xff]  ;;  %v6537_v5 = vld [vmem:[#allocation11_spill] sm:$0xff] }
 0x39e   : > { %v2945_v28 = vsel %vm1613_vm12, %v2944_v50, %v6531_v27  ;;  %6532 = vst [vmem:[#allocation41_spill] sm:$0xff] %v6128_v33  ;;  %v2897_v2 = vadd.f32 %v2896_v63, %v2895_v17  ;;  %v2852_v13 = vmul.f32 %v5962_v51, %v5512_v46  ;;  %v2527_v57 = vmul.f32 %v5942_v38, %v6502_v1  ;;  %v6535_v17 = vld [vmem:[#allocation10_spill] sm:$0xff]  ;;  %v3939_v45 = vld [vmem:[#allocation2 + $0x18] sm:$0xff] }
 0x39f   : > { %v2924_v29 = vmul.f32 %v6517_v31, %v2890_v43  ;;  %v2599_v52 = vmul.f32 %v6518_v55, %v2571_v15  ;;  %v2853_v41 = vmul.f32 %v6533_v26, %v5528_v54  ;;  %v2528_v60 = vmul.f32 %v6534_v61, %v6504_v23  ;;  %v6536_v46 = vld [vmem:[#allocation38_spill] sm:$0xff]  ;;  %v3938_v43 = vld [vmem:[#allocation2 + $0x10] sm:$0xff] }
 0x3a0   : > { %v2612_v18 = vrot.slane %v2598_v20, 6  ;;  %v2925_v0 = vmul.f32 %v6520_v8, %v2897_v2  ;;  %v2854_v50 = vmul.f32 %v6535_v17, %v6506_v10  ;;  %v2529_v51 = vmul.f32 %v6536_v46, %v6507_v53  ;;  %v3937_v2 = vld [vmem:[#allocation2 + $0x8] sm:$0xff] }
 0x3a1   : > { %v2939_v38 = vrot.slane %v2924_v29, 2  ;;  %v2618_v1 = vrot.slane %v2599_v52, 6  ;;  %v2572_v7 = vadd.f32 %v2528_v60, %v2526_v4  ;;  %v2855_v19 = vmul.f32 %v6537_v5, %v6511_v47  ;;  %v3936_v52 = vld [vmem:[#allocation2] sm:$0xff]  ;;  %v6544_v46 = vld [vmem:[#allocation19_spill] sm:$0xff] }
 0x3a2   : > { %v6149_v54 = vsel %vm1279_vm15, %v2612_v18, %v2611_v22  ;;  %v2946_v23 = vrot.slane %v2925_v0, 2  ;;  %v2898_v63 = vadd.f32 %v2854_v50, %v2852_v13  ;;  %v2579_v27 = vadd.f32 %v2529_v51, %v2527_v57  ;;  %v6151_v15 = vpop.f32.mrb[68].mxu1  ;;  %v6541_v18 = vld [vmem:[#allocation18_spill] sm:$0xff]  ;;  %v6545_v51 = vld [vmem:[#allocation20_spill] sm:$0xff] }
 0x3a3   : > { %6538 = vst [vmem:[#allocation9_spill] sm:$0xff] %v6151_v15  ;;  %v6154_v10 = vsel %vm1616_vm0, %v2939_v38, %v2938_v14  ;;  %v6157_v53 = vsel %vm1279_vm15, %v2618_v1, %v2617_v36  ;;  %v2573_v4 = vrot.slane %v2572_v7, 4  ;;  %v2905_v20 = vadd.f32 %v2855_v19, %v2853_v41  ;;  %v6159_v47 = vpop.f32.mrb[69].mxu1  ;;  %v6542_v36 = vld [vmem:[#allocation12_spill] sm:$0xff] }
 0x3a4   : > { %6539 = vst [vmem:[#allocation37_spill] sm:$0xff] %v6159_v47  ;;  %v6162_v22 = vsel %vm1616_vm0, %v2946_v23, %v2945_v28  ;;  %v2899_v29 = vrot.slane %v2898_v63, 4  ;;  %v2580_v13 = vrot.slane %v2579_v27, 4  ;;  %v4251_v57 = vpack.c.bf16 %v3939_v45, %v3937_v2  ;;  %v6164_v26 = vpop.f32.mrb[70].mxu1  ;;  %v6546_v38 = vld [vmem:[#allocation8_spill] sm:$0xff]  ;;  %v6548_v23 = vld [vmem:[#allocation23_spill] sm:$0xff] }
 0x3a5   : > { %6540 = vst [vmem:[#allocation10_spill] sm:$0xff] %v6164_v26  ;;  %v2574_v61 = vadd.f32 %v2573_v4, %v2572_v7  ;;  %v2906_v14 = vrot.slane %v2905_v20, 4  ;;  %v4253_v60 = vpack.c.bf16 %v3938_v43, %v3936_v52  ;;  %v3161_v0 = vmul.f32 %v6542_v36, %v6541_v18  ;;  %v6168_v17 = vpop.f32.mrb[71].mxu1  ;;  %v6547_v7 = vld [vmem:[#allocation22_spill] sm:$0xff]  ;;  %v6551_v36 = vld [vmem:[#allocation29_spill] sm:$0xff] }
 0x3a6   : > { %6543 = vst [vmem:[#allocation38_spill] sm:$0xff] %v6168_v17  ;;  %v2900_v41 = vadd.f32 %v2899_v29, %v2898_v63  ;;  %v2581_v50 = vadd.f32 %v2580_v13, %v2579_v27  ;;  %4252 = vmatprep.subr.bf16.mxu0 %v4251_v57  ;;  %v3496_v28 = vmul.f32 %v5993_v11, %v6544_v46  ;;  %v6549_v63 = vld [vmem:[#allocation26_spill] sm:$0xff]  ;;  %v6550_v29 = vld [vmem:[#allocation27_spill] sm:$0xff] }
 0x3a7   : > { %v3162_v1 = vmul.f32 %v6546_v38, %v6545_v51  ;;  %v2575_v5 = vrot.slane %v2574_v61, 2  ;;  %v2907_v19 = vadd.f32 %v2906_v14, %v2905_v20  ;;  %4254 = vmatpush1.bf16.msra.mxu0 %v4253_v60  ;;  %v3497_v45 = vmul.f32 %v5997_v16, %v6547_v7 }
 0x3a8   : > { %v3163_v43 = vmul.f32 %v5988_v44, %v6548_v23  ;;  %v2901_v4 = vrot.slane %v2900_v41, 2  ;;  %v2582_v2 = vrot.slane %v2581_v50, 2  ;;  %v3498_v27 = vmul.f32 %v6000_v62, %v6549_v63 }
 0x3a9   : > { %v3164_v11 = vmul.f32 %v5990_v42, %v6550_v29  ;;  %v2576_v13 = vadd.f32 %v2575_v5, %v2574_v61  ;;  %v2908_v57 = vrot.slane %v2907_v19, 2  ;;  %v3499_v20 = vmul.f32 %v6002_v40, %v6551_v36 }
 0x3aa   : > { %v3177_v52 = vadd.f32 %v3163_v43, %v3161_v0  ;;  %v2902_v14 = vadd.f32 %v2901_v4, %v2900_v41  ;;  %v2583_v60 = vadd.f32 %v2582_v2, %v2581_v50  ;;  %v3512_v16 = vadd.f32 %v3498_v27, %v3496_v28  ;;  %v6184_v17 = vpop.f32.mrb[72].mxu1 }
 0x3ab   : > { %v3184_v38 = vadd.f32 %v3164_v11, %v3162_v1  ;;  %v2577_v44 = vrot.slane %v2576_v13, 1  ;;  %v2909_v26 = vadd.f32 %v2908_v57, %v2907_v19  ;;  %v3519_v15 = vadd.f32 %v3499_v20, %v3497_v45  ;;  %v6186_v62 = vpop.f32.mrb[73].mxu1 }
 0x3ac   : > { %v3178_v47 = vrot.slane %v3177_v52, 4  ;;  %6552 = vst [vmem:[#allocation11_spill] sm:$0xff] %v6186_v62  ;;  %v2903_v33 = vrot.slane %v2902_v14, 1  ;;  %v2584_v42 = vrot.slane %v2583_v60, 1  ;;  %v3513_v61 = vrot.slane %v3512_v16, 4  ;;  %v6188_v0 = vpop.f32.mrb[74].mxu1 }
 0x3ad   : > { %v3185_v5 = vrot.slane %v3184_v38, 4  ;;  %6553 = vst [vmem:[#allocation18_spill] sm:$0xff] %v6188_v0  ;;  %v2578_v43 = vadd.f32 %v2577_v44, %v2576_v13  ;;  %v2910_v40 = vrot.slane %v2909_v26, 1  ;;  %v3520_v50 = vrot.slane %v3519_v15, 4  ;;  %v6190_v28 = vpop.f32.mrb[75].mxu1 }
 0x3ae   : > { %v3179_v41 = vadd.f32 %v3178_v47, %v3177_v52  ;;  %6554 = vst [vmem:[#allocation12_spill] sm:$0xff] %v6190_v28  ;;  %v2904_v1 = vadd.f32 %v2903_v33, %v2902_v14  ;;  %v2585_v4 = vadd.f32 %v2584_v42, %v2583_v60  ;;  %v3514_v2 = vadd.f32 %v3513_v61, %v3512_v16 }
 0x3af   : > { %v3186_v19 = vadd.f32 %v3185_v5, %v3184_v38  ;;  %v2600_v45 = vmul.f32 %v6516_v3, %v2578_v43  ;;  %v2911_v27 = vadd.f32 %v2910_v40, %v2909_v26  ;;  %v3521_v57 = vadd.f32 %v3520_v50, %v3519_v15 }
 0x3b0   : > { %v3180_v11 = vrot.slane %v3179_v41, 2  ;;  %v2926_v20 = vmul.f32 %v6517_v31, %v2904_v1  ;;  %v2601_v62 = vmul.f32 %v6518_v55, %v2585_v4  ;;  %v3515_v0 = vrot.slane %v3514_v2, 2  ;;  %v6555_v1 = vld [vmem:[#allocation21_spill] sm:$0xff] }
 0x3b1   : > { %v3187_v13 = vrot.slane %v3186_v19, 2  ;;  %v2614_v44 = vrot.slane %v2600_v45, 5  ;;  %v2927_v47 = vmul.f32 %v6520_v8, %v2911_v27  ;;  %v3522_v28 = vrot.slane %v3521_v57, 2  ;;  %v6557_v27 = vld [vmem:[#allocation25_spill] sm:$0xff] }
 0x3b2   : > { %v3181_v52 = vadd.f32 %v3180_v11, %v3179_v41  ;;  %v2941_v33 = vrot.slane %v2926_v20, 1  ;;  %v2620_v14 = vrot.slane %v2601_v62, 5  ;;  %v3516_v60 = vadd.f32 %v3515_v0, %v3514_v2  ;;  %v6196_v38 = vpop.f32.mrb[76].mxu1 }
 0x3b3   : > { %v3188_v16 = vadd.f32 %v3187_v13, %v3186_v19  ;;  %v2615_v3 = vsel %vm1282_vm7, %v2614_v44, %v6149_v54  ;;  %v2948_v15 = vrot.slane %v2927_v47, 1  ;;  %v3523_v26 = vadd.f32 %v3522_v28, %v3521_v57  ;;  %v6200_v55 = vpop.f32.mrb[77].mxu1  ;;  %v6556_v19 = vld [vmem:[#allocation24_spill] sm:$0xff] }
 0x3b4   : > { %v3182_v31 = vrot.slane %v3181_v52, 1  ;;  %2624 = vst [vmem:[#allocation2 + $0x20] sm:$0xf] %v2615_v3  ;;  %v2942_v8 = vsel %vm1619_vm8, %v2941_v33, %v6154_v10  ;;  %v2621_v42 = vsel %vm1282_vm7, %v2620_v14, %v6157_v53  ;;  %v3517_v62 = vrot.slane %v3516_v60, 1  ;;  %v6206_v5 = vpop.f32.mrb[78].mxu1  ;;  %v6558_v57 = vld [vmem:[#allocation28_spill] sm:$0xff] }
 0x3b5   : > { %v3189_v61 = vrot.slane %v3188_v16, 1  ;;  %2952 = vst [vmem:[#allocation2 + $0x20] sm:$0xf0] %v2942_v8  ;;  %2625 = vst [vmem:[#allocation2 + $0x28] sm:$0xf] %v2621_v42  ;;  %v2949_v54 = vsel %vm1619_vm8, %v2948_v15, %v6162_v22  ;;  %v3524_v43 = vrot.slane %v3523_v26, 1  ;;  %v3165_v40 = vmul.f32 %v6004_v58, %v6541_v18 }
 0x3b6   : > { %v3183_v0 = vadd.f32 %v3182_v31, %v3181_v52  ;;  %v6212_v41 = vpop.f32.mrb[79].mxu1  ;;  %2953 = vst [vmem:[#allocation2 + $0x28] sm:$0xf0] %v2949_v54  ;;  %v3518_v10 = vadd.f32 %v3517_v62, %v3516_v60  ;;  %v3500_v53 = vmul.f32 %v6030_v39, %v6544_v46  ;;  %v3166_v28 = vmul.f32 %v6008_v37, %v6545_v51  ;;  %v6560_v14 = vld [vmem:[#allocation14_spill] sm:$0xff]  ;;  %v6563_v42 = vld [vmem:[#allocation35_spill] sm:$0xff] }
 0x3b7   : > { %v3190_v50 = vadd.f32 %v3189_v61, %v3188_v16  ;;  %v3525_v22 = vadd.f32 %v3524_v43, %v3523_v26  ;;  %v3501_v2 = vmul.f32 %v6036_v59, %v6547_v7  ;;  %v3167_v58 = vmul.f32 %v6014_v30, %v6548_v23  ;;  %v6559_v30 = vld [vmem:[#allocation13_spill] sm:$0xff]  ;;  %v6561_v3 = vld [vmem:[#allocation34_spill] sm:$0xff] }
 0x3b8   : > { %v6219_v4 = vmul.f32 %v6555_v1, %v3183_v0  ;;  %v6226_v45 = vmul.f32 %v6556_v19, %v3518_v10  ;;  %v3502_v39 = vmul.f32 %v6043_v24, %v6549_v63  ;;  %v3168_v37 = vmul.f32 %v6020_v21, %v6550_v29  ;;  %v6564_v0 = vld [vmem:[#allocation16_spill] sm:$0xff] }
 0x3b9   : > { %v6229_v11 = vmul.f32 %v6557_v27, %v3190_v50  ;;  %v6236_v20 = vmul.f32 %v6558_v57, %v3525_v22  ;;  %v3191_v13 = vadd.f32 %v3167_v58, %v3165_v40  ;;  %v3503_v59 = vmul.f32 %v6051_v25, %v6551_v36  ;;  %v6562_v25 = vld [vmem:[#allocation15_spill] sm:$0xff]  ;;  %v6565_v40 = vld [vmem:[#allocation36_spill] sm:$0xff]  ;;  %v6566_v22 = vld [vmem:[#allocation17_spill] sm:$0xff] }
 0x3ba   : > { %v3169_v44 = vmul.f32 %v6559_v30, %v6541_v18  ;;  %v3526_v52 = vadd.f32 %v3502_v39, %v3500_v53  ;;  %v3198_v33 = vadd.f32 %v3168_v37, %v3166_v28  ;;  %v3504_v24 = vmul.f32 %v6560_v14, %v6544_v46 }
 0x3bb   : > { %v3192_v21 = vrot.slane %v3191_v13, 4  ;;  %v3533_v16 = vadd.f32 %v3503_v59, %v3501_v2  ;;  %v3170_v15 = vmul.f32 %v6561_v3, %v6545_v51  ;;  %v3505_v8 = vmul.f32 %v6562_v25, %v6547_v7 }
 0x3bc   : > { %v3527_v31 = vrot.slane %v3526_v52, 4  ;;  %v3199_v26 = vrot.slane %v3198_v33, 4  ;;  %v3171_v62 = vmul.f32 %v6563_v42, %v6548_v23  ;;  %v3506_v43 = vmul.f32 %v6564_v0, %v6549_v63 }
 0x3bd   : > { %v3193_v61 = vadd.f32 %v3192_v21, %v3191_v13  ;;  %v3534_v54 = vrot.slane %v3533_v16, 4  ;;  %v3172_v10 = vmul.f32 %v6565_v40, %v6550_v29  ;;  %v3507_v2 = vmul.f32 %v6566_v22, %v6551_v36 }
 0x3be   : > { %v3528_v50 = vadd.f32 %v3527_v31, %v3526_v52  ;;  %v3200_v53 = vadd.f32 %v3199_v26, %v3198_v33  ;;  %v3205_v28 = vadd.f32 %v3171_v62, %v3169_v44  ;;  %v3540_v37 = vadd.f32 %v3506_v43, %v3504_v24 }
 0x3bf   : > { %v3194_v58 = vrot.slane %v3193_v61, 2  ;;  %v3535_v39 = vadd.f32 %v3534_v54, %v3533_v16  ;;  %v3212_v59 = vadd.f32 %v3172_v10, %v3170_v15  ;;  %v3547_v21 = vadd.f32 %v3507_v2, %v3505_v8 }
 0x3c0   : > { %v3529_v30 = vrot.slane %v3528_v50, 2  ;;  %v3201_v14 = vrot.slane %v3200_v53, 2  ;;  %v3206_v13 = vrot.slane %v3205_v28, 4  ;;  %v3541_v42 = vrot.slane %v3540_v37, 4 }
 0x3c1   : > { %v3195_v3 = vadd.f32 %v3194_v58, %v3193_v61  ;;  %v3536_v25 = vrot.slane %v3535_v39, 2  ;;  %v3213_v0 = vrot.slane %v3212_v59, 4  ;;  %v3548_v33 = vrot.slane %v3547_v21, 4 }
 0x3c2   : > { %v3530_v60 = vadd.f32 %v3529_v30, %v3528_v50  ;;  %v3202_v40 = vadd.f32 %v3201_v14, %v3200_v53  ;;  %v3207_v52 = vadd.f32 %v3206_v13, %v3205_v28  ;;  %v3542_v26 = vadd.f32 %v3541_v42, %v3540_v37 }
 0x3c3   : > { %v3196_v44 = vrot.slane %v3195_v3, 1  ;;  %v3537_v31 = vadd.f32 %v3536_v25, %v3535_v39  ;;  %v3214_v62 = vadd.f32 %v3213_v0, %v3212_v59  ;;  %v3549_v15 = vadd.f32 %v3548_v33, %v3547_v21 }
 0x3c4   : > { %v3531_v22 = vrot.slane %v3530_v60, 1  ;;  %v3203_v16 = vrot.slane %v3202_v40, 1  ;;  %v3208_v24 = vrot.slane %v3207_v52, 2  ;;  %v3543_v10 = vrot.slane %v3542_v26, 2 }
 0x3c5   : > { %v3197_v54 = vadd.f32 %v3196_v44, %v3195_v3  ;;  %v3538_v43 = vrot.slane %v3537_v31, 1  ;;  %v3215_v8 = vrot.slane %v3214_v62, 2  ;;  %v3550_v47 = vrot.slane %v3549_v15, 2 }
 0x3c6   : > { %v3532_v61 = vadd.f32 %v3531_v22, %v3530_v60  ;;  %v3204_v2 = vadd.f32 %v3203_v16, %v3202_v40  ;;  %v3209_v58 = vadd.f32 %v3208_v24, %v3207_v52  ;;  %v3544_v28 = vadd.f32 %v3543_v10, %v3542_v26 }
 0x3c7   : > { %v3243_v50 = vmul.f32 %v6555_v1, %v3197_v54  ;;  %v3539_v53 = vadd.f32 %v3538_v43, %v3537_v31  ;;  %v3216_v30 = vadd.f32 %v3215_v8, %v3214_v62  ;;  %v3551_v14 = vadd.f32 %v3550_v47, %v3549_v15  ;;  %v6569_v43 = vld [vmem:[#allocation39_spill] sm:$0xff] }
 0x3c8   : > { %v3578_v39 = vmul.f32 %v6556_v19, %v3532_v61  ;;  %v3244_v37 = vmul.f32 %v6557_v27, %v3204_v2  ;;  %v3210_v59 = vrot.slane %v3209_v58, 1  ;;  %v3545_v3 = vrot.slane %v3544_v28, 1  ;;  %v6570_v61 = vld [vmem:[#allocation40_spill] sm:$0xff] }
 0x3c9   : > { %v3257_v13 = vrot.slane %v3243_v50, 7  ;;  %v3579_v21 = vmul.f32 %v6558_v57, %v3539_v53  ;;  %v3217_v25 = vrot.slane %v3216_v30, 1  ;;  %v3552_v40 = vrot.slane %v3551_v14, 1 }
 0x3ca   : > { %v3593_v60 = vrot.slane %v3578_v39, 3  ;;  %v3263_v42 = vrot.slane %v3244_v37, 7  ;;  %v3211_v0 = vadd.f32 %v3210_v59, %v3209_v58  ;;  %v3546_v44 = vadd.f32 %v3545_v3, %v3544_v28  ;;  %v6571_v37 = vld [vmem:[#allocation30_spill] sm:$0xff] }
 0x3cb   : > { %v3258_v52 = vsel %vm1276_vm6, %v3257_v13, %v6219_v4  ;;  %v3600_v33 = vrot.slane %v3579_v21, 3  ;;  %v3218_v31 = vadd.f32 %v3217_v25, %v3216_v30  ;;  %v6567_v26 = vrot.slane %v6226_v45, 4  ;;  %v6574_v25 = vld [vmem:[#allocation33_spill] sm:$0xff] }
 0x3cc   : > { %v3264_v47 = vsel %vm1276_vm6, %v3263_v42, %v6229_v11  ;;  %v3245_v22 = vmul.f32 %v6555_v1, %v3211_v0  ;;  %v3553_v16 = vadd.f32 %v3552_v40, %v3551_v14  ;;  %v6568_v24 = vrot.slane %v6236_v20, 4  ;;  %v6573_v14 = vld [vmem:[#allocation32_spill] sm:$0xff] }
 0x3cd   : > { %v3594_v62 = vsel %vm1613_vm12, %v3593_v60, %v6567_v26  ;;  %v3580_v54 = vmul.f32 %v6556_v19, %v3546_v44  ;;  %v3246_v4 = vmul.f32 %v6557_v27, %v3218_v31  ;;  %v3173_v10 = vmul.f32 %v6569_v43, %v6541_v18  ;;  %v6576_v60 = vld [vmem:[#allocation9_spill] sm:$0xff]  ;;  %v6578_v26 = vld [vmem:[#allocation10_spill] sm:$0xff] }
 0x3ce   : > { %v3601_v15 = vsel %vm1613_vm12, %v3600_v33, %v6568_v24  ;;  %v3259_v45 = vrot.slane %v3245_v22, 6  ;;  %v3581_v8 = vmul.f32 %v6558_v57, %v3553_v16  ;;  %v3508_v11 = vmul.f32 %v6099_v56, %v6544_v46  ;;  %v6579_v16 = vld [vmem:[#allocation38_spill] sm:$0xff] }
 0x3cf   : > { %v3174_v2 = vmul.f32 %v6570_v61, %v6545_v51  ;;  %v3595_v58 = vrot.slane %v3580_v54, 2  ;;  %v3265_v20 = vrot.slane %v3246_v4, 6  ;;  %v3509_v50 = vmul.f32 %v6103_v12, %v6547_v7 }
 0x3d0   : > { %v3175_v53 = vmul.f32 %v6094_v49, %v6548_v23  ;;  %v6287_v28 = vsel %vm1279_vm15, %v3259_v45, %v3258_v52  ;;  %v3602_v18 = vrot.slane %v3581_v8, 2  ;;  %v3510_v30 = vmul.f32 %v6106_v48, %v6549_v63 }
 0x3d1   : > { %v3176_v56 = vmul.f32 %v6096_v32, %v6550_v29  ;;  %v6294_v46 = vsel %vm1616_vm0, %v3595_v58, %v3594_v62  ;;  %v6297_v51 = vsel %vm1279_vm15, %v3265_v20, %v3264_v47  ;;  %v3511_v49 = vmul.f32 %v6108_v34, %v6551_v36  ;;  %v6572_v29 = vld [vmem:[#allocation31_spill] sm:$0xff]  ;;  %v6575_v34 = vld [vmem:[#allocation41_spill] sm:$0xff] }
 0x3d2   : > { %v3219_v12 = vadd.f32 %v3175_v53, %v3173_v10  ;;  %v6302_v7 = vsel %vm1616_vm0, %v3602_v18, %v3601_v15  ;;  %v3554_v23 = vadd.f32 %v3510_v30, %v3508_v11  ;;  %v3823_v48 = vmul.f32 %v6110_v9, %v6571_v37  ;;  %v6577_v9 = vld [vmem:[#allocation37_spill] sm:$0xff] }
 0x3d3   : > { %v3226_v39 = vadd.f32 %v3176_v56, %v3174_v2  ;;  %v3561_v32 = vadd.f32 %v3511_v49, %v3509_v50  ;;  %v3824_v59 = vmul.f32 %v6114_v6, %v6572_v29  ;;  %v3825_v13 = vmul.f32 %v6121_v35, %v6573_v14 }
 0x3d4   : > { %v3220_v63 = vrot.slane %v3219_v12, 4  ;;  %v3555_v21 = vrot.slane %v3554_v23, 4  ;;  %v3826_v36 = vmul.f32 %v6575_v34, %v6574_v25  ;;  %v3827_v42 = vmul.f32 %v6576_v60, %v6571_v37 }
 0x3d5   : > { %v3227_v3 = vrot.slane %v3226_v39, 4  ;;  %v3562_v40 = vrot.slane %v3561_v32, 4  ;;  %v3839_v52 = vadd.f32 %v3825_v13, %v3823_v48  ;;  %v3828_v33 = vmul.f32 %v6577_v9, %v6572_v29 }
 0x3d6   : > { %v3221_v0 = vadd.f32 %v3220_v63, %v3219_v12  ;;  %v3556_v44 = vadd.f32 %v3555_v21, %v3554_v23  ;;  %v3846_v6 = vadd.f32 %v3826_v36, %v3824_v59  ;;  %v3829_v35 = vmul.f32 %v6578_v26, %v6573_v14 }
 0x3d7   : > { %v3228_v31 = vadd.f32 %v3227_v3, %v3226_v39  ;;  %v3563_v47 = vadd.f32 %v3562_v40, %v3561_v32  ;;  %v3840_v22 = vrot.slane %v3839_v52, 4  ;;  %v3830_v24 = vmul.f32 %v6579_v16, %v6574_v25  ;;  %v6580_v16 = vld [vmem:[#allocation6_spill] sm:$0xff] }
 0x3d8   : > { %v3222_v62 = vrot.slane %v3221_v0, 2  ;;  %v3557_v15 = vrot.slane %v3556_v44, 2  ;;  %v3847_v4 = vrot.slane %v3846_v6, 4  ;;  %v3853_v43 = vadd.f32 %v3829_v35, %v3827_v42 }
 0x3d9   : > { %v3229_v54 = vrot.slane %v3228_v31, 2  ;;  %v3564_v45 = vrot.slane %v3563_v47, 2  ;;  %v3841_v8 = vadd.f32 %v3840_v22, %v3839_v52  ;;  %v3860_v11 = vadd.f32 %v3830_v24, %v3828_v33 }
 0x3da   : > { %v3223_v10 = vadd.f32 %v3222_v62, %v3221_v0  ;;  %v3558_v61 = vadd.f32 %v3557_v15, %v3556_v44  ;;  %v3848_v58 = vadd.f32 %v3847_v4, %v3846_v6  ;;  %v3854_v20 = vrot.slane %v3853_v43, 4  ;;  %v6581_v15 = vld [vmem:[#allocation7_spill] sm:$0xff] }
 0x3db   : > { %v3230_v2 = vadd.f32 %v3229_v54, %v3228_v31  ;;  %v3565_v53 = vadd.f32 %v3564_v45, %v3563_v47  ;;  %v3842_v18 = vrot.slane %v3841_v8, 2  ;;  %v3861_v30 = vrot.slane %v3860_v11, 4  ;;  %v6582_v45 = vld [vmem:[#allocation11_spill] sm:$0xff] }
 0x3dc   : > { %v3224_v50 = vrot.slane %v3223_v10, 1  ;;  %v3559_v56 = vrot.slane %v3558_v61, 1  ;;  %v3849_v49 = vrot.slane %v3848_v58, 2  ;;  %v3855_v23 = vadd.f32 %v3854_v20, %v3853_v43 }
 0x3dd   : > { %v3231_v12 = vrot.slane %v3230_v2, 1  ;;  %v3566_v48 = vrot.slane %v3565_v53, 1  ;;  %v3843_v63 = vadd.f32 %v3842_v18, %v3841_v8  ;;  %v3862_v32 = vadd.f32 %v3861_v30, %v3860_v11 }
 0x3de   : > { %v3225_v39 = vadd.f32 %v3224_v50, %v3223_v10  ;;  %v3560_v59 = vadd.f32 %v3559_v56, %v3558_v61  ;;  %v3850_v21 = vadd.f32 %v3849_v49, %v3848_v58  ;;  %v3856_v3 = vrot.slane %v3855_v23, 2  ;;  %v6584_v61 = vld [vmem:[#allocation12_spill] sm:$0xff] }
 0x3df   : > { %v3232_v13 = vadd.f32 %v3231_v12, %v3230_v2  ;;  %v3567_v36 = vadd.f32 %v3566_v48, %v3565_v53  ;;  %v3844_v60 = vrot.slane %v3843_v63, 1  ;;  %v3863_v42 = vrot.slane %v3862_v32, 2 }
 0x3e0   : > { %v3247_v34 = vmul.f32 %v6555_v1, %v3225_v39  ;;  %v3582_v0 = vmul.f32 %v6556_v19, %v3560_v59  ;;  %v3851_v52 = vrot.slane %v3850_v21, 1  ;;  %v3857_v9 = vadd.f32 %v3856_v3, %v3855_v23  ;;  %v3940_v3 = vld [vmem:[#allocation2 + $0x20] sm:$0xff] }
 0x3e1   : > { %v3248_v40 = vmul.f32 %v6557_v27, %v3232_v13  ;;  %v3583_v44 = vmul.f32 %v6558_v57, %v3567_v36  ;;  %v3845_v31 = vadd.f32 %v3844_v60, %v3843_v63  ;;  %v3864_v6 = vadd.f32 %v3863_v42, %v3862_v32 }
 0x3e2   : > { %v3261_v33 = vrot.slane %v3247_v34, 5  ;;  %v3597_v26 = vrot.slane %v3582_v0, 1  ;;  %v3852_v62 = vadd.f32 %v3851_v52, %v3850_v21  ;;  %v3858_v47 = vrot.slane %v3857_v9, 1 }
 0x3e3   : > { %v3267_v35 = vrot.slane %v3248_v40, 5  ;;  %v3604_v22 = vrot.slane %v3583_v44, 1  ;;  %v3903_v24 = vmul.f32 %v6580_v16, %v3845_v31  ;;  %v3865_v19 = vrot.slane %v3864_v6, 1 }
 0x3e4   : > { %v3262_v1 = vsel %vm1282_vm7, %v3261_v33, %v6287_v28  ;;  %v3598_v27 = vsel %vm1619_vm8, %v3597_v26, %v6294_v46  ;;  %v3904_v54 = vmul.f32 %v6581_v15, %v3852_v62  ;;  %v3859_v4 = vadd.f32 %v3858_v47, %v3857_v9 }
 0x3e5   : > { %3271 = vst [vmem:[#allocation2 + $0x30] sm:$0xf] %v3262_v1  ;;  %v3268_v57 = vsel %vm1282_vm7, %v3267_v35, %v6297_v51  ;;  %3608 = vst [vmem:[#allocation2 + $0x30] sm:$0xf0] %v3598_v27  ;;  %v3605_v43 = vsel %vm1619_vm8, %v3604_v22, %v6302_v7  ;;  %v3866_v28 = vadd.f32 %v3865_v19, %v3864_v6  ;;  %v6583_v51 = vld [vmem:[#allocation18_spill] sm:$0xff] }
 0x3e6   : > { %3272 = vst [vmem:[#allocation2 + $0x38] sm:$0xf] %v3268_v57  ;;  %v3831_v10 = vmul.f32 %v6184_v17, %v6571_v37  ;;  %v3832_v8 = vmul.f32 %v6582_v45, %v6572_v29  ;;  %3609 = vst [vmem:[#allocation2 + $0x38] sm:$0xf0] %v3605_v43  ;;  %v3905_v46 = vmul.f32 %v6580_v16, %v3859_v4 }
 0x3e7   : > { %v3833_v11 = vmul.f32 %v6583_v51, %v6573_v14  ;;  %v3834_v2 = vmul.f32 %v6584_v61, %v6574_v25  ;;  %v3835_v58 = vmul.f32 %v6196_v38, %v6571_v37  ;;  %v3906_v7 = vmul.f32 %v6581_v15, %v3866_v28  ;;  %v4038_v61 = vpop.permute.xlu0 %4037 }
 0x3e8   : > { %v3836_v17 = vmul.f32 %v6200_v55, %v6572_v29  ;;  %v3837_v20 = vmul.f32 %v6206_v5, %v6573_v14  ;;  %v3838_v50 = vmul.f32 %v6212_v41, %v6574_v25  ;;  %v3919_v53 = vrot.slane %v3905_v46, 7  ;;  %v3941_v41 = vld [vmem:[#allocation2 + $0x28] sm:$0xff] }
 0x3e9   : > { %v3867_v18 = vadd.f32 %v3833_v11, %v3831_v10  ;;  %v3874_v30 = vadd.f32 %v3834_v2, %v3832_v8  ;;  %v3925_v56 = vrot.slane %v3906_v7, 7  ;;  %v4030_v8 = vpop.permute.xlu1 %4029 }
 0x3ea   : > { %v3881_v12 = vadd.f32 %v3837_v20, %v3835_v58  ;;  %v3888_v49 = vadd.f32 %v3838_v50, %v3836_v17  ;;  %v3920_v23 = vsel %vm1276_vm6, %v3919_v53, %v3903_v24 }
 0x3eb   : > { %v3868_v38 = vrot.slane %v3867_v18, 4  ;;  %v3875_v37 = vrot.slane %v3874_v30, 4  ;;  %v3926_v39 = vsel %vm1276_vm6, %v3925_v56, %v3904_v54 }
 0x3ec   : > { %v3882_v48 = vrot.slane %v3881_v12, 4  ;;  %v3889_v55 = vrot.slane %v3888_v49, 4  ;;  %v3942_v5 = vld [vmem:[#allocation2 + $0x30] sm:$0xff] }
 0x3ed   : > { %v3869_v29 = vadd.f32 %v3868_v38, %v3867_v18  ;;  %v3876_v63 = vadd.f32 %v3875_v37, %v3874_v30  ;;  %v3943_v25 = vld [vmem:[#allocation2 + $0x38] sm:$0xff]  ;;  %v4257_v60 = vpack.c.bf16 %v3942_v5, %v3940_v3 }
 0x3ee   : > { %v3883_v14 = vadd.f32 %v3882_v48, %v3881_v12  ;;  %v3890_v32 = vadd.f32 %v3889_v55, %v3888_v49  ;;  %v4255_v21 = vpack.c.bf16 %v3943_v25, %v3941_v41 }
 0x3ef   : > { %v3870_v59 = vrot.slane %v3869_v29, 2  ;;  %v3877_v13 = vrot.slane %v3876_v63, 2 }
 0x3f0   : > { %v3884_v34 = vrot.slane %v3883_v14, 2  ;;  %v3891_v36 = vrot.slane %v3890_v32, 2  ;;  %4256 = vmatprep.subr.bf16.mxu0 %v4255_v21 }
 0x3f1   : > { %v3871_v42 = vadd.f32 %v3870_v59, %v3869_v29  ;;  %v3878_v0 = vadd.f32 %v3877_v13, %v3876_v63  ;;  %4258 = vmatpush1.bf16.msra.mxu0 %v4257_v60 }
 0x3f2   : > { %v3885_v40 = vadd.f32 %v3884_v34, %v3883_v14  ;;  %v3892_v52 = vadd.f32 %v3891_v36, %v3890_v32 }
 0x3f3   : > { %v3872_v9 = vrot.slane %v3871_v42, 1  ;;  %v3879_v33 = vrot.slane %v3878_v0, 1 }
 0x3f4   : > { %v3886_v44 = vrot.slane %v3885_v40, 1  ;;  %v3893_v31 = vrot.slane %v3892_v52, 1 }
 0x3f5   : > { %v3873_v6 = vadd.f32 %v3872_v9, %v3871_v42  ;;  %v3880_v26 = vadd.f32 %v3879_v33, %v3878_v0 }
 0x3f6   : > { %v3887_v35 = vadd.f32 %v3886_v44, %v3885_v40  ;;  %v3894_v62 = vadd.f32 %v3893_v31, %v3892_v52 }
 0x3f7   : > { %v3907_v47 = vmul.f32 %v6580_v16, %v3873_v6  ;;  %v3908_v1 = vmul.f32 %v6581_v15, %v3880_v26 }
 0x3f8   : > { %v3909_v22 = vmul.f32 %v6580_v16, %v3887_v35  ;;  %v3910_v24 = vmul.f32 %v6581_v15, %v3894_v62  ;;  %v3935_v16 = vld [vmem:[%s6425_s5] sm:$0xf] }
 0x3f9   : > { %v3921_v19 = vrot.slane %v3907_v47, 6  ;;  %v3927_v27 = vrot.slane %v3908_v1, 6 }
 0x3fa   : > { %v3923_v57 = vrot.slane %v3909_v22, 5  ;;  %v3929_v54 = vrot.slane %v3910_v24, 5 }
 0x3fb   : > { %v3922_v4 = vsel %vm1279_vm15, %v3921_v19, %v3920_v23  ;;  %v3928_v43 = vsel %vm1279_vm15, %v3927_v27, %v3926_v39 }
 0x3fc   : > { %v3924_v28 = vsel %vm1282_vm7, %v3923_v57, %v3922_v4  ;;  %v3930_v10 = vsel %vm1282_vm7, %v3929_v54, %v3928_v43 }
 0x3fd   : > { %3933 = vst [vmem:[#allocation2 + $0x40] sm:$0xf] %v3924_v28  ;;  %3934 = vst [vmem:[#allocation2 + $0x48] sm:$0xf] %v3930_v10 }
 0x404   : > { %v3945_v45 = vld [vmem:[#allocation2 + $0x48] sm:$0xf]  ;;  %v3944_v15 = vld [vmem:[#allocation2 + $0x40] sm:$0xf] }
 0x405   : > { %4233 = vmatprep.subr.msk.mxu0 %vm776_vm2, %v3945_v45 }
 0x406   : > { %4234 = vmatpush1.msk.msra.mxu0 %vm776_vm2, %v3944_v15 }
 0x407   : > { %4235 = vmatmul.mubr.msk.f32.vlgmr.msra.gmra.mrb[72].mxu0 %vm763_vm10, %v3935_v16 }
 0x4da   : > { %v4021_v46 = vpop.f32.mrb[72].mxu0 }
 0x4db   : > { %v4032_v51 = vmul.f32 %v4030_v8, %v4021_v46  ;;  %v4023_v11 = vpop.f32.mrb[73].mxu0 }
 0x4dc   : > { %v4033_v2 = vmul.f32 %v4030_v8, %v4023_v11 }
 0x4dd   : > { %v4040_v58 = vadd.f32 %v4038_v61, %v4032_v51 }
 0x4de   : > { %v4041_v7 = vadd.f32 %v4038_v61, %v4033_v2 }
 0x4df   : > { %v4042_v17 = vmax.f32 %v4040_v58, 0.0 }
 0x4e0   : > { %v4043_v20 = vmax.f32 %v4041_v7, 0.0 }
 0x4e2   : > { %v4046_v50 = vcombine.low %v4042_v17, %v4043_v20 }
 0x4e4   : > { %4048 = vst [vmem:[%s343_s16] sm:$0xff] %v4046_v50 }
 0x4e5   : > { %4406 = shalt.err (!%p4403_p5)
}
 0x4e6   : > { %s4407_s26 = scalar_lea.hbm %s6373_s22, 128  ;;  %s4411_s16 = scalar_lea.hbm %s6428_s8, 256 }
 0x4e7   : > { %p4408_p6 = scmp.ne.s32.totalorder %s6373_s22, %s4407_s26  ;;  %p4412_p10 = scmp.lt.u32.totalorder %s6373_s22, %s6428_s8 }
 0x4e8   : > { %p4413_p11 = scmp.lt.u32.totalorder %s4411_s16, %s4407_s26  ;;  %p4415_p13 = scmp.lt.u32.totalorder %s4407_s26, %s6373_s22 }
 0x4e9   : > { %p4409_p7 = pnand %p4408_p6, %p4578_p4 }
 0x4ea   : > { %p4414_p12 = por %p4413_p11, %p4412_p10 }
 0x4eb   : > { %p4410_p9 = pneg %p4409_p7 }
 0x4ec   : > { %p4416_p0 = por %p4415_p13, %p4414_p12 }
 0x4ee   : > { %p4417_p1 = pnand %p4416_p0, %p4410_p9 }
 0x4f0   : > { %4420 = shalt.err (!%p4417_p1)
}
 0x4f1   : > { %4296 = dma.vmem_to_hbm [thread:$0]  (%p4578_p4), %s6375_s19, 128, %s6373_s22, %s4050_s11  }
 0x4f2 PF: > { %p4302_p2 = scmp.ge.s32.totalorder %s4471_s10, 2  ;;  %s4078_s23 = sand.u32 1, %s4451_s27  }
 0x4f3   : > { %s4079_s30 = scalar_lea.sflag [#allocation4], %s4078_s23 }
 0x4f4   : > { %p4299_p3 = pnand %p4302_p2, %p4585_p8 }
 0x4f6   : > { %4446 = dma.done.wait (!%p4299_p3), %s4079_s30, 128  }
 0x4f7   : > { %4448 = vsyncadd (!%p4299_p3), %s4079_s30, 4294967168  ;;  %s21_s10 = sadd.s32 1, %s4471_s10   ;;  %s6585_s27 = smov %s4455_s28 }
 0x4f8   : > { %p18_p5 = scmp.ge.s32.totalorder %s21_s10, 4   ;;  %s6586_s28 = smov %s4459_s29 }
 0x4f9   : > { %s6587_s29 = smov %s4591_s18  ;;  %s6588_s30 = smov %s4467_s9 }
 0x4fa   : > { %s6589_s9 = smov %s6591_s13  ;;  %20 = sbr.rel (!%p18_p5) target bundleno = 4 (0x4), region = 94 }
 0x501   :  { %4084 = vsyncpa [#allocation4], 1 }
 0x502   :  { %4086 = vsyncpa [#allocation4 + $0x1], 1 }

</bundles_post_ra>
